<compile_context>
chip_gen: v5e
topology: v5e:2x2
jax: 0.10.0
libtpu: 0.0.40
codegen_flags: <defaults>
</compile_context>

<pallas_src>
import math

import jax
import jax.numpy as jnp
from jax import lax
from jax.experimental import pallas as pl
from jax.experimental.pallas import tpu as pltpu


# -----------------------------------------------------------------------------
# Hardware-aware VMEM limit / tile budget
# -----------------------------------------------------------------------------
def _vmem_limit_bytes():
    cap = 64 * 1024 * 1024
    try:
        info = pltpu.get_tpu_info()
        cap = int(getattr(info, "vmem_capacity_bytes", cap))
    except Exception:
        pass
    # leave headroom for double buffering + compiler-internal scratch
    return max(32 * 1024 * 1024, min(int(cap * 0.8), 112 * 1024 * 1024))


_VMEM_LIMIT = _vmem_limit_bytes()
_TILE_BUDGET = int(_VMEM_LIMIT * 0.45)


def _cin_tile(cin):
    """Input-channel tile: full when small, else 256 (lane-aligned, fills MXU)."""
    if cin > 256 and cin % 256 == 0:
        return 256
    return cin


def _divisor_row_tiles(h):
    return sorted((t for t in range(8, h, 8) if h % t == 0), reverse=True)


def _conv_row_tile(h, w, cins, cout, budget):
    """Largest output-row tile (multiple of 8 dividing H) fitting the budget."""
    wp = w + 2
    tcs = [_cin_tile(c) for c in cins]

    def est(ht, tiled):
        rows_in = ht if tiled else h + 2
        b = 0
        for tc in tcs:
            b += rows_in * wp * tc * 2 * 2            # main input block (bf16, x2 buf)
            if tiled:
                b += 8 * wp * tc * 2 * 2              # halo block
            b += 9 * tc * cout * 2 * 2                # weight block
        b += ht * w * cout * 2 * 2                    # bf16 output block
        b += ht * w * cout * 4                        # f32 accumulator scratch
        b += (rows_in + 2) * wp * max(tcs) * 2        # window scratch
        b += 3 * ht * w * max(tcs) * 4                # in-kernel temporaries
        return b

    if est(h, False) <= budget:
        return h, False
    cands = _divisor_row_tiles(h)
    for ht in cands:
        if est(ht, True) <= budget:
            return ht, True
    return (cands[-1], True) if cands else (h, False)


def _ew_row_tile(h, w, c, budget):
    def est(ht):
        return ht * w * c * 20  # in/out blocks (x2 buffers) + f32 temporaries

    if est(h) <= budget:
        return h
    cands = _divisor_row_tiles(h)
    for ht in cands:
        if est(ht) <= budget:
            return ht
    return cands[-1] if cands else h


# -----------------------------------------------------------------------------
# Pallas kernels
# -----------------------------------------------------------------------------
def _build_conv_kernel(*, n_src, tiled, ht, wd, cout, tcs, k_lo, k_hi, n_k):
    """3x3 conv (+bias) kernel over multiple channel-sources.

    grid = (N, row_tiles, cin_tiles).  Accumulates into an f32 VMEM scratch over
    the (last, "arbitrary") cin-tile axis; at the last cin tile writes the bf16
    output block plus per-(image, row-tile) channel mean / centered-M2.
    """

    def kernel(*refs):
        mains, halos, wts = [], [], []
        idx = 0
        for _ in range(n_src):
            mains.append(refs[idx]); idx += 1
            if tiled:
                halos.append(refs[idx]); idx += 1
            else:
                halos.append(None)
            wts.append(refs[idx]); idx += 1
        b_ref = refs[idx]; idx += 1
        y_ref, s1_ref, s2_ref = refs[idx], refs[idx + 1], refs[idx + 2]
        acc_ref = refs[idx + 3]
        win_ref = refs[idx + 4] if tiled else None

        k = pl.program_id(2)

        @pl.when(k == 0)
        def _init():
            acc_ref[...] = jnp.zeros(acc_ref.shape, acc_ref.dtype)

        def accumulate(s):
            tc = tcs[s]
            if tiled:
                # assemble the (ht+2)-row window: main rows + 2 halo rows
                win_ref[0:ht, :, 0:tc] = mains[s][0]
                win_ref[ht:ht + 2, :, 0:tc] = halos[s][0, 0:2]
                win = win_ref[:, :, 0:tc]
            else:
                win = mains[s][0]                      # (H+2, W+2, tc)
            part = None
            for dh in range(3):
                for dw in range(3):
                    patch = win[dh:dh + ht, dw:dw + wd, :].reshape(ht * wd, tc)
                    d = jnp.dot(patch, wts[s][dh, dw],
                                preferred_element_type=jnp.float32)
                    part = d if part is None else part + d
            acc_ref[...] += part

        if n_src == 1:
            accumulate(0)
        else:
            for s in range(n_src):
                @pl.when((k >= k_lo[s]) & (k < k_hi[s]))
                def _acc(s=s):
                    accumulate(s)

        @pl.when(k == n_k - 1)
        def _finalize():
            cnt = float(ht * wd)
            yf = acc_ref[...] + b_ref[...]                      # (ht*wd, cout) f32
            mu = jnp.sum(yf, axis=0, keepdims=True) / cnt       # per-tile mean
            dev = yf - mu
            m2 = jnp.sum(dev * dev, axis=0, keepdims=True)      # centered SSQ
            y_ref[...] = yf.reshape(1, ht, wd, cout).astype(y_ref.dtype)
            s1_ref[...] = mu.reshape(1, 1, 1, cout)
            s2_ref[...] = m2.reshape(1, 1, 1, cout)

    return kernel


def _scale_bias_relu_kernel(x_ref, s_ref, b_ref, o_ref):
    c = o_ref.shape[-1]
    x = x_ref[...].astype(jnp.float32)
    y = x * s_ref[...].reshape(1, 1, 1, c) + b_ref[...].reshape(1, 1, 1, c)
    o_ref[...] = jnp.maximum(y, 0.0).astype(o_ref.dtype)


def _conv1x1_kernel(x_ref, w_ref, b_ref, o_ref):
    _, ht, wd, cout = o_ref.shape
    cin = x_ref.shape[-1]
    xm = x_ref[0].reshape(ht * wd, cin)
    y = jnp.dot(xm, w_ref[...], preferred_element_type=jnp.float32) + b_ref[...]
    o_ref[...] = y.reshape(1, ht, wd, cout).astype(o_ref.dtype)


# -----------------------------------------------------------------------------
# Pallas wrappers
# -----------------------------------------------------------------------------
def conv3x3_pallas(inputs, weights, bias, *, out_dtype=jnp.bfloat16, row_tile=None):
    """3x3 'same' conv (+bias) over the channel-concatenation of `inputs`.

    inputs : list of (N,H,W,C_s) arrays (skip-concat fused: contributions summed)
    weights: list of (3,3,C_s,Cout) HWIO slices;  bias: (Cout,) f32
    Returns (y, tile_mean, tile_m2) where tile_* are (N, R, 1, Cout) f32 partial
    BatchNorm statistics (per image, per row-tile).
    """
    n_src = len(inputs)
    N, H, W, _ = inputs[0].shape
    cout = int(weights[0].shape[-1])
    cins = [int(x.shape[-1]) for x in inputs]
    tcs = [_cin_tile(c) for c in cins]
    kcs = [c // t for c, t in zip(cins, tcs)]
    k_lo, k_hi, off = [], [], 0
    for kc in kcs:
        k_lo.append(off)
        off += kc
        k_hi.append(off)
    n_k = off

    if row_tile is None:
        ht, tiled = _conv_row_tile(H, W, cins, cout, _TILE_BUDGET)
    else:
        ht = min(int(row_tile), H)
        tiled = ht < H
    if tiled:
        assert H % ht == 0 and ht % 8 == 0, (H, ht)
    R = H // ht
    wp = W + 2
    tc_max = max(tcs)

    # zero padding for the 3x3 halo; bf16 operands for the MXU (f32 accumulate)
    xs = [jnp.pad(x.astype(jnp.bfloat16), ((0, 0), (1, 1), (1, 1), (0, 0)))
          for x in inputs]
    ws = [w.astype(jnp.bfloat16) for w in weights]
    b2 = bias.astype(jnp.float32).reshape(1, cout)

    in_specs, args = [], []
    for s in range(n_src):
        tc = tcs[s]
        kl, kc = k_lo[s], kcs[s]

        def kk(k, kl=kl, kc=kc):           # clamp -> no re-fetch while inactive
            return jnp.clip(k - kl, 0, kc - 1)

        if tiled:
            hb = ht // 8
            in_specs.append(pl.BlockSpec(
                (1, ht, wp, tc), lambda n, i, k, kk=kk: (n, i, 0, kk(k))))
            args.append(xs[s])
            in_specs.append(pl.BlockSpec(  # 8-row block holding the 2 halo rows
                (1, 8, wp, tc),
                lambda n, i, k, kk=kk, hb=hb: (n, (i + 1) * hb, 0, kk(k))))
            args.append(xs[s])
        else:
            in_specs.append(pl.BlockSpec(
                (1, H + 2, wp, tc), lambda n, i, k, kk=kk: (n, 0, 0, kk(k))))
            args.append(xs[s])
        in_specs.append(pl.BlockSpec(
            (3, 3, tc, cout), lambda n, i, k, kk=kk: (0, 0, kk(k), 0)))
        args.append(ws[s])
    in_specs.append(pl.BlockSpec((1, cout), lambda n, i, k: (0, 0)))
    args.append(b2)

    out_shape = (
        jax.ShapeDtypeStruct((N, H, W, cout), out_dtype),
        jax.ShapeDtypeStruct((N, R, 1, cout), jnp.float32),
        jax.ShapeDtypeStruct((N, R, 1, cout), jnp.float32),
    )
    out_specs = (
        pl.BlockSpec((1, ht, W, cout), lambda n, i, k: (n, i, 0, 0)),
        pl.BlockSpec((1, 1, 1, cout), lambda n, i, k: (n, i, 0, 0)),
        pl.BlockSpec((1, 1, 1, cout), lambda n, i, k: (n, i, 0, 0)),
    )
    scratch_shapes = [pltpu.VMEM((ht * W, cout), jnp.float32)]
    if tiled:
        scratch_shapes.append(pltpu.VMEM((ht + 2, wp, tc_max), jnp.bfloat16))

    kernel = _build_conv_kernel(n_src=n_src, tiled=tiled, ht=ht, wd=W, cout=cout,
                                tcs=tcs, k_lo=k_lo, k_hi=k_hi, n_k=n_k)

    return pl.pallas_call(
        kernel,
        out_shape=out_shape,
        grid_spec=pltpu.PrefetchScalarGridSpec(
            num_scalar_prefetch=0,
            grid=(N, R, n_k),
            in_specs=in_specs,
            out_specs=out_specs,
            scratch_shapes=scratch_shapes),
        compiler_params=pltpu.CompilerParams(
            dimension_semantics=("parallel", "parallel", "arbitrary"),
            vmem_limit_bytes=_VMEM_LIMIT),
    )(*args)


def scale_bias_relu_pallas(x, scale, shift, *, out_dtype=jnp.bfloat16):
    N, H, W, C = x.shape
    ht = _ew_row_tile(H, W, C, _TILE_BUDGET)
    R = H // ht
    return pl.pallas_call(
        _scale_bias_relu_kernel,
        out_shape=jax.ShapeDtypeStruct((N, H, W, C), out_dtype),
        grid_spec=pltpu.PrefetchScalarGridSpec(
            num_scalar_prefetch=0,
            grid=(N, R),
            in_specs=[
                pl.BlockSpec((1, ht, W, C), lambda n, i: (n, i, 0, 0)),
                pl.BlockSpec((1, C), lambda n, i: (0, 0)),
                pl.BlockSpec((1, C), lambda n, i: (0, 0)),
            ],
            out_specs=pl.BlockSpec((1, ht, W, C), lambda n, i: (n, i, 0, 0))),
        compiler_params=pltpu.CompilerParams(
            dimension_semantics=("parallel", "parallel"),
            vmem_limit_bytes=_VMEM_LIMIT),
    )(x, scale.reshape(1, C).astype(jnp.float32),
      shift.reshape(1, C).astype(jnp.float32))


def conv1x1_pallas(x, w, b):
    N, H, W, Cin = x.shape
    Cout = int(w.shape[-1])
    ht = _ew_row_tile(H, W, max(Cin, Cout), _TILE_BUDGET)
    R = H // ht
    return pl.pallas_call(
        _conv1x1_kernel,
        out_shape=jax.ShapeDtypeStruct((N, H, W, Cout), jnp.float32),
        grid_spec=pltpu.PrefetchScalarGridSpec(
            num_scalar_prefetch=0,
            grid=(N, R),
            in_specs=[
                pl.BlockSpec((1, ht, W, Cin), lambda n, i: (n, i, 0, 0)),
                pl.BlockSpec((Cin, Cout), lambda n, i: (0, 0)),
                pl.BlockSpec((1, Cout), lambda n, i: (0, 0)),
            ],
            out_specs=pl.BlockSpec((1, ht, W, Cout), lambda n, i: (n, i, 0, 0))),
        compiler_params=pltpu.CompilerParams(
            dimension_semantics=("parallel", "parallel"),
            vmem_limit_bytes=_VMEM_LIMIT),
    )(x.astype(jnp.bfloat16), w.astype(jnp.bfloat16),
      b.reshape(1, Cout).astype(jnp.float32))


# -----------------------------------------------------------------------------
# UNet building blocks
# -----------------------------------------------------------------------------
def conv_bn_relu(inputs, weights, bias, gamma, beta, *, eps=1e-5,
                 out_dtype=jnp.bfloat16, row_tile=None):
    y, mu_t, m2_t = conv3x3_pallas(inputs, weights, bias, row_tile=row_tile)
    N, H, W, C = y.shape
    R = mu_t.shape[1]
    tile_cnt = (H // R) * W
    mu_t = mu_t.reshape(N * R, C)
    m2_t = m2_t.reshape(N * R, C)
    mean = jnp.mean(mu_t, axis=0)                       # equal-count tiles
    m2 = jnp.sum(m2_t, axis=0) + tile_cnt * jnp.sum((mu_t - mean) ** 2, axis=0)
    var = jnp.maximum(m2 / float(N * H * W), 0.0)       # biased var (train BN)
    inv = lax.rsqrt(var + eps)
    scale = gamma * inv
    shift = beta - mean * scale
    return scale_bias_relu_pallas(y, scale, shift, out_dtype=out_dtype)


def double_conv(inputs, p):
    x = conv_bn_relu(inputs, p["w1"], p["b1"], p["g1"], p["bt1"])
    x = conv_bn_relu([x], p["w2"], p["b2"], p["g2"], p["bt2"])
    return x


def maxpool2x2(x):  # NHWC, kernel 2 stride 2
    N, H, W, C = x.shape
    return jnp.max(x.reshape(N, H // 2, 2, W // 2, 2, C), axis=(2, 4))


def _interp_matrix(si, so):
    if si == 1:
        return jnp.ones((so, 1), jnp.float32)
    c = jnp.arange(so, dtype=jnp.float32) * ((si - 1) / (so - 1))
    i0 = jnp.clip(jnp.floor(c).astype(jnp.int32), 0, si - 1)
    i1 = jnp.clip(i0 + 1, 0, si - 1)
    f = c - i0.astype(jnp.float32)
    return (jax.nn.one_hot(i0, si, dtype=jnp.float32) * (1.0 - f)[:, None]
            + jax.nn.one_hot(i1, si, dtype=jnp.float32) * f[:, None])


def upsample_bilinear_x2(x):
    # nn.Upsample(scale_factor=2, mode='bilinear', align_corners=True) as two
    # small dense interpolation matmuls (no gather lowering, no big temporaries).
    N, H, W, C = x.shape
    mh = _interp_matrix(H, 2 * H)
    mw = _interp_matrix(W, 2 * W)
    y = jnp.einsum("oh,nhwc->nowc", mh, x.astype(jnp.float32))
    y = jnp.einsum("pw,nowc->nopc", mw, y)
    return y.astype(jnp.bfloat16)


# -----------------------------------------------------------------------------
# Parameter init (deterministic; mimics PyTorch default uniform bounds)
# -----------------------------------------------------------------------------
def init_block(key, cins, cout):
    """cins: list of input-channel slices (their sum = the module's in_channels)."""
    ks = jax.random.split(key, 4)
    cin_total = sum(cins)
    b1v = 1.0 / math.sqrt(cin_total * 9.0)
    w1_full = jax.random.uniform(ks[0], (3, 3, cin_total, cout), jnp.float32, -b1v, b1v)
    b1 = jax.random.uniform(ks[1], (cout,), jnp.float32, -b1v, b1v)
    b2v = 1.0 / math.sqrt(cout * 9.0)
    w2 = jax.random.uniform(ks[2], (3, 3, cout, cout), jnp.float32, -b2v, b2v)
    b2 = jax.random.uniform(ks[3], (cout,), jnp.float32, -b2v, b2v)
    offs = [0]
    for c in cins:
        offs.append(offs[-1] + c)
    w1 = [w1_full[:, :, offs[i]:offs[i + 1], :] for i in range(len(cins))]
    return dict(w1=w1, b1=b1, g1=jnp.ones((cout,), jnp.float32),
                bt1=jnp.zeros((cout,), jnp.float32),
                w2=[w2], b2=b2, g2=jnp.ones((cout,), jnp.float32),
                bt2=jnp.zeros((cout,), jnp.float32))


def init_unet_params(key, in_channels, out_channels):
    ks = jax.random.split(key, 10)
    params = {
        "down1": init_block(ks[0], [in_channels], 64),
        "down2": init_block(ks[1], [64], 128),
        "down3": init_block(ks[2], [128], 256),
        "down4": init_block(ks[3], [256], 512),
        "down5": init_block(ks[4], [512], 1024),
        # up blocks take [upsampled, skip] -- concat fused into the conv
        "up4": init_block(ks[5], [1024, 512], 512),
        "up3": init_block(ks[6], [512, 256], 256),
        "up2": init_block(ks[7], [256, 128], 128),
        "up1": init_block(ks[8], [128, 64], 64),
    }
    bound = 1.0 / math.sqrt(64.0)
    kf1, kf2 = jax.random.split(ks[9])
    params["wfin"] = jax.random.uniform(kf1, (64, out_channels), jnp.float32, -bound, bound)
    params["bfin"] = jax.random.uniform(kf2, (out_channels,), jnp.float32, -bound, bound)
    return params


# -----------------------------------------------------------------------------
# Forward pass
# -----------------------------------------------------------------------------
@jax.jit
def unet_forward(x_nchw, params):
    x = jnp.transpose(x_nchw, (0, 2, 3, 1)).astype(jnp.bfloat16)  # NCHW -> NHWC

    conv1 = double_conv([x], params["down1"])
    conv2 = double_conv([maxpool2x2(conv1)], params["down2"])
    conv3 = double_conv([maxpool2x2(conv2)], params["down3"])
    conv4 = double_conv([maxpool2x2(conv3)], params["down4"])
    conv5 = double_conv([maxpool2x2(conv4)], params["down5"])

    x = double_conv([upsample_bilinear_x2(conv5), conv4], params["up4"])
    x = double_conv([upsample_bilinear_x2(x), conv3], params["up3"])
    x = double_conv([upsample_bilinear_x2(x), conv2], params["up2"])
    x = double_conv([upsample_bilinear_x2(x), conv1], params["up1"])

    out = conv1x1_pallas(x, params["wfin"], params["bfin"])
    return jnp.transpose(out, (0, 3, 1, 2))  # NHWC -> NCHW


if __name__ == "__main__":
    key = jax.random.PRNGKey(0)
    k_xa, k_xb, k_w, k_b, k_p, k_in = jax.random.split(key, 6)

    # 1) Self-check of the conv kernel's row-tiled / halo / dual-source /
    #    channel-tiled path against lax.conv (bf16 operands, f32 accumulation).
    hh = ww = 16
    ca, cb, co = 512, 64, 128
    xa = jax.random.normal(k_xa, (2, hh, ww, ca), jnp.float32).astype(jnp.bfloat16)
    xb = jax.random.normal(k_xb, (2, hh, ww, cb), jnp.float32).astype(jnp.bfloat16)
    wfull = (jax.random.normal(k_w, (3, 3, ca + cb, co), jnp.float32)
             / math.sqrt(9.0 * (ca + cb)))
    wfull = wfull.astype(jnp.bfloat16).astype(jnp.float32)  # bf16-representable
    bias = jax.random.normal(k_b, (co,), jnp.float32) * 0.1
    wa, wb = wfull[:, :, :ca, :], wfull[:, :, ca:, :]
    y, _, _ = conv3x3_pallas([xa, xb], [wa, wb], bias, row_tile=8)
    y = jax.block_until_ready(y)
    ref = lax.conv_general_dilated(
        jnp.concatenate([xa, xb], axis=-1).astype(jnp.float32), wfull,
        window_strides=(1, 1), padding=((1, 1), (1, 1)),
        dimension_numbers=("NHWC", "HWIO", "NHWC")) + bias
    err = float(jnp.max(jnp.abs(y.astype(jnp.float32) - ref)))
    assert err < 5e-2, f"conv3x3 self-check failed: max abs err {err}"

    # 2) Full UNet forward at small shapes.
    N, in_ch, out_ch, hw = 2, 4, 3, 16
    params = init_unet_params(k_p, in_ch, out_ch)
    x = jax.random.normal(k_in, (N, in_ch, hw, hw), jnp.float32)
    out = jax.block_until_ready(unet_forward(x, params))
    assert out.shape == (N, out_ch, hw, hw), out.shape
    assert bool(jnp.all(jnp.isfinite(out)))
    print("KERNEL_OK")
</pallas_src>

<mosaic_0001>
module attributes {stable_mosaic.version = 11 : i64} {
  func.func @kernel(%arg0: i32, %arg1: i32, %arg2: i32, %arg3: memref<1x8x18x256xbf16, #tpu.memory_space<vmem>>, %arg4: memref<1x8x18x256xbf16, #tpu.memory_space<vmem>>, %arg5: memref<3x3x256x128xbf16, #tpu.memory_space<vmem>>, %arg6: memref<1x8x18x64xbf16, #tpu.memory_space<vmem>>, %arg7: memref<1x8x18x64xbf16, #tpu.memory_space<vmem>>, %arg8: memref<3x3x64x128xbf16, #tpu.memory_space<vmem>>, %arg9: memref<1x128xf32, #tpu.memory_space<vmem>>, %arg10: memref<1x8x16x128xbf16, #tpu.memory_space<vmem>>, %arg11: memref<1x1x1x128xf32, #tpu.memory_space<vmem>>, %arg12: memref<1x1x1x128xf32, #tpu.memory_space<vmem>>, %arg13: memref<128x128xf32, #tpu.memory_space<vmem>>, %arg14: memref<10x18x256xbf16, #tpu.memory_space<vmem>>) attributes {dimension_semantics = [#tpu.dimension_semantics<parallel>, #tpu.dimension_semantics<parallel>, #tpu.dimension_semantics<arbitrary>], iteration_bounds = array<i64: 2, 2, 3>, scalar_prefetch = 0 : i64, scratch_operands = 2 : i64, tpu.core_type = #tpu.core_type<tc>, window_params = [{transform_indices = @transform_0, window_bounds = array<i64: 1, 8, 18, 256>}, {transform_indices = @transform_1, window_bounds = array<i64: 1, 8, 18, 256>}, {transform_indices = @transform_2, window_bounds = array<i64: 3, 3, 256, 128>}, {transform_indices = @transform_3, window_bounds = array<i64: 1, 8, 18, 64>}, {transform_indices = @transform_4, window_bounds = array<i64: 1, 8, 18, 64>}, {transform_indices = @transform_5, window_bounds = array<i64: 3, 3, 64, 128>}, {pipeline_mode = #tpu.pipeline_mode<synchronous>, transform_indices = @transform_6, window_bounds = array<i64: 1, 128>}, {transform_indices = @transform_7, window_bounds = array<i64: 1, 8, 16, 128>}, {transform_indices = @transform_8, window_bounds = array<i64: 1, 1, 1, 128>}, {transform_indices = @transform_9, window_bounds = array<i64: 1, 1, 1, 128>}]} {
    %c0_i32 = arith.constant 0 : i32
    %0 = arith.cmpi eq, %arg2, %c0_i32 : i32
    %1 = arith.extui %0 : i1 to i32
    %c0_i32_0 = arith.constant 0 : i32
    %2 = arith.cmpi ne, %1, %c0_i32_0 : i32
    scf.if %2 {
      %cst = arith.constant 0.000000e+00 : f32
      %16 = vector.broadcast %cst : f32 to vector<128x128xf32>
      %c0 = arith.constant 0 : index
      %c0_7 = arith.constant 0 : index
      %17 = vector.load %arg13[%c0, %c0_7] : memref<128x128xf32, #tpu.memory_space<vmem>>, vector<128x128xf32>
      tpu.vector_store %arg13[%c0, %c0_7], %16 {strides = array<i32>} : memref<128x128xf32, #tpu.memory_space<vmem>>, vector<128x128xf32>,
    } else {
    }
    %c0_i32_1 = arith.constant 0 : i32
    %3 = arith.cmpi sge, %arg2, %c0_i32_1 : i32
    %c2_i32 = arith.constant 2 : i32
    %4 = arith.cmpi slt, %arg2, %c2_i32 : i32
    %5 = arith.andi %3, %4 : i1
    %6 = arith.extui %5 : i1 to i32
    %c0_i32_2 = arith.constant 0 : i32
    %7 = arith.cmpi ne, %6, %c0_i32_2 : i32
    scf.if %7 {
      %c0 = arith.constant 0 : index
      %c0_7 = arith.constant 0 : index
      %c0_8 = arith.constant 0 : index
      %c0_9 = arith.constant 0 : index
      %16 = vector.load %arg3[%c0, %c0_7, %c0_8, %c0_9] : memref<1x8x18x256xbf16, #tpu.memory_space<vmem>>, vector<1x8x18x256xbf16>
      %17 = vector.shape_cast %16 : vector<1x8x18x256xbf16> to vector<8x18x256xbf16>
      %c0_10 = arith.constant 0 : index
      %c0_11 = arith.constant 0 : index
      %c0_12 = arith.constant 0 : index
      %18 = vector.load %arg14[%c0_10, %c0_11, %c0_12] : memref<10x18x256xbf16, #tpu.memory_space<vmem>>, vector<8x18x256xbf16>
      tpu.vector_store %arg14[%c0_10, %c0_11, %c0_12], %17 {strides = array<i32>} : memref<10x18x256xbf16, #tpu.memory_space<vmem>>, vector<8x18x256xbf16>,
      %c0_13 = arith.constant 0 : index
      %c0_14 = arith.constant 0 : index
      %c0_15 = arith.constant 0 : index
      %c0_16 = arith.constant 0 : index
      %19 = vector.load %arg4[%c0_13, %c0_14, %c0_15, %c0_16] : memref<1x8x18x256xbf16, #tpu.memory_space<vmem>>, vector<1x2x18x256xbf16>
      %20 = vector.shape_cast %19 : vector<1x2x18x256xbf16> to vector<2x18x256xbf16>
      %c8 = arith.constant 8 : index
      %c0_17 = arith.constant 0 : index
      %c0_18 = arith.constant 0 : index
      %21 = vector.load %arg14[%c8, %c0_17, %c0_18] : memref<10x18x256xbf16, #tpu.memory_space<vmem>>, vector<2x18x256xbf16>
      tpu.vector_store %arg14[%c8, %c0_17, %c0_18], %20 {strides = array<i32>} : memref<10x18x256xbf16, #tpu.memory_space<vmem>>, vector<2x18x256xbf16>,
      %c0_19 = arith.constant 0 : index
      %c0_20 = arith.constant 0 : index
      %c0_21 = arith.constant 0 : index
      %22 = vector.load %arg14[%c0_19, %c0_20, %c0_21] : memref<10x18x256xbf16, #tpu.memory_space<vmem>>, vector<10x18x256xbf16>
      %23 = vector.extract_strided_slice %22 {offsets = [0, 0, 0], sizes = [8, 16, 256], strides = [1, 1, 1]} : vector<10x18x256xbf16> to vector<8x16x256xbf16>
      %24 = vector.shape_cast %23 : vector<8x16x256xbf16> to vector<128x256xbf16>
      %c0_22 = arith.constant 0 : index
      %c0_23 = arith.constant 0 : index
      %c0_24 = arith.constant 0 : index
      %c0_25 = arith.constant 0 : index
      %25 = vector.load %arg5[%c0_22, %c0_23, %c0_24, %c0_25] : memref<3x3x256x128xbf16, #tpu.memory_space<vmem>>, vector<1x1x256x128xbf16>
      %26 = vector.shape_cast %25 : vector<1x1x256x128xbf16> to vector<256x128xbf16>
      %cst = arith.constant dense<0.000000e+00> : vector<128x128xf32>
      %27 = tpu.matmul %24, %26, %cst {dimension_numbers = #tpu.dot_dimension_numbers<[1], [0], [0], [1], [0, 0, 1, 1], [], []>} : vector<128x256xbf16>, vector<256x128xbf16>, vector<128x128xf32> -> vector<128x128xf32>
      %28 = vector.extract_strided_slice %22 {offsets = [0, 1, 0], sizes = [8, 16, 256], strides = [1, 1, 1]} : vector<10x18x256xbf16> to vector<8x16x256xbf16>
      %29 = vector.shape_cast %28 : vector<8x16x256xbf16> to vector<128x256xbf16>
      %c0_26 = arith.constant 0 : index
      %c1 = arith.constant 1 : index
      %c0_27 = arith.constant 0 : index
      %c0_28 = arith.constant 0 : index
      %30 = vector.load %arg5[%c0_26, %c1, %c0_27, %c0_28] : memref<3x3x256x128xbf16, #tpu.memory_space<vmem>>, vector<1x1x256x128xbf16>
      %31 = vector.shape_cast %30 : vector<1x1x256x128xbf16> to vector<256x128xbf16>
      %cst_29 = arith.constant dense<0.000000e+00> : vector<128x128xf32>
      %32 = tpu.matmul %29, %31, %cst_29 {dimension_numbers = #tpu.dot_dimension_numbers<[1], [0], [0], [1], [0, 0, 1, 1], [], []>} : vector<128x256xbf16>, vector<256x128xbf16>, vector<128x128xf32> -> vector<128x128xf32>
      %33 = arith.addf %27, %32 : vector<128x128xf32>
      %34 = vector.extract_strided_slice %22 {offsets = [0, 2, 0], sizes = [8, 16, 256], strides = [1, 1, 1]} : vector<10x18x256xbf16> to vector<8x16x256xbf16>
      %35 = vector.shape_cast %34 : vector<8x16x256xbf16> to vector<128x256xbf16>
      %c0_30 = arith.constant 0 : index
      %c2 = arith.constant 2 : index
      %c0_31 = arith.constant 0 : index
      %c0_32 = arith.constant 0 : index
      %36 = vector.load %arg5[%c0_30, %c2, %c0_31, %c0_32] : memref<3x3x256x128xbf16, #tpu.memory_space<vmem>>, vector<1x1x256x128xbf16>
      %37 = vector.shape_cast %36 : vector<1x1x256x128xbf16> to vector<256x128xbf16>
      %cst_33 = arith.constant dense<0.000000e+00> : vector<128x128xf32>
      %38 = tpu.matmul %35, %37, %cst_33 {dimension_numbers = #tpu.dot_dimension_numbers<[1], [0], [0], [1], [0, 0, 1, 1], [], []>} : vector<128x256xbf16>, vector<256x128xbf16>, vector<128x128xf32> -> vector<128x128xf32>
      %39 = arith.addf %33, %38 : vector<128x128xf32>
      %40 = vector.extract_strided_slice %22 {offsets = [1, 0, 0], sizes = [8, 16, 256], strides = [1, 1, 1]} : vector<10x18x256xbf16> to vector<8x16x256xbf16>
      %41 = vector.shape_cast %40 : vector<8x16x256xbf16> to vector<128x256xbf16>
      %c1_34 = arith.constant 1 : index
      %c0_35 = arith.constant 0 : index
      %c0_36 = arith.constant 0 : index
      %c0_37 = arith.constant 0 : index
      %42 = vector.load %arg5[%c1_34, %c0_35, %c0_36, %c0_37] : memref<3x3x256x128xbf16, #tpu.memory_space<vmem>>, vector<1x1x256x128xbf16>
      %43 = vector.shape_cast %42 : vector<1x1x256x128xbf16> to vector<256x128xbf16>
      %cst_38 = arith.constant dense<0.000000e+00> : vector<128x128xf32>
      %44 = tpu.matmul %41, %43, %cst_38 {dimension_numbers = #tpu.dot_dimension_numbers<[1], [0], [0], [1], [0, 0, 1, 1], [], []>} : vector<128x256xbf16>, vector<256x128xbf16>, vector<128x128xf32> -> vector<128x128xf32>
      %45 = arith.addf %39, %44 : vector<128x128xf32>
      %46 = vector.extract_strided_slice %22 {offsets = [1, 1, 0], sizes = [8, 16, 256], strides = [1, 1, 1]} : vector<10x18x256xbf16> to vector<8x16x256xbf16>
      %47 = vector.shape_cast %46 : vector<8x16x256xbf16> to vector<128x256xbf16>
      %c1_39 = arith.constant 1 : index
      %c1_40 = arith.constant 1 : index
      %c0_41 = arith.constant 0 : index
      %c0_42 = arith.constant 0 : index
      %48 = vector.load %arg5[%c1_39, %c1_40, %c0_41, %c0_42] : memref<3x3x256x128xbf16, #tpu.memory_space<vmem>>, vector<1x1x256x128xbf16>
      %49 = vector.shape_cast %48 : vector<1x1x256x128xbf16> to vector<256x128xbf16>
      %cst_43 = arith.constant dense<0.000000e+00> : vector<128x128xf32>
      %50 = tpu.matmul %47, %49, %cst_43 {dimension_numbers = #tpu.dot_dimension_numbers<[1], [0], [0], [1], [0, 0, 1, 1], [], []>} : vector<128x256xbf16>, vector<256x128xbf16>, vector<128x128xf32> -> vector<128x128xf32>
      %51 = arith.addf %45, %50 : vector<128x128xf32>
      %52 = vector.extract_strided_slice %22 {offsets = [1, 2, 0], sizes = [8, 16, 256], strides = [1, 1, 1]} : vector<10x18x256xbf16> to vector<8x16x256xbf16>
      %53 = vector.shape_cast %52 : vector<8x16x256xbf16> to vector<128x256xbf16>
      %c1_44 = arith.constant 1 : index
      %c2_45 = arith.constant 2 : index
      %c0_46 = arith.constant 0 : index
      %c0_47 = arith.constant 0 : index
      %54 = vector.load %arg5[%c1_44, %c2_45, %c0_46, %c0_47] : memref<3x3x256x128xbf16, #tpu.memory_space<vmem>>, vector<1x1x256x128xbf16>
      %55 = vector.shape_cast %54 : vector<1x1x256x128xbf16> to vector<256x128xbf16>
      %cst_48 = arith.constant dense<0.000000e+00> : vector<128x128xf32>
      %56 = tpu.matmul %53, %55, %cst_48 {dimension_numbers = #tpu.dot_dimension_numbers<[1], [0], [0], [1], [0, 0, 1, 1], [], []>} : vector<128x256xbf16>, vector<256x128xbf16>, vector<128x128xf32> -> vector<128x128xf32>
      %57 = arith.addf %51, %56 : vector<128x128xf32>
      %58 = vector.extract_strided_slice %22 {offsets = [2, 0, 0], sizes = [8, 16, 256], strides = [1, 1, 1]} : vector<10x18x256xbf16> to vector<8x16x256xbf16>
      %59 = vector.shape_cast %58 : vector<8x16x256xbf16> to vector<128x256xbf16>
      %c2_49 = arith.constant 2 : index
      %c0_50 = arith.constant 0 : index
      %c0_51 = arith.constant 0 : index
      %c0_52 = arith.constant 0 : index
      %60 = vector.load %arg5[%c2_49, %c0_50, %c0_51, %c0_52] : memref<3x3x256x128xbf16, #tpu.memory_space<vmem>>, vector<1x1x256x128xbf16>
      %61 = vector.shape_cast %60 : vector<1x1x256x128xbf16> to vector<256x128xbf16>
      %cst_53 = arith.constant dense<0.000000e+00> : vector<128x128xf32>
      %62 = tpu.matmul %59, %61, %cst_53 {dimension_numbers = #tpu.dot_dimension_numbers<[1], [0], [0], [1], [0, 0, 1, 1], [], []>} : vector<128x256xbf16>, vector<256x128xbf16>, vector<128x128xf32> -> vector<128x128xf32>
      %63 = arith.addf %57, %62 : vector<128x128xf32>
      %64 = vector.extract_strided_slice %22 {offsets = [2, 1, 0], sizes = [8, 16, 256], strides = [1, 1, 1]} : vector<10x18x256xbf16> to vector<8x16x256xbf16>
      %65 = vector.shape_cast %64 : vector<8x16x256xbf16> to vector<128x256xbf16>
      %c2_54 = arith.constant 2 : index
      %c1_55 = arith.constant 1 : index
      %c0_56 = arith.constant 0 : index
      %c0_57 = arith.constant 0 : index
      %66 = vector.load %arg5[%c2_54, %c1_55, %c0_56, %c0_57] : memref<3x3x256x128xbf16, #tpu.memory_space<vmem>>, vector<1x1x256x128xbf16>
      %67 = vector.shape_cast %66 : vector<1x1x256x128xbf16> to vector<256x128xbf16>
      %cst_58 = arith.constant dense<0.000000e+00> : vector<128x128xf32>
      %68 = tpu.matmul %65, %67, %cst_58 {dimension_numbers = #tpu.dot_dimension_numbers<[1], [0], [0], [1], [0, 0, 1, 1], [], []>} : vector<128x256xbf16>, vector<256x128xbf16>, vector<128x128xf32> -> vector<128x128xf32>
      %69 = arith.addf %63, %68 : vector<128x128xf32>
      %70 = vector.extract_strided_slice %22 {offsets = [2, 2, 0], sizes = [8, 16, 256], strides = [1, 1, 1]} : vector<10x18x256xbf16> to vector<8x16x256xbf16>
      %71 = vector.shape_cast %70 : vector<8x16x256xbf16> to vector<128x256xbf16>
      %c2_59 = arith.constant 2 : index
      %c2_60 = arith.constant 2 : index
      %c0_61 = arith.constant 0 : index
      %c0_62 = arith.constant 0 : index
      %72 = vector.load %arg5[%c2_59, %c2_60, %c0_61, %c0_62] : memref<3x3x256x128xbf16, #tpu.memory_space<vmem>>, vector<1x1x256x128xbf16>
      %73 = vector.shape_cast %72 : vector<1x1x256x128xbf16> to vector<256x128xbf16>
      %cst_63 = arith.constant dense<0.000000e+00> : vector<128x128xf32>
      %74 = tpu.matmul %71, %73, %cst_63 {dimension_numbers = #tpu.dot_dimension_numbers<[1], [0], [0], [1], [0, 0, 1, 1], [], []>} : vector<128x256xbf16>, vector<256x128xbf16>, vector<128x128xf32> -> vector<128x128xf32>
      %75 = arith.addf %69, %74 : vector<128x128xf32>
      %c0_64 = arith.constant 0 : index
      %c0_65 = arith.constant 0 : index
      %76 = vector.load %arg13[%c0_64, %c0_65] : memref<128x128xf32, #tpu.memory_space<vmem>>, vector<128x128xf32>
      %77 = arith.addf %76, %75 : vector<128x128xf32>
      %c0_66 = arith.constant 0 : index
      %c0_67 = arith.constant 0 : index
      %78 = vector.load %arg13[%c0_66, %c0_67] : memref<128x128xf32, #tpu.memory_space<vmem>>, vector<128x128xf32>
      tpu.vector_store %arg13[%c0_66, %c0_67], %77 {strides = array<i32>} : memref<128x128xf32, #tpu.memory_space<vmem>>, vector<128x128xf32>,
    } else {
    }
    %c2_i32_3 = arith.constant 2 : i32
    %8 = arith.cmpi sge, %arg2, %c2_i32_3 : i32
    %c3_i32 = arith.constant 3 : i32
    %9 = arith.cmpi slt, %arg2, %c3_i32 : i32
    %10 = arith.andi %8, %9 : i1
    %11 = arith.extui %10 : i1 to i32
    %c0_i32_4 = arith.constant 0 : i32
    %12 = arith.cmpi ne, %11, %c0_i32_4 : i32
    scf.if %12 {
      %c0 = arith.constant 0 : index
      %c0_7 = arith.constant 0 : index
      %c0_8 = arith.constant 0 : index
      %c0_9 = arith.constant 0 : index
      %16 = vector.load %arg6[%c0, %c0_7, %c0_8, %c0_9] : memref<1x8x18x64xbf16, #tpu.memory_space<vmem>>, vector<1x8x18x64xbf16>
      %17 = vector.shape_cast %16 : vector<1x8x18x64xbf16> to vector<8x18x64xbf16>
      %c0_10 = arith.constant 0 : index
      %c0_11 = arith.constant 0 : index
      %c0_12 = arith.constant 0 : index
      %18 = vector.load %arg14[%c0_10, %c0_11, %c0_12] : memref<10x18x256xbf16, #tpu.memory_space<vmem>>, vector<8x18x64xbf16>
      tpu.vector_store %arg14[%c0_10, %c0_11, %c0_12], %17 {strides = array<i32>} : memref<10x18x256xbf16, #tpu.memory_space<vmem>>, vector<8x18x64xbf16>,
      %c0_13 = arith.constant 0 : index
      %c0_14 = arith.constant 0 : index
      %c0_15 = arith.constant 0 : index
      %c0_16 = arith.constant 0 : index
      %19 = vector.load %arg7[%c0_13, %c0_14, %c0_15, %c0_16] : memref<1x8x18x64xbf16, #tpu.memory_space<vmem>>, vector<1x2x18x64xbf16>
      %20 = vector.shape_cast %19 : vector<1x2x18x64xbf16> to vector<2x18x64xbf16>
      %c8 = arith.constant 8 : index
      %c0_17 = arith.constant 0 : index
      %c0_18 = arith.constant 0 : index
      %21 = vector.load %arg14[%c8, %c0_17, %c0_18] : memref<10x18x256xbf16, #tpu.memory_space<vmem>>, vector<2x18x64xbf16>
      tpu.vector_store %arg14[%c8, %c0_17, %c0_18], %20 {strides = array<i32>} : memref<10x18x256xbf16, #tpu.memory_space<vmem>>, vector<2x18x64xbf16>,
      %c0_19 = arith.constant 0 : index
      %c0_20 = arith.constant 0 : index
      %c0_21 = arith.constant 0 : index
      %22 = vector.load %arg14[%c0_19, %c0_20, %c0_21] : memref<10x18x256xbf16, #tpu.memory_space<vmem>>, vector<10x18x64xbf16>
      %23 = vector.extract_strided_slice %22 {offsets = [0, 0, 0], sizes = [8, 16, 64], strides = [1, 1, 1]} : vector<10x18x64xbf16> to vector<8x16x64xbf16>
      %24 = vector.shape_cast %23 : vector<8x16x64xbf16> to vector<128x64xbf16>
      %c0_22 = arith.constant 0 : index
      %c0_23 = arith.constant 0 : index
      %c0_24 = arith.constant 0 : index
      %c0_25 = arith.constant 0 : index
      %25 = vector.load %arg8[%c0_22, %c0_23, %c0_24, %c0_25] : memref<3x3x64x128xbf16, #tpu.memory_space<vmem>>, vector<1x1x64x128xbf16>
      %26 = vector.shape_cast %25 : vector<1x1x64x128xbf16> to vector<64x128xbf16>
      %cst = arith.constant dense<0.000000e+00> : vector<128x128xf32>
      %27 = tpu.matmul %24, %26, %cst {dimension_numbers = #tpu.dot_dimension_numbers<[1], [0], [0], [1], [0, 0, 1, 1], [], []>} : vector<128x64xbf16>, vector<64x128xbf16>, vector<128x128xf32> -> vector<128x128xf32>
      %28 = vector.extract_strided_slice %22 {offsets = [0, 1, 0], sizes = [8, 16, 64], strides = [1, 1, 1]} : vector<10x18x64xbf16> to vector<8x16x64xbf16>
      %29 = vector.shape_cast %28 : vector<8x16x64xbf16> to vector<128x64xbf16>
      %c0_26 = arith.constant 0 : index
      %c1 = arith.constant 1 : index
      %c0_27 = arith.constant 0 : index
      %c0_28 = arith.constant 0 : index
      %30 = vector.load %arg8[%c0_26, %c1, %c0_27, %c0_28] : memref<3x3x64x128xbf16, #tpu.memory_space<vmem>>, vector<1x1x64x128xbf16>
      %31 = vector.shape_cast %30 : vector<1x1x64x128xbf16> to vector<64x128xbf16>
      %cst_29 = arith.constant dense<0.000000e+00> : vector<128x128xf32>
      %32 = tpu.matmul %29, %31, %cst_29 {dimension_numbers = #tpu.dot_dimension_numbers<[1], [0], [0], [1], [0, 0, 1, 1], [], []>} : vector<128x64xbf16>, vector<64x128xbf16>, vector<128x128xf32> -> vector<128x128xf32>
      %33 = arith.addf %27, %32 : vector<128x128xf32>
      %34 = vector.extract_strided_slice %22 {offsets = [0, 2, 0], sizes = [8, 16, 64], strides = [1, 1, 1]} : vector<10x18x64xbf16> to vector<8x16x64xbf16>
      %35 = vector.shape_cast %34 : vector<8x16x64xbf16> to vector<128x64xbf16>
      %c0_30 = arith.constant 0 : index
      %c2 = arith.constant 2 : index
      %c0_31 = arith.constant 0 : index
      %c0_32 = arith.constant 0 : index
      %36 = vector.load %arg8[%c0_30, %c2, %c0_31, %c0_32] : memref<3x3x64x128xbf16, #tpu.memory_space<vmem>>, vector<1x1x64x128xbf16>
      %37 = vector.shape_cast %36 : vector<1x1x64x128xbf16> to vector<64x128xbf16>
      %cst_33 = arith.constant dense<0.000000e+00> : vector<128x128xf32>
      %38 = tpu.matmul %35, %37, %cst_33 {dimension_numbers = #tpu.dot_dimension_numbers<[1], [0], [0], [1], [0, 0, 1, 1], [], []>} : vector<128x64xbf16>, vector<64x128xbf16>, vector<128x128xf32> -> vector<128x128xf32>
      %39 = arith.addf %33, %38 : vector<128x128xf32>
      %40 = vector.extract_strided_slice %22 {offsets = [1, 0, 0], sizes = [8, 16, 64], strides = [1, 1, 1]} : vector<10x18x64xbf16> to vector<8x16x64xbf16>
      %41 = vector.shape_cast %40 : vector<8x16x64xbf16> to vector<128x64xbf16>
      %c1_34 = arith.constant 1 : index
      %c0_35 = arith.constant 0 : index
      %c0_36 = arith.constant 0 : index
      %c0_37 = arith.constant 0 : index
      %42 = vector.load %arg8[%c1_34, %c0_35, %c0_36, %c0_37] : memref<3x3x64x128xbf16, #tpu.memory_space<vmem>>, vector<1x1x64x128xbf16>
      %43 = vector.shape_cast %42 : vector<1x1x64x128xbf16> to vector<64x128xbf16>
      %cst_38 = arith.constant dense<0.000000e+00> : vector<128x128xf32>
      %44 = tpu.matmul %41, %43, %cst_38 {dimension_numbers = #tpu.dot_dimension_numbers<[1], [0], [0], [1], [0, 0, 1, 1], [], []>} : vector<128x64xbf16>, vector<64x128xbf16>, vector<128x128xf32> -> vector<128x128xf32>
      %45 = arith.addf %39, %44 : vector<128x128xf32>
      %46 = vector.extract_strided_slice %22 {offsets = [1, 1, 0], sizes = [8, 16, 64], strides = [1, 1, 1]} : vector<10x18x64xbf16> to vector<8x16x64xbf16>
      %47 = vector.shape_cast %46 : vector<8x16x64xbf16> to vector<128x64xbf16>
      %c1_39 = arith.constant 1 : index
      %c1_40 = arith.constant 1 : index
      %c0_41 = arith.constant 0 : index
      %c0_42 = arith.constant 0 : index
      %48 = vector.load %arg8[%c1_39, %c1_40, %c0_41, %c0_42] : memref<3x3x64x128xbf16, #tpu.memory_space<vmem>>, vector<1x1x64x128xbf16>
      %49 = vector.shape_cast %48 : vector<1x1x64x128xbf16> to vector<64x128xbf16>
      %cst_43 = arith.constant dense<0.000000e+00> : vector<128x128xf32>
      %50 = tpu.matmul %47, %49, %cst_43 {dimension_numbers = #tpu.dot_dimension_numbers<[1], [0], [0], [1], [0, 0, 1, 1], [], []>} : vector<128x64xbf16>, vector<64x128xbf16>, vector<128x128xf32> -> vector<128x128xf32>
      %51 = arith.addf %45, %50 : vector<128x128xf32>
      %52 = vector.extract_strided_slice %22 {offsets = [1, 2, 0], sizes = [8, 16, 64], strides = [1, 1, 1]} : vector<10x18x64xbf16> to vector<8x16x64xbf16>
      %53 = vector.shape_cast %52 : vector<8x16x64xbf16> to vector<128x64xbf16>
      %c1_44 = arith.constant 1 : index
      %c2_45 = arith.constant 2 : index
      %c0_46 = arith.constant 0 : index
      %c0_47 = arith.constant 0 : index
      %54 = vector.load %arg8[%c1_44, %c2_45, %c0_46, %c0_47] : memref<3x3x64x128xbf16, #tpu.memory_space<vmem>>, vector<1x1x64x128xbf16>
      %55 = vector.shape_cast %54 : vector<1x1x64x128xbf16> to vector<64x128xbf16>
      %cst_48 = arith.constant dense<0.000000e+00> : vector<128x128xf32>
      %56 = tpu.matmul %53, %55, %cst_48 {dimension_numbers = #tpu.dot_dimension_numbers<[1], [0], [0], [1], [0, 0, 1, 1], [], []>} : vector<128x64xbf16>, vector<64x128xbf16>, vector<128x128xf32> -> vector<128x128xf32>
      %57 = arith.addf %51, %56 : vector<128x128xf32>
      %58 = vector.extract_strided_slice %22 {offsets = [2, 0, 0], sizes = [8, 16, 64], strides = [1, 1, 1]} : vector<10x18x64xbf16> to vector<8x16x64xbf16>
      %59 = vector.shape_cast %58 : vector<8x16x64xbf16> to vector<128x64xbf16>
      %c2_49 = arith.constant 2 : index
      %c0_50 = arith.constant 0 : index
      %c0_51 = arith.constant 0 : index
      %c0_52 = arith.constant 0 : index
      %60 = vector.load %arg8[%c2_49, %c0_50, %c0_51, %c0_52] : memref<3x3x64x128xbf16, #tpu.memory_space<vmem>>, vector<1x1x64x128xbf16>
      %61 = vector.shape_cast %60 : vector<1x1x64x128xbf16> to vector<64x128xbf16>
      %cst_53 = arith.constant dense<0.000000e+00> : vector<128x128xf32>
      %62 = tpu.matmul %59, %61, %cst_53 {dimension_numbers = #tpu.dot_dimension_numbers<[1], [0], [0], [1], [0, 0, 1, 1], [], []>} : vector<128x64xbf16>, vector<64x128xbf16>, vector<128x128xf32> -> vector<128x128xf32>
      %63 = arith.addf %57, %62 : vector<128x128xf32>
      %64 = vector.extract_strided_slice %22 {offsets = [2, 1, 0], sizes = [8, 16, 64], strides = [1, 1, 1]} : vector<10x18x64xbf16> to vector<8x16x64xbf16>
      %65 = vector.shape_cast %64 : vector<8x16x64xbf16> to vector<128x64xbf16>
      %c2_54 = arith.constant 2 : index
      %c1_55 = arith.constant 1 : index
      %c0_56 = arith.constant 0 : index
      %c0_57 = arith.constant 0 : index
      %66 = vector.load %arg8[%c2_54, %c1_55, %c0_56, %c0_57] : memref<3x3x64x128xbf16, #tpu.memory_space<vmem>>, vector<1x1x64x128xbf16>
      %67 = vector.shape_cast %66 : vector<1x1x64x128xbf16> to vector<64x128xbf16>
      %cst_58 = arith.constant dense<0.000000e+00> : vector<128x128xf32>
      %68 = tpu.matmul %65, %67, %cst_58 {dimension_numbers = #tpu.dot_dimension_numbers<[1], [0], [0], [1], [0, 0, 1, 1], [], []>} : vector<128x64xbf16>, vector<64x128xbf16>, vector<128x128xf32> -> vector<128x128xf32>
      %69 = arith.addf %63, %68 : vector<128x128xf32>
      %70 = vector.extract_strided_slice %22 {offsets = [2, 2, 0], sizes = [8, 16, 64], strides = [1, 1, 1]} : vector<10x18x64xbf16> to vector<8x16x64xbf16>
      %71 = vector.shape_cast %70 : vector<8x16x64xbf16> to vector<128x64xbf16>
      %c2_59 = arith.constant 2 : index
      %c2_60 = arith.constant 2 : index
      %c0_61 = arith.constant 0 : index
      %c0_62 = arith.constant 0 : index
      %72 = vector.load %arg8[%c2_59, %c2_60, %c0_61, %c0_62] : memref<3x3x64x128xbf16, #tpu.memory_space<vmem>>, vector<1x1x64x128xbf16>
      %73 = vector.shape_cast %72 : vector<1x1x64x128xbf16> to vector<64x128xbf16>
      %cst_63 = arith.constant dense<0.000000e+00> : vector<128x128xf32>
      %74 = tpu.matmul %71, %73, %cst_63 {dimension_numbers = #tpu.dot_dimension_numbers<[1], [0], [0], [1], [0, 0, 1, 1], [], []>} : vector<128x64xbf16>, vector<64x128xbf16>, vector<128x128xf32> -> vector<128x128xf32>
      %75 = arith.addf %69, %74 : vector<128x128xf32>
      %c0_64 = arith.constant 0 : index
      %c0_65 = arith.constant 0 : index
      %76 = vector.load %arg13[%c0_64, %c0_65] : memref<128x128xf32, #tpu.memory_space<vmem>>, vector<128x128xf32>
      %77 = arith.addf %76, %75 : vector<128x128xf32>
      %c0_66 = arith.constant 0 : index
      %c0_67 = arith.constant 0 : index
      %78 = vector.load %arg13[%c0_66, %c0_67] : memref<128x128xf32, #tpu.memory_space<vmem>>, vector<128x128xf32>
      tpu.vector_store %arg13[%c0_66, %c0_67], %77 {strides = array<i32>} : memref<128x128xf32, #tpu.memory_space<vmem>>, vector<128x128xf32>,
    } else {
    }
    %c2_i32_5 = arith.constant 2 : i32
    %13 = arith.cmpi eq, %arg2, %c2_i32_5 : i32
    %14 = arith.extui %13 : i1 to i32
    %c0_i32_6 = arith.constant 0 : i32
    %15 = arith.cmpi ne, %14, %c0_i32_6 : i32
    scf.if %15 {
      %c0 = arith.constant 0 : index
      %c0_7 = arith.constant 0 : index
      %16 = vector.load %arg13[%c0, %c0_7] : memref<128x128xf32, #tpu.memory_space<vmem>>, vector<128x128xf32>
      %c0_8 = arith.constant 0 : index
      %c0_9 = arith.constant 0 : index
      %17 = vector.load %arg9[%c0_8, %c0_9] : memref<1x128xf32, #tpu.memory_space<vmem>>, vector<1x128xf32>
      %18 = vector.broadcast %17 : vector<1x128xf32> to vector<128x128xf32>
      %19 = arith.addf %16, %18 : vector<128x128xf32>
      %cst = arith.constant dense<0.000000e+00> : vector<128xf32>
      %20 = vector.multi_reduction <add>, %19, %cst [0] : vector<128x128xf32> to vector<128xf32>
      %21 = vector.shape_cast %20 : vector<128xf32> to vector<1x128xf32>
      %cst_10 = arith.constant 1.280000e+02 : f32
      %22 = vector.broadcast %cst_10 : f32 to vector<1x128xf32>
      %23 = arith.divf %21, %22 : vector<1x128xf32>
      %24 = vector.broadcast %23 : vector<1x128xf32> to vector<128x128xf32>
      %25 = arith.subf %19, %24 : vector<128x128xf32>
      %26 = arith.mulf %25, %25 : vector<128x128xf32>
      %cst_11 = arith.constant dense<0.000000e+00> : vector<128xf32>
      %27 = vector.multi_reduction <add>, %26, %cst_11 [0] : vector<128x128xf32> to vector<128xf32>
      %28 = vector.shape_cast %27 : vector<128xf32> to vector<1x128xf32>
      %29 = vector.shape_cast %19 : vector<128x128xf32> to vector<1x8x16x128xf32>
      %30 = arith.truncf %29 : vector<1x8x16x128xf32> to vector<1x8x16x128xbf16>
      %c0_12 = arith.constant 0 : index
      %c0_13 = arith.constant 0 : index
      %c0_14 = arith.constant 0 : index
      %c0_15 = arith.constant 0 : index
      %31 = vector.load %arg10[%c0_12, %c0_13, %c0_14, %c0_15] : memref<1x8x16x128xbf16, #tpu.memory_space<vmem>>, vector<1x8x16x128xbf16>
      tpu.vector_store %arg10[%c0_12, %c0_13, %c0_14, %c0_15], %30 {strides = array<i32>} : memref<1x8x16x128xbf16, #tpu.memory_space<vmem>>, vector<1x8x16x128xbf16>,
      %32 = vector.shape_cast %23 : vector<1x128xf32> to vector<1x1x1x128xf32>
      %c0_16 = arith.constant 0 : index
      %c0_17 = arith.constant 0 : index
      %c0_18 = arith.constant 0 : index
      %c0_19 = arith.constant 0 : index
      %33 = vector.load %arg11[%c0_16, %c0_17, %c0_18, %c0_19] : memref<1x1x1x128xf32, #tpu.memory_space<vmem>>, vector<1x1x1x128xf32>
      tpu.vector_store %arg11[%c0_16, %c0_17, %c0_18, %c0_19], %32 {strides = array<i32>} : memref<1x1x1x128xf32, #tpu.memory_space<vmem>>, vector<1x1x1x128xf32>,
      %34 = vector.shape_cast %28 : vector<1x128xf32> to vector<1x1x1x128xf32>
      %c0_20 = arith.constant 0 : index
      %c0_21 = arith.constant 0 : index
      %c0_22 = arith.constant 0 : index
      %c0_23 = arith.constant 0 : index
      %35 = vector.load %arg12[%c0_20, %c0_21, %c0_22, %c0_23] : memref<1x1x1x128xf32, #tpu.memory_space<vmem>>, vector<1x1x1x128xf32>
      tpu.vector_store %arg12[%c0_20, %c0_21, %c0_22, %c0_23], %34 {strides = array<i32>} : memref<1x1x1x128xf32, #tpu.memory_space<vmem>>, vector<1x1x1x128xf32>,
    } else {
    }
    return
  }
  func.func @transform_0(%arg0: i32, %arg1: i32, %arg2: i32) -> (i32, i32, i32, i32) {
    %c0_i32 = arith.constant 0 : i32
    %0 = arith.subi %arg2, %c0_i32 : i32
    %c0_i32_0 = arith.constant 0 : i32
    %c1_i32 = arith.constant 1 : i32
    %1 = arith.maxsi %c0_i32_0, %0 : i32
    %2 = arith.minsi %c1_i32, %1 : i32
    %c0_i32_1 = arith.constant 0 : i32
    %c0_i32_2 = arith.constant 0 : i32
    return %arg0, %arg1, %c0_i32_1, %2 : i32, i32, i32, i32
  }
  func.func @transform_1(%arg0: i32, %arg1: i32, %arg2: i32) -> (i32, i32, i32, i32) {
    %c1_i32 = arith.constant 1 : i32
    %0 = arith.addi %arg1, %c1_i32 : i32
    %c1_i32_0 = arith.constant 1 : i32
    %1 = arith.muli %0, %c1_i32_0 : i32
    %c0_i32 = arith.constant 0 : i32
    %2 = arith.subi %arg2, %c0_i32 : i32
    %c0_i32_1 = arith.constant 0 : i32
    %c1_i32_2 = arith.constant 1 : i32
    %3 = arith.maxsi %c0_i32_1, %2 : i32
    %4 = arith.minsi %c1_i32_2, %3 : i32
    %c0_i32_3 = arith.constant 0 : i32
    %c0_i32_4 = arith.constant 0 : i32
    return %arg0, %1, %c0_i32_3, %4 : i32, i32, i32, i32
  }
  func.func @transform_2(%arg0: i32, %arg1: i32, %arg2: i32) -> (i32, i32, i32, i32) {
    %c0_i32 = arith.constant 0 : i32
    %0 = arith.subi %arg2, %c0_i32 : i32
    %c0_i32_0 = arith.constant 0 : i32
    %c1_i32 = arith.constant 1 : i32
    %1 = arith.maxsi %c0_i32_0, %0 : i32
    %2 = arith.minsi %c1_i32, %1 : i32
    %c0_i32_1 = arith.constant 0 : i32
    %c0_i32_2 = arith.constant 0 : i32
    %c0_i32_3 = arith.constant 0 : i32
    %c0_i32_4 = arith.constant 0 : i32
    return %c0_i32_1, %c0_i32_2, %2, %c0_i32_3 : i32, i32, i32, i32
  }
  func.func @transform_3(%arg0: i32, %arg1: i32, %arg2: i32) -> (i32, i32, i32, i32) {
    %c2_i32 = arith.constant 2 : i32
    %0 = arith.subi %arg2, %c2_i32 : i32
    %c0_i32 = arith.constant 0 : i32
    %c0_i32_0 = arith.constant 0 : i32
    %1 = arith.maxsi %c0_i32, %0 : i32
    %2 = arith.minsi %c0_i32_0, %1 : i32
    %c0_i32_1 = arith.constant 0 : i32
    %c0_i32_2 = arith.constant 0 : i32
    return %arg0, %arg1, %c0_i32_1, %2 : i32, i32, i32, i32
  }
  func.func @transform_4(%arg0: i32, %arg1: i32, %arg2: i32) -> (i32, i32, i32, i32) {
    %c1_i32 = arith.constant 1 : i32
    %0 = arith.addi %arg1, %c1_i32 : i32
    %c1_i32_0 = arith.constant 1 : i32
    %1 = arith.muli %0, %c1_i32_0 : i32
    %c2_i32 = arith.constant 2 : i32
    %2 = arith.subi %arg2, %c2_i32 : i32
    %c0_i32 = arith.constant 0 : i32
    %c0_i32_1 = arith.constant 0 : i32
    %3 = arith.maxsi %c0_i32, %2 : i32
    %4 = arith.minsi %c0_i32_1, %3 : i32
    %c0_i32_2 = arith.constant 0 : i32
    %c0_i32_3 = arith.constant 0 : i32
    return %arg0, %1, %c0_i32_2, %4 : i32, i32, i32, i32
  }
  func.func @transform_5(%arg0: i32, %arg1: i32, %arg2: i32) -> (i32, i32, i32, i32) {
    %c2_i32 = arith.constant 2 : i32
    %0 = arith.subi %arg2, %c2_i32 : i32
    %c0_i32 = arith.constant 0 : i32
    %c0_i32_0 = arith.constant 0 : i32
    %1 = arith.maxsi %c0_i32, %0 : i32
    %2 = arith.minsi %c0_i32_0, %1 : i32
    %c0_i32_1 = arith.constant 0 : i32
    %c0_i32_2 = arith.constant 0 : i32
    %c0_i32_3 = arith.constant 0 : i32
    %c0_i32_4 = arith.constant 0 : i32
    return %c0_i32_1, %c0_i32_2, %2, %c0_i32_3 : i32, i32, i32, i32
  }
  func.func @transform_6(%arg0: i32, %arg1: i32, %arg2: i32) -> (i32, i32) {
    %c0_i32 = arith.constant 0 : i32
    %c0_i32_0 = arith.constant 0 : i32
    %c0_i32_1 = arith.constant 0 : i32
    return %c0_i32, %c0_i32_0 : i32, i32
  }
  func.func @transform_7(%arg0: i32, %arg1: i32, %arg2: i32) -> (i32, i32, i32, i32) {
    %c0_i32 = arith.constant 0 : i32
    %c0_i32_0 = arith.constant 0 : i32
    %c0_i32_1 = arith.constant 0 : i32
    return %arg0, %arg1, %c0_i32, %c0_i32_0 : i32, i32, i32, i32
  }
  func.func @transform_8(%arg0: i32, %arg1: i32, %arg2: i32) -> (i32, i32, i32, i32) {
    %c0_i32 = arith.constant 0 : i32
    %c0_i32_0 = arith.constant 0 : i32
    %c0_i32_1 = arith.constant 0 : i32
    return %arg0, %arg1, %c0_i32, %c0_i32_0 : i32, i32, i32, i32
  }
  func.func @transform_9(%arg0: i32, %arg1: i32, %arg2: i32) -> (i32, i32, i32, i32) {
    %c0_i32 = arith.constant 0 : i32
    %c0_i32_0 = arith.constant 0 : i32
    %c0_i32_1 = arith.constant 0 : i32
    return %arg0, %arg1, %c0_i32, %c0_i32_0 : i32, i32, i32, i32
  }
}

</mosaic_0001>

<bundles_post_ra>
// kernel: tpu_custom_call.1
= control target key start
LH: loop header
LB: loop body
LE: loop exit
PB: predicated region body
PF: predicated region fallthrough
CT: control target
= control target key end

     0   :  { %s13475_s0 = inlined_call_operand.vmem [shape: bf16[2,18,18,512], index: 0, kind: input, shape index: {}]   ;;  %s13476_s1 = inlined_call_operand.vmem [shape: bf16[2,18,18,512], index: 1, kind: input, shape index: {}]   ;;  %s13477_s2 = inlined_call_operand.vmem [shape: bf16[3,3,512,128], index: 2, kind: input, shape index: {}]   ;;  %s13478_s3 = inlined_call_operand.vmem [shape: bf16[2,18,18,64], index: 3, kind: input, shape index: {}]   ;;  %s13479_s4 = inlined_call_operand.vmem [shape: bf16[2,18,18,64], index: 4, kind: input, shape index: {}]   ;;  %s13480_s5 = inlined_call_operand.vmem [shape: bf16[3,3,64,128], index: 5, kind: input, shape index: {}]   ;;  %s13481_s6 = inlined_call_operand.vmem [shape: f32[1,128], index: 6, kind: input, shape index: {}]   ;;  %s13482_s7 = inlined_call_operand.hbm [shape: bf16[2,16,16,128], index: 7, kind: output, shape index: {0}]   ;;  %s13483_s8 = inlined_call_operand.hbm [shape: f32[2,2,1,128], index: 8, kind: output, shape index: {1}]   ;;  %s13484_s9 = inlined_call_operand.hbm [shape: f32[2,2,1,128], index: 9, kind: output, shape index: {2}]  }
   0x1   :  { %13535 = sst [smem:[#allocation48_spill]] %s13475_s0 }
   0x2   :  { %13536 = sst [smem:[#allocation49_spill]] %s13476_s1 }
   0x3   :  { %13537 = sst [smem:[#allocation50_spill]] %s13477_s2 }
   0x4   :  { %13538 = sst [smem:[#allocation51_spill]] %s13478_s3 }
   0x5   :  { %13539 = sst [smem:[#allocation52_spill]] %s13479_s4 }
   0x6   :  { %13540 = sst [smem:[#allocation53_spill]] %s13480_s5 }
   0x7   :  { %13541 = sst [smem:[#allocation54_spill]] %s13481_s6 }
   0x8   :  { %13542 = sst [smem:[#allocation55_spill]] %s13482_s7 }
   0x9   :  { %13543 = sst [smem:[#allocation56_spill]] %s13483_s8 }
   0xa   :  { %13544 = sst [smem:[#allocation57_spill]] %s13484_s9 }
   0xb   :  { %15 = vsyncpa [#allocation8], 0 }
   0xc   :  { %17 = vsyncpa [#allocation8 + $0x1], 0 }
   0xd   :  { %18 = vsyncpa [#allocation10], 0 }
   0xe   :  { %20 = vsyncpa [#allocation10 + $0x1], 0  ;;  %s10993_s30 = smov 0   ;;  %s10995_s10 = smov 0  }
   0xf   :  { %s10997_s11 = smov 0   ;;  %s10999_s12 = smov 0  }
  0x10   :  { %s11001_s13 = smov 0   ;;  %s11003_s14 = smov 0  }
  0x11   :  { %s11005_s15 = smov 0   ;;  %s11007_s16 = smov 0  }
  0x12   :  { %s11009_s17 = smov 0   ;;  %s11011_s18 = smov 0  }
  0x13   :  { %s11013_s19 = smov 0   ;;  %s11015_s20 = smov 0  }
  0x14   :  { %s11017_s21 = smov 0   ;;  %s11019_s22 = smov 0  }
  0x15   :  { %s11021_s23 = smov 0   ;;  %s11023_s24 = smov 0  }
  0x16 LB: > { %13545 = sst [smem:[#allocation14_spill]] %s10812_s30  ;;  %s38_s27 = sadd.s32 1, %s10860_s21  ;;  %s10872_s24 = sphi %s11023_s24, %s26_s24   ;;  %s10868_s23 = sphi %s11021_s23, %s13656_s23   ;;  %s10864_s22 = sphi %s11019_s22, %s13655_s22   ;;  %s10860_s21 = sphi %s11017_s21, %s13654_s21   ;;  %s10856_s20 = sphi %s11015_s20, %s13653_s20   ;;  %s10852_s19 = sphi %s11013_s19, %s13652_s19   ;;  %s10848_s18 = sphi %s11011_s18, %s13651_s18   ;;  %s10844_s17 = sphi %s11009_s17, %s13650_s17   ;;  %s10840_s16 = sphi %s11007_s16, %s13649_s16   ;;  %s10836_s15 = sphi %s11005_s15, %s13662_s15   ;;  %s10832_s14 = sphi %s11003_s14, %s13661_s14   ;;  %s10828_s13 = sphi %s11001_s13, %s13660_s13   ;;  %s10824_s12 = sphi %s10999_s12, %s13659_s12   ;;  %s10820_s11 = sphi %s10997_s11, %s13646_s11   ;;  %s10816_s10 = sphi %s10995_s10, %s13658_s10   ;;  %s10812_s30 = sphi %s10993_s30, %s13657_s30  }
  0x17   : > { %13546 = sst [smem:[#allocation15_spill]] %s10820_s11  ;;  %s13487_s28 = sadd.s32 1, %s10864_s22 }
  0x18   : > { %13547 = sst [smem:[#allocation16_spill]] %s10844_s17  ;;  %p39_p0 = scmp.ge.s32.totalorder %s38_s27, 3 }
  0x19   : > { %13548 = sst [smem:[#allocation17_spill]] %s10848_s18  ;;  %s45_s29 = sadd.s32 1, %s10868_s23 }
  0x1a   : > { %13549 = sst [smem:[#allocation18_spill]] %s10856_s20  ;;  %p49_p1 = scmp.gt.s32.totalorder %s10860_s21, 0 }
  0x1b   : > { %13550 = sst [smem:[#allocation19_spill]] %s10860_s21  ;;  %p8574_p2 = scmp.lt.s32.totalorder %s10860_s21, 1 }
  0x1c   : > { %13551 = sst [smem:[#allocation20_spill]] %s10864_s22  ;;  %s13664_s27 = smov (%p39_p0, %s38_s27), 0 }
  0x1d   : > { %13552 = sst [smem:[#allocation21_spill]] %s10868_s23  ;;  %p53_p4 = scmp.gt.s32.totalorder %s13664_s27, 0 }
  0x1e   : > { %13553 = sst [smem:[#allocation22_spill]] %s13664_s27  ;;  %p8579_p6 = scmp.lt.s32.totalorder %s13664_s27, 1 }
  0x1f   : > { %s42_s9 = scalar_select %p39_p0, %s13487_s28, %s10864_s22 }
  0x20   : > { %s50_s25 = scalar_select %p49_p1, %s10860_s21, 0 }
  0x21   : > { %p43_p3 = scmp.ge.s32.totalorder %s42_s9, 2  ;;  %s64_s28 = sadd.s32 1, %s10844_s17 }
  0x22   : > { %s13666_s25 = smov (!%p8574_p2, %s50_s25), 1  ;;  %p71_p7 = scmp.ne.s32.totalorder %s10844_s17, %s10840_s16 }
  0x23   : > { %s13668_s9 = smov (%p43_p3, %s42_s9), 0  ;;  %s13670_s29 = smov (!%p43_p3, %s45_s29), %s10868_s23 }
  0x24   : > { %13554 = sst [smem:[#allocation23_spill]] %s13668_s9  ;;  %p47_p5 = scmp.ge.s32.totalorder %s13670_s29, 2 }
  0x25   : > { %s54_s26 = scalar_select %p53_p4, %s13664_s27, 0 }
  0x26   : > { %s58_s7 = ssub.s32 %s10864_s22, %s13668_s9  ;;  %s13672_s29 = smov (%p47_p5, %s13670_s29), 0 }
  0x27   : > { %13555 = sst [smem:[#allocation24_spill]] %s13672_s29  ;;  %s13674_s26 = smov (!%p8579_p6, %s54_s26), 1 }
  0x28   : > { %s57_s21 = ssub.s32 %s10868_s23, %s13672_s29  ;;  %s60_s6 = ssub.s32 %s13666_s25, %s13674_s26 }
  0x29   : > { %s59_s8 = sor.u32 %s58_s7, %s57_s21  ;;  %p72_p8 = scmp.eq.s32.totalorder %s10872_s24, 0 }
  0x2a   : > { %s61_s5 = sor.u32 %s60_s6, %s59_s8  ;;  %s92_s27 = sadd.s32 1, %s13668_s9 }
  0x2b   : > { %p62_p9 = scmp.eq.s32.totalorder %s61_s5, 0  ;;  %p11108_p10 = por %p72_p8, %p71_p7 }
  0x2c   : > { %s13557_s29 = sadd.s32 1, %s10864_s22  ;;  %s104_s3 = sadd.s32 1, %s10836_s15 }
  0x2d   : > { %s98_s7 = ssub.s32 %s13557_s29, %s92_s27  ;;  %p111_p11 = scmp.ne.s32.totalorder %s10836_s15, %s10832_s14 }
  0x2e   : > { %s11115_s26 = scalar_select %p62_p9, %s10844_s17, %s64_s28  }
  0x2f   : > { %s99_s4 = sor.u32 %s98_s7, %s57_s21  ;;  %p136_p13 = scmp.eq.s32.totalorder %s60_s6, 0 }
  0x30   : > { %13558 = sst [smem:[#allocation25_spill]] %s11115_s26  ;;  %s101_s20 = sor.u32 %s99_s4, %s60_s6 }
  0x31   : > { %p102_p12 = scmp.eq.s32.totalorder %s101_s20, 0  ;;  %p11122_p0 = por %p111_p11, %p72_p8 }
  0x32   : > { %s138_s27 = sadd.s32 1, %s10828_s13  ;;  %p145_p1 = scmp.ne.s32.totalorder %s10828_s13, %s10824_s12 }
  0x33   : > { %s11128_s29 = scalar_select %p102_p12, %s10836_s15, %s104_s3  }
  0x34   : > { %s11131_s28 = scalar_select %p136_p13, %s10828_s13, %s138_s27  }
  0x35   : > { %13560 = sst [smem:[#allocation26_spill]] %s11128_s29  ;;  %p303_p2 = scmp.eq.s32.totalorder %s59_s8, 0 }
  0x36   : > { %13561 = sst [smem:[#allocation27_spill]] %s11131_s28  ;;  %s305_s21 = sadd.s32 1, %s10820_s11 }
  0x37   : > { %p315_p3 = scmp.ne.s32.totalorder %s10820_s11, %s10816_s10  ;;  %p11140_p4 = por %p145_p1, %p72_p8 }
  0x38   : > { %s13563_s6 = sadd.s32 4294967295, %s10872_s24   ;;  %p321_p7 = scmp.ne.s32.totalorder %s10816_s10, %s10812_s30 }
  0x39   : > { %p316_p5 = scmp.eq.s32.totalorder %s13563_s6, 11  ;;  %s13567_s3 = sadd.s32 4294967294, %s10872_s24  }
  0x3a   : > { %s11147_s20 = scalar_select %p303_p2, %s10820_s11, %s305_s21  }
  0x3b   : > { %p11149_p6 = por %p316_p5, %p315_p3  ;;  %p322_p9 = scmp.eq.s32.totalorder %s13567_s3, 11 }
  0x3c   : > { %13564 = sst [smem:[#allocation28_spill]] %s11147_s20  ;;  %p8641_p8 = scmp.ge.s32.totalorder %s10872_s24, 12 }
  0x3d   : > { %s13565_s7 = scalar_select %p11149_p6, 1, 0 }
  0x3e   : > { %p11157_p11 = por %p322_p9, %p321_p7  ;;  %397 = sbr.rel (%p8641_p8) target bundleno = 372 (0x174), region = 20 }
  0x3f   : > { %13566 = sst [smem:[#allocation29_spill]] %s13565_s7 }
  0x40   : > { %s13568_s8 = scalar_select %p11157_p11, 1, 0 }
  0x42   : > { %13569 = sst [smem:[#allocation30_spill]] %s13568_s8 }
  0x43   : > { %400 = sbr.rel (!%p11108_p10) target bundleno = 140 (0x8c), region = 24  ;;  %s402_s27 = sand.u32 (%p11108_p10), 1, %s10844_s17  }
  0x44   : > { %s10285_s21 = smul.u32 (%p11108_p10), 192, %s402_s27  ;;  %s8648_s6 = sshll.u32 (%p11108_p10), %s13666_s25, 1 }
  0x45   : > { %s10286_s9 = smul.u32 (%p11108_p10), 96, %s10864_s22  ;;  %s13570_s0 = sld [smem:[#allocation48_spill]] (%p11108_p10) }
  0x46   : > { %s10287_s3 = smul.u32 (%p11108_p10), 216, %s10868_s23  ;;  %s11173_s30 = scalar_lea.vmem (%p11108_p10), [#allocation4], %s10285_s21  }
  0x47   : > { %s419_s26 = sadd.s32 (%p11108_p10), %s10286_s9, %s8648_s6  ;;  %s10938_s18 = smov (%p11108_p10), 24  }
  0x48   : > { %s421_s29 = sadd.s32 %s10287_s3, %s419_s26  ;;  %10575 = sdivrem.u32 %s10938_s18, 24 }
  0x49   : > { %s8654_s28 = sshll.u32 %s421_s29, 2 }
  0x4b   : > { %s11171_s8 = scalar_lea.vmem %s13570_s0, %s8654_s28  }
  0x51   : > { %s11176_s7 = spop.drf %10575 }
  0x52   : > { %s10577_s17 = spop.drf %10575  ;;  %p8656_p10 = scmp.le.s32.totalorder %s11176_s7, 0 }
  0x53   : > { %s13571_s9 = smov (!%p8656_p10), %s11173_s30  ;;  %s13572_s26 = smov (!%p8656_p10), %s11171_s8 }
  0x54   : > { %8435 = sbr.rel (%p8656_p10) target bundleno = 114 (0x72), region = 349  ;;  %s11185_s11 = smov (!%p8656_p10), 0  }
  0x55   : > { %s11187_s29 = smov (!%p8656_p10), 0  }
  0x59 LB: >> { %v538_v0 = vld [vmem:[%s10880_s26] sm:$0xff]  ;;  %v540_v1 = vld [vmem:[%s10880_s26 + $0x10] sm:$0xff]  ;;  %s586_s17 = sadd.s32 1, %s10884_s11  ;;  %s532_s29 = sadd.s32 1, %s10888_s29   ;;  %s10888_s29 = sphi %s11187_s29, %s532_s29   ;;  %s10884_s11 = sphi %s11185_s11, %s13575_s11   ;;  %s10880_s26 = sphi %s13572_s26, %s13574_s26   ;;  %s10876_s9 = sphi %s13571_s9, %s13573_s9  }
  0x5a   : >> { %v542_v2 = vld [vmem:[%s10880_s26 + $0x20] sm:$0xff]  ;;  %539 = vst [vmem:[%s10876_s9] sm:$0xff] %v538_v0  ;;  %v544_v3 = vld [vmem:[%s10880_s26 + $0x30] sm:$0xff]  ;;  %p587_p12 = scmp.ge.s32.totalorder %s586_s17, %s11176_s7  ;;  %p531_p13 = scmp.ge.s32.totalorder %s532_s29, %s11176_s7 }
  0x5b   : >> { %541 = vst [vmem:[%s10876_s9 + $0x8] sm:$0xff] %v540_v1  ;;  %v546_v4 = vld [vmem:[%s10880_s26 + $0x40] sm:$0xff]  ;;  %v548_v5 = vld [vmem:[%s10880_s26 + $0x50] sm:$0xff] }
  0x5c   : >> { %543 = vst [vmem:[%s10876_s9 + $0x10] sm:$0xff] %v542_v2  ;;  %s13676_s17 = smov (%p587_p12, %s586_s17), 0  ;;  %v550_v6 = vld [vmem:[%s10880_s26 + $0x60] sm:$0xff]  ;;  %v552_v7 = vld [vmem:[%s10880_s26 + $0x70] sm:$0xff] }
  0x5d   : >> { %545 = vst [vmem:[%s10876_s9 + $0x18] sm:$0xff] %v544_v3  ;;  %s589_s28 = smul.u32 384, %s13676_s17  ;;  %v554_v8 = vld [vmem:[%s10880_s26 + $0x80] sm:$0xff]  ;;  %v556_v9 = vld [vmem:[%s10880_s26 + $0x90] sm:$0xff]  ;;  %s13575_s11 = smov %s13676_s17 }
  0x5e   : >> { %547 = vst [vmem:[%s10876_s9 + $0x20] sm:$0xff] %v546_v4  ;;  %s590_s20 = smul.u32 192, %s13676_s17  ;;  %v558_v10 = vld [vmem:[%s10880_s26 + $0xa0] sm:$0xff]  ;;  %v560_v11 = vld [vmem:[%s10880_s26 + $0xb0] sm:$0xff] }
  0x5f   : >> { %549 = vst [vmem:[%s10876_s9 + $0x28] sm:$0xff] %v548_v5  ;;  %s11222_s27 = scalar_lea.vmem %s11171_s8, %s589_s28   ;;  %v562_v12 = vld [vmem:[%s10880_s26 + $0xc0] sm:$0xff]  ;;  %v564_v13 = vld [vmem:[%s10880_s26 + $0xd0] sm:$0xff] }
  0x60   : >> { %551 = vst [vmem:[%s10876_s9 + $0x30] sm:$0xff] %v550_v6  ;;  %s11227_s21 = scalar_lea.vmem %s11173_s30, %s590_s20 [#allocation4]   ;;  %v566_v14 = vld [vmem:[%s10880_s26 + $0xe0] sm:$0xff]  ;;  %v568_v15 = vld [vmem:[%s10880_s26 + $0xf0] sm:$0xff] }
  0x61   : >> { %553 = vst [vmem:[%s10876_s9 + $0x38] sm:$0xff] %v552_v7  ;;  %v570_v16 = vld [vmem:[%s10880_s26 + $0x100] sm:$0xff]  ;;  %v572_v17 = vld [vmem:[%s10880_s26 + $0x110] sm:$0xff] }
  0x62   : >> { %555 = vst [vmem:[%s10876_s9 + $0x40] sm:$0xff] %v554_v8  ;;  %v574_v18 = vld [vmem:[%s10880_s26 + $0x120] sm:$0xff]  ;;  %v576_v19 = vld [vmem:[%s10880_s26 + $0x130] sm:$0xff] }
  0x63   : >> { %557 = vst [vmem:[%s10876_s9 + $0x48] sm:$0xff] %v556_v9  ;;  %v578_v20 = vld [vmem:[%s10880_s26 + $0x140] sm:$0xff]  ;;  %v580_v21 = vld [vmem:[%s10880_s26 + $0x150] sm:$0xff] }
  0x64   : >> { %559 = vst [vmem:[%s10876_s9 + $0x50] sm:$0xff] %v558_v10  ;;  %v582_v22 = vld [vmem:[%s10880_s26 + $0x160] sm:$0xff]  ;;  %v584_v23 = vld [vmem:[%s10880_s26 + $0x170] sm:$0xff]  ;;  %s13574_s26 = smov %s11222_s27 }
  0x65   : >> { %561 = vst [vmem:[%s10876_s9 + $0x58] sm:$0xff] %v560_v11 }
  0x66   : >> { %563 = vst [vmem:[%s10876_s9 + $0x60] sm:$0xff] %v562_v12 }
  0x67   : >> { %565 = vst [vmem:[%s10876_s9 + $0x68] sm:$0xff] %v564_v13 }
  0x68   : >> { %567 = vst [vmem:[%s10876_s9 + $0x70] sm:$0xff] %v566_v14 }
  0x69   : >> { %569 = vst [vmem:[%s10876_s9 + $0x78] sm:$0xff] %v568_v15 }
  0x6a   : >> { %571 = vst [vmem:[%s10876_s9 + $0x80] sm:$0xff] %v570_v16 }
  0x6b   : >> { %573 = vst [vmem:[%s10876_s9 + $0x88] sm:$0xff] %v572_v17 }
  0x6c   : >> { %575 = vst [vmem:[%s10876_s9 + $0x90] sm:$0xff] %v574_v18 }
  0x6d   : >> { %577 = vst [vmem:[%s10876_s9 + $0x98] sm:$0xff] %v576_v19  ;;  %534 = sbr.rel (!%p531_p13) target bundleno = 89 (0x59), region = 355 }
  0x6e   : >> { %579 = vst [vmem:[%s10876_s9 + $0xa0] sm:$0xff] %v578_v20 }
  0x6f   : >> { %581 = vst [vmem:[%s10876_s9 + $0xa8] sm:$0xff] %v580_v21 }
  0x70   : >> { %583 = vst [vmem:[%s10876_s9 + $0xb0] sm:$0xff] %v582_v22 }
  0x71   : >> { %585 = vst [vmem:[%s10876_s9 + $0xb8] sm:$0xff] %v584_v23  ;;  %s13573_s9 = smov %s11227_s21 }
  0x72 PF: > { %10578 = sdivrem.u32 %s10938_s18, 24 }
  0x73   : > { %s8657_s6 = smul.u32 384, %s11176_s7 }
  0x74   : > { %s8658_s3 = smul.u32 192, %s11176_s7 }
  0x75   : > { %s11275_s28 = scalar_lea.vmem %s11171_s8, %s8657_s6  }
  0x76   : > { %s11278_s20 = scalar_lea.vmem %s11173_s30, %s8658_s3 [#allocation4]  }
  0x7b   : > { %s10579_s21 = spop.drf %10578 }
  0x7c   : > { %s10580_s27 = spop.drf %10578 }
  0x7d   : > { %p8659_p1 = scmp.le.s32.totalorder %s10580_s27, 0 }
  0x7e   : > { %s10890_s29 = smov (!%p8659_p1), %s11278_s20   ;;  %s10894_s9 = smov (!%p8659_p1), %s11275_s28  }
  0x7f   : > { %8449 = sbr.rel (%p8659_p1) target bundleno = 140 (0x8c), region = 360  ;;  %s10898_s26 = smov (!%p8659_p1), 0  }
  0x80   : > { %s10902_s11 = smov (!%p8659_p1), 0  }
  0x84 LB: >> { %v609_v24 = vld [vmem:[%s10896_s9] sm:$0xff]  ;;  %s611_s30 = sadd.s32 1, %s10900_s26  ;;  %s603_s11 = sadd.s32 1, %s10904_s11   ;;  %s10904_s11 = sphi %s10902_s11, %s603_s11   ;;  %s10900_s26 = sphi %s10898_s26, %s10899_s26   ;;  %s10896_s9 = sphi %s10894_s9, %s616_s9   ;;  %s10892_s29 = sphi %s10890_s29, %s617_s29  }
  0x85   : >> { %610 = vst [vmem:[%s10892_s29] sm:$0xff] %v609_v24  ;;  %p612_p2 = scmp.ge.s32.totalorder %s611_s30, %s10580_s27  ;;  %p602_p3 = scmp.ge.s32.totalorder %s603_s11, %s10580_s27 }
  0x87   : >> { %s13678_s30 = smov (%p612_p2, %s611_s30), 0  ;;  %605 = sbr.rel (!%p602_p3) target bundleno = 132 (0x84), region = 366 }
  0x88   : >> { %s8660_s7 = sshll.u32 %s13678_s30, 4  ;;  %s8661_s8 = sshll.u32 %s13678_s30, 3 }
  0x89   : >> { %s616_s9 = scalar_lea.vmem %s11275_s28, %s8660_s7   ;;  %s617_s29 = scalar_lea.vmem %s11278_s20, %s8661_s8 [#allocation4]  }
  0x8a   : >> { %s10899_s26 = smov %s13678_s30  }
  0x8c PF: > { %623 = sbr.rel (!%p11122_p0) target bundleno = 218 (0xda), region = 76  ;;  %s625_s18 = sand.u32 (%p11122_p0), 1, %s10836_s15  }
  0x8d   : > { %s9992_s17 = sshll.u32 (%p11122_p0), %s10864_s22, 3  ;;  %s10288_s6 = smul.u32 (%p11122_p0), 192, %s625_s18 }
  0x8e   : > { %s9993_s3 = sadd.s32 (%p11122_p0), 8, %s9992_s17  ;;  %s8672_s29 = sshll.u32 (%p11122_p0), %s13666_s25, 1 }
  0x8f   : > { %s635_s21 = ssub.s32 (%p11122_p0), 18, %s9993_s3  ;;  %s8291_s9 = smul.u32 (%p11122_p0), 96, %s10864_s22 }
  0x90   : > { %p636_p5 = scmp.lt.s32.totalorder (%p11122_p0), %s635_s21, 8  ;;  %s8293_s5 = smul.u32 (%p11122_p0), 216, %s10868_s23 }
  0x91   : > { %s8292_s28 = sadd.s32 %s8672_s29, %s8291_s9  ;;  %s13576_s1 = sld [smem:[#allocation49_spill]] }
  0x92   : > { %s13680_s21 = smov (!%p636_p5, %s635_s21), 8  ;;  %s8294_s27 = sadd.s32 %s8293_s5, %s8292_s28 }
  0x93   : > { %s8670_s20 = smul.u32 24, %s13680_s21  ;;  %s8673_s11 = sshll.u32 %s8294_s27, 2 }
  0x94   : > { %s648_s26 = smul.u32 3, %s13680_s21  ;;  %s11301_s17 = scalar_lea.vmem [#allocation5], %s10288_s6  }
  0x95   : > { %p8674_p0 = scmp.eq.s32.totalorder %s8670_s20, 0 }
  0x96   : > { %10581 = sdivrem.u32 (!%p8674_p0), %s648_s26, 24 }
  0x97   : > { %s11298_s8 = scalar_lea.vmem %s13576_s1, %s8673_s11  ;;  %651 = sbr.rel (%p8674_p0) target bundleno = 218 (0xda), region = 80 }
  0x98   : > { %s8297_s18 = scalar_lea.vmem %s11298_s8, 384  }
  0x9f   : > { %s11305_s3 = spop.drf %10581 }
  0xa0   : > { %s10583_s29 = spop.drf %10581  ;;  %p8675_p7 = scmp.le.s32.totalorder %s11305_s3, 0 }
  0xa1   : > { %s13577_s9 = smov (!%p8675_p7), %s11301_s17  ;;  %s11313_s28 = smov (!%p8675_p7), 0  }
  0xa2   : > { %8463 = sbr.rel (%p8675_p7) target bundleno = 192 (0xc0), region = 371  ;;  %s11315_s6 = smov (!%p8675_p7), 0  }
  0xa7 LB: >> { %v762_v25 = vld [vmem:[%s10912_s18] sm:$0xff]  ;;  %v764_v26 = vld [vmem:[%s10912_s18 + $0x10] sm:$0xff]  ;;  %s810_s5 = sadd.s32 1, %s10916_s28  ;;  %s756_s6 = sadd.s32 1, %s10920_s6   ;;  %s10920_s6 = sphi %s11315_s6, %s756_s6   ;;  %s10916_s28 = sphi %s11313_s28, %s13580_s28   ;;  %s10912_s18 = sphi %s8297_s18, %s13579_s18   ;;  %s10908_s9 = sphi %s13577_s9, %s13578_s9  }
  0xa8   : >> { %v766_v27 = vld [vmem:[%s10912_s18 + $0x20] sm:$0xff]  ;;  %763 = vst [vmem:[%s10908_s9] sm:$0xff] %v762_v25  ;;  %v768_v28 = vld [vmem:[%s10912_s18 + $0x30] sm:$0xff]  ;;  %p811_p9 = scmp.ge.s32.totalorder %s810_s5, %s11305_s3  ;;  %p755_p8 = scmp.ge.s32.totalorder %s756_s6, %s11305_s3 }
  0xa9   : >> { %765 = vst [vmem:[%s10908_s9 + $0x8] sm:$0xff] %v764_v26  ;;  %v770_v29 = vld [vmem:[%s10912_s18 + $0x40] sm:$0xff]  ;;  %v772_v30 = vld [vmem:[%s10912_s18 + $0x50] sm:$0xff] }
  0xaa   : >> { %767 = vst [vmem:[%s10908_s9 + $0x10] sm:$0xff] %v766_v27  ;;  %s13682_s5 = smov (%p811_p9, %s810_s5), 0  ;;  %v774_v31 = vld [vmem:[%s10912_s18 + $0x60] sm:$0xff]  ;;  %v776_v32 = vld [vmem:[%s10912_s18 + $0x70] sm:$0xff] }
  0xab   : >> { %769 = vst [vmem:[%s10908_s9 + $0x18] sm:$0xff] %v768_v28  ;;  %s814_s20 = smul.u32 192, %s13682_s5  ;;  %v778_v33 = vld [vmem:[%s10912_s18 + $0x80] sm:$0xff]  ;;  %v780_v34 = vld [vmem:[%s10912_s18 + $0x90] sm:$0xff]  ;;  %s13580_s28 = smov %s13682_s5 }
  0xac   : >> { %771 = vst [vmem:[%s10908_s9 + $0x20] sm:$0xff] %v770_v29  ;;  %s8298_s27 = smul.u32 384, %s13682_s5  ;;  %v782_v35 = vld [vmem:[%s10912_s18 + $0xa0] sm:$0xff]  ;;  %v784_v36 = vld [vmem:[%s10912_s18 + $0xb0] sm:$0xff] }
  0xad   : >> { %773 = vst [vmem:[%s10908_s9 + $0x28] sm:$0xff] %v772_v30  ;;  %s11350_s11 = scalar_lea.vmem %s11301_s17, %s814_s20 [#allocation5]   ;;  %v786_v37 = vld [vmem:[%s10912_s18 + $0xc0] sm:$0xff]  ;;  %v788_v38 = vld [vmem:[%s10912_s18 + $0xd0] sm:$0xff] }
  0xae   : >> { %775 = vst [vmem:[%s10908_s9 + $0x30] sm:$0xff] %v774_v31  ;;  %s11355_s30 = scalar_lea.vmem %s11298_s8, %s8298_s27  ;;  %v790_v39 = vld [vmem:[%s10912_s18 + $0xe0] sm:$0xff]  ;;  %v792_v40 = vld [vmem:[%s10912_s18 + $0xf0] sm:$0xff] }
  0xaf   : >> { %777 = vst [vmem:[%s10908_s9 + $0x38] sm:$0xff] %v776_v32  ;;  %s8300_s7 = scalar_lea.vmem %s11355_s30, 384   ;;  %v794_v41 = vld [vmem:[%s10912_s18 + $0x100] sm:$0xff]  ;;  %v796_v42 = vld [vmem:[%s10912_s18 + $0x110] sm:$0xff] }
  0xb0   : >> { %779 = vst [vmem:[%s10908_s9 + $0x40] sm:$0xff] %v778_v33  ;;  %v798_v43 = vld [vmem:[%s10912_s18 + $0x120] sm:$0xff]  ;;  %v800_v44 = vld [vmem:[%s10912_s18 + $0x130] sm:$0xff] }
  0xb1   : >> { %781 = vst [vmem:[%s10908_s9 + $0x48] sm:$0xff] %v780_v34  ;;  %v802_v45 = vld [vmem:[%s10912_s18 + $0x140] sm:$0xff]  ;;  %v804_v46 = vld [vmem:[%s10912_s18 + $0x150] sm:$0xff] }
  0xb2   : >> { %783 = vst [vmem:[%s10908_s9 + $0x50] sm:$0xff] %v782_v35  ;;  %v806_v47 = vld [vmem:[%s10912_s18 + $0x160] sm:$0xff]  ;;  %v808_v48 = vld [vmem:[%s10912_s18 + $0x170] sm:$0xff]  ;;  %s13579_s18 = smov %s8300_s7 }
  0xb3   : >> { %785 = vst [vmem:[%s10908_s9 + $0x58] sm:$0xff] %v784_v36 }
  0xb4   : >> { %787 = vst [vmem:[%s10908_s9 + $0x60] sm:$0xff] %v786_v37 }
  0xb5   : >> { %789 = vst [vmem:[%s10908_s9 + $0x68] sm:$0xff] %v788_v38 }
  0xb6   : >> { %791 = vst [vmem:[%s10908_s9 + $0x70] sm:$0xff] %v790_v39 }
  0xb7   : >> { %793 = vst [vmem:[%s10908_s9 + $0x78] sm:$0xff] %v792_v40 }
  0xb8   : >> { %795 = vst [vmem:[%s10908_s9 + $0x80] sm:$0xff] %v794_v41 }
  0xb9   : >> { %797 = vst [vmem:[%s10908_s9 + $0x88] sm:$0xff] %v796_v42 }
  0xba   : >> { %799 = vst [vmem:[%s10908_s9 + $0x90] sm:$0xff] %v798_v43 }
  0xbb   : >> { %801 = vst [vmem:[%s10908_s9 + $0x98] sm:$0xff] %v800_v44  ;;  %758 = sbr.rel (!%p755_p8) target bundleno = 167 (0xa7), region = 377 }
  0xbc   : >> { %803 = vst [vmem:[%s10908_s9 + $0xa0] sm:$0xff] %v802_v45 }
  0xbd   : >> { %805 = vst [vmem:[%s10908_s9 + $0xa8] sm:$0xff] %v804_v46 }
  0xbe   : >> { %807 = vst [vmem:[%s10908_s9 + $0xb0] sm:$0xff] %v806_v47 }
  0xbf   : >> { %809 = vst [vmem:[%s10908_s9 + $0xb8] sm:$0xff] %v808_v48  ;;  %s13578_s9 = smov %s11350_s11 }
  0xc0 PF: > { %10584 = sdivrem.u32 %s648_s26, 24 }
  0xc1   : > { %s8303_s29 = smul.u32 384, %s11305_s3 }
  0xc2   : > { %s8676_s20 = smul.u32 192, %s11305_s3 }
  0xc3   : > { %s11406_s27 = scalar_lea.vmem %s11298_s8, %s8303_s29 }
  0xc4   : > { %s8305_s11 = scalar_lea.vmem %s11406_s27, 384   ;;  %s11410_s30 = scalar_lea.vmem %s11301_s17, %s8676_s20 [#allocation5]  }
  0xc9   : > { %s10585_s5 = spop.drf %10584 }
  0xca   : > { %s10586_s7 = spop.drf %10584 }
  0xcb   : > { %p8677_p10 = scmp.le.s32.totalorder %s10586_s7, 0 }
  0xcc   : > { %s10922_s18 = smov (!%p8677_p10), %s11410_s30   ;;  %s10926_s21 = smov (!%p8677_p10), %s8305_s11  }
  0xcd   : > { %8477 = sbr.rel (%p8677_p10) target bundleno = 218 (0xda), region = 382  ;;  %s10930_s9 = smov (!%p8677_p10), 0  }
  0xce   : > { %s10934_s28 = smov (!%p8677_p10), 0  }
  0xd2 LB: >> { %v833_v49 = vld [vmem:[%s10928_s21] sm:$0xff]  ;;  %s835_s26 = sadd.s32 1, %s10932_s9  ;;  %s827_s28 = sadd.s32 1, %s10936_s28   ;;  %s10936_s28 = sphi %s10934_s28, %s827_s28   ;;  %s10932_s9 = sphi %s10930_s9, %s10931_s9   ;;  %s10928_s21 = sphi %s10926_s21, %s8310_s21   ;;  %s10924_s18 = sphi %s10922_s18, %s841_s18  }
  0xd3   : >> { %834 = vst [vmem:[%s10924_s18] sm:$0xff] %v833_v49  ;;  %p836_p12 = scmp.ge.s32.totalorder %s835_s26, %s10586_s7  ;;  %p826_p13 = scmp.ge.s32.totalorder %s827_s28, %s10586_s7 }
  0xd5   : >> { %s13684_s26 = smov (%p836_p12, %s835_s26), 0  ;;  %829 = sbr.rel (!%p826_p13) target bundleno = 210 (0xd2), region = 388 }
  0xd6   : >> { %s8678_s8 = sshll.u32 %s13684_s26, 3  ;;  %s8679_s17 = sshll.u32 %s13684_s26, 4 }
  0xd7   : >> { %s8309_s3 = scalar_lea.vmem %s11406_s27, %s8679_s17  ;;  %s841_s18 = scalar_lea.vmem %s11410_s30, %s8678_s8 [#allocation5]  }
  0xd8   : >> { %s8310_s21 = scalar_lea.vmem %s8309_s3, 384   ;;  %s10931_s9 = smov %s13684_s26  }
  0xda PF: > { %847 = sbr.rel (!%p11140_p4) target bundleno = 372 (0x174), region = 128  ;;  %s849_s6 = sand.u32 (%p11140_p4), 1, %s10828_s13  }
  0xdb   : > { %s9996_s29 = sshll.u32 (%p11140_p4), %s13666_s25, 7  ;;  %s10289_s20 = smul.u32 (%p11140_p4), 1152, %s849_s6 }
  0xdc   : > { %s13581_s2 = sld [smem:[#allocation50_spill]] (%p11140_p4) }
  0xdd   : > { %s11427_s25 = scalar_lea.vmem (%p11140_p4), [#allocation6], %s10289_s20 }
  0xe2   : > { %s11422_s9 = scalar_lea.vmem %s13581_s2, %s9996_s29 }
  0xe3   : > { %v875_v50 = vld [vmem:[%s11422_s9] sm:$0xff]   ;;  %v879_v51 = vld [vmem:[%s11422_s9 + $0x8] sm:$0xff]   ;;  %v883_v52 = vld [vmem:[%s11422_s9 + $0x10] sm:$0xff]  }
  0xe4   : > { %876 = vst [vmem:[%s11427_s25] sm:$0xff] %v875_v50   ;;  %v887_v53 = vld [vmem:[%s11422_s9 + $0x18] sm:$0xff]   ;;  %v891_v54 = vld [vmem:[%s11422_s9 + $0x20] sm:$0xff]   ;;  %v895_v55 = vld [vmem:[%s11422_s9 + $0x28] sm:$0xff]  }
  0xe5   : > { %880 = vst [vmem:[%s11427_s25 + $0x8] sm:$0xff] %v879_v51   ;;  %v899_v56 = vld [vmem:[%s11422_s9 + $0x30] sm:$0xff]   ;;  %v903_v57 = vld [vmem:[%s11422_s9 + $0x38] sm:$0xff]   ;;  %v907_v58 = vld [vmem:[%s11422_s9 + $0x40] sm:$0xff]  }
  0xe6   : > { %884 = vst [vmem:[%s11427_s25 + $0x10] sm:$0xff] %v883_v52   ;;  %v911_v59 = vld [vmem:[%s11422_s9 + $0x48] sm:$0xff]   ;;  %v915_v60 = vld [vmem:[%s11422_s9 + $0x50] sm:$0xff]   ;;  %v919_v61 = vld [vmem:[%s11422_s9 + $0x58] sm:$0xff]  }
  0xe7   : > { %888 = vst [vmem:[%s11427_s25 + $0x18] sm:$0xff] %v887_v53   ;;  %v923_v62 = vld [vmem:[%s11422_s9 + $0x60] sm:$0xff]   ;;  %v927_v63 = vld [vmem:[%s11422_s9 + $0x68] sm:$0xff]   ;;  %v931_v0 = vld [vmem:[%s11422_s9 + $0x70] sm:$0xff]  }
  0xe8   : > { %892 = vst [vmem:[%s11427_s25 + $0x20] sm:$0xff] %v891_v54   ;;  %v935_v1 = vld [vmem:[%s11422_s9 + $0x78] sm:$0xff]   ;;  %v939_v2 = vld [vmem:[%s11422_s9 + $0x100] sm:$0xff]   ;;  %v943_v3 = vld [vmem:[%s11422_s9 + $0x108] sm:$0xff]  }
  0xe9   : > { %896 = vst [vmem:[%s11427_s25 + $0x28] sm:$0xff] %v895_v55   ;;  %v947_v4 = vld [vmem:[%s11422_s9 + $0x110] sm:$0xff]   ;;  %v951_v5 = vld [vmem:[%s11422_s9 + $0x118] sm:$0xff]   ;;  %v955_v6 = vld [vmem:[%s11422_s9 + $0x120] sm:$0xff]  }
  0xea   : > { %900 = vst [vmem:[%s11427_s25 + $0x30] sm:$0xff] %v899_v56   ;;  %v959_v7 = vld [vmem:[%s11422_s9 + $0x128] sm:$0xff]   ;;  %v963_v8 = vld [vmem:[%s11422_s9 + $0x130] sm:$0xff]   ;;  %v967_v9 = vld [vmem:[%s11422_s9 + $0x138] sm:$0xff]  }
  0xeb   : > { %904 = vst [vmem:[%s11427_s25 + $0x38] sm:$0xff] %v903_v57   ;;  %v971_v10 = vld [vmem:[%s11422_s9 + $0x140] sm:$0xff]   ;;  %v975_v11 = vld [vmem:[%s11422_s9 + $0x148] sm:$0xff]   ;;  %v979_v12 = vld [vmem:[%s11422_s9 + $0x150] sm:$0xff]  }
  0xec   : > { %908 = vst [vmem:[%s11427_s25 + $0x40] sm:$0xff] %v907_v58   ;;  %v983_v13 = vld [vmem:[%s11422_s9 + $0x158] sm:$0xff]   ;;  %v987_v14 = vld [vmem:[%s11422_s9 + $0x160] sm:$0xff]   ;;  %v991_v15 = vld [vmem:[%s11422_s9 + $0x168] sm:$0xff]  }
  0xed   : > { %912 = vst [vmem:[%s11427_s25 + $0x48] sm:$0xff] %v911_v59   ;;  %v995_v16 = vld [vmem:[%s11422_s9 + $0x170] sm:$0xff]   ;;  %v999_v17 = vld [vmem:[%s11422_s9 + $0x178] sm:$0xff]   ;;  %v1003_v18 = vld [vmem:[%s11422_s9 + $0x200] sm:$0xff]  }
  0xee   : > { %916 = vst [vmem:[%s11427_s25 + $0x50] sm:$0xff] %v915_v60   ;;  %v1007_v19 = vld [vmem:[%s11422_s9 + $0x208] sm:$0xff]   ;;  %v1011_v20 = vld [vmem:[%s11422_s9 + $0x210] sm:$0xff]   ;;  %v1015_v21 = vld [vmem:[%s11422_s9 + $0x218] sm:$0xff]  }
  0xef   : > { %920 = vst [vmem:[%s11427_s25 + $0x58] sm:$0xff] %v919_v61   ;;  %v1019_v22 = vld [vmem:[%s11422_s9 + $0x220] sm:$0xff]   ;;  %v1023_v23 = vld [vmem:[%s11422_s9 + $0x228] sm:$0xff]   ;;  %v1027_v24 = vld [vmem:[%s11422_s9 + $0x230] sm:$0xff]  }
  0xf0   : > { %924 = vst [vmem:[%s11427_s25 + $0x60] sm:$0xff] %v923_v62   ;;  %v1031_v25 = vld [vmem:[%s11422_s9 + $0x238] sm:$0xff]   ;;  %v1035_v26 = vld [vmem:[%s11422_s9 + $0x240] sm:$0xff]   ;;  %v1039_v27 = vld [vmem:[%s11422_s9 + $0x248] sm:$0xff]  }
  0xf1   : > { %928 = vst [vmem:[%s11427_s25 + $0x68] sm:$0xff] %v927_v63   ;;  %v1043_v28 = vld [vmem:[%s11422_s9 + $0x250] sm:$0xff]   ;;  %v1047_v29 = vld [vmem:[%s11422_s9 + $0x258] sm:$0xff]   ;;  %v1051_v30 = vld [vmem:[%s11422_s9 + $0x260] sm:$0xff]  }
  0xf2   : > { %932 = vst [vmem:[%s11427_s25 + $0x70] sm:$0xff] %v931_v0   ;;  %v1055_v31 = vld [vmem:[%s11422_s9 + $0x268] sm:$0xff]   ;;  %v1059_v32 = vld [vmem:[%s11422_s9 + $0x270] sm:$0xff]   ;;  %v1063_v33 = vld [vmem:[%s11422_s9 + $0x278] sm:$0xff]  }
  0xf3   : > { %936 = vst [vmem:[%s11427_s25 + $0x78] sm:$0xff] %v935_v1   ;;  %v1067_v34 = vld [vmem:[%s11422_s9 + $0x300] sm:$0xff]   ;;  %v1071_v35 = vld [vmem:[%s11422_s9 + $0x308] sm:$0xff]   ;;  %v1075_v36 = vld [vmem:[%s11422_s9 + $0x310] sm:$0xff]  }
  0xf4   : > { %940 = vst [vmem:[%s11427_s25 + $0x80] sm:$0xff] %v939_v2   ;;  %v1079_v37 = vld [vmem:[%s11422_s9 + $0x318] sm:$0xff]   ;;  %v1083_v38 = vld [vmem:[%s11422_s9 + $0x320] sm:$0xff]   ;;  %v1087_v39 = vld [vmem:[%s11422_s9 + $0x328] sm:$0xff]  }
  0xf5   : > { %944 = vst [vmem:[%s11427_s25 + $0x88] sm:$0xff] %v943_v3   ;;  %v1091_v40 = vld [vmem:[%s11422_s9 + $0x330] sm:$0xff]   ;;  %v1095_v41 = vld [vmem:[%s11422_s9 + $0x338] sm:$0xff]   ;;  %v1099_v42 = vld [vmem:[%s11422_s9 + $0x340] sm:$0xff]  }
  0xf6   : > { %948 = vst [vmem:[%s11427_s25 + $0x90] sm:$0xff] %v947_v4   ;;  %v1103_v43 = vld [vmem:[%s11422_s9 + $0x348] sm:$0xff]   ;;  %v1107_v44 = vld [vmem:[%s11422_s9 + $0x350] sm:$0xff]   ;;  %v1111_v45 = vld [vmem:[%s11422_s9 + $0x358] sm:$0xff]  }
  0xf7   : > { %952 = vst [vmem:[%s11427_s25 + $0x98] sm:$0xff] %v951_v5   ;;  %v1115_v46 = vld [vmem:[%s11422_s9 + $0x360] sm:$0xff]   ;;  %v1119_v47 = vld [vmem:[%s11422_s9 + $0x368] sm:$0xff]   ;;  %v1123_v48 = vld [vmem:[%s11422_s9 + $0x370] sm:$0xff]  }
  0xf8   : > { %956 = vst [vmem:[%s11427_s25 + $0xa0] sm:$0xff] %v955_v6   ;;  %v1127_v49 = vld [vmem:[%s11422_s9 + $0x378] sm:$0xff]   ;;  %v1131_v50 = vld [vmem:[%s11422_s9 + $0x400] sm:$0xff]   ;;  %v1135_v51 = vld [vmem:[%s11422_s9 + $0x408] sm:$0xff]  }
  0xf9   : > { %960 = vst [vmem:[%s11427_s25 + $0xa8] sm:$0xff] %v959_v7   ;;  %v1139_v52 = vld [vmem:[%s11422_s9 + $0x410] sm:$0xff]   ;;  %v1143_v53 = vld [vmem:[%s11422_s9 + $0x418] sm:$0xff]   ;;  %v1147_v54 = vld [vmem:[%s11422_s9 + $0x420] sm:$0xff]  }
  0xfa   : > { %964 = vst [vmem:[%s11427_s25 + $0xb0] sm:$0xff] %v963_v8   ;;  %v1151_v55 = vld [vmem:[%s11422_s9 + $0x428] sm:$0xff]   ;;  %v1155_v56 = vld [vmem:[%s11422_s9 + $0x430] sm:$0xff]   ;;  %v1159_v57 = vld [vmem:[%s11422_s9 + $0x438] sm:$0xff]  }
  0xfb   : > { %968 = vst [vmem:[%s11427_s25 + $0xb8] sm:$0xff] %v967_v9   ;;  %v1163_v58 = vld [vmem:[%s11422_s9 + $0x440] sm:$0xff]   ;;  %v1167_v59 = vld [vmem:[%s11422_s9 + $0x448] sm:$0xff]   ;;  %v1171_v60 = vld [vmem:[%s11422_s9 + $0x450] sm:$0xff]  }
  0xfc   : > { %972 = vst [vmem:[%s11427_s25 + $0xc0] sm:$0xff] %v971_v10   ;;  %v1175_v61 = vld [vmem:[%s11422_s9 + $0x458] sm:$0xff]   ;;  %v1179_v62 = vld [vmem:[%s11422_s9 + $0x460] sm:$0xff]   ;;  %v1183_v63 = vld [vmem:[%s11422_s9 + $0x468] sm:$0xff]  }
  0xfd   : > { %976 = vst [vmem:[%s11427_s25 + $0xc8] sm:$0xff] %v975_v11   ;;  %v1187_v0 = vld [vmem:[%s11422_s9 + $0x470] sm:$0xff]   ;;  %v1191_v1 = vld [vmem:[%s11422_s9 + $0x478] sm:$0xff]   ;;  %v1195_v2 = vld [vmem:[%s11422_s9 + $0x500] sm:$0xff]  }
  0xfe   : > { %980 = vst [vmem:[%s11427_s25 + $0xd0] sm:$0xff] %v979_v12   ;;  %v1199_v3 = vld [vmem:[%s11422_s9 + $0x508] sm:$0xff]   ;;  %v1203_v4 = vld [vmem:[%s11422_s9 + $0x510] sm:$0xff]   ;;  %v1207_v5 = vld [vmem:[%s11422_s9 + $0x518] sm:$0xff]  }
  0xff   : > { %984 = vst [vmem:[%s11427_s25 + $0xd8] sm:$0xff] %v983_v13   ;;  %v1211_v6 = vld [vmem:[%s11422_s9 + $0x520] sm:$0xff]   ;;  %v1215_v7 = vld [vmem:[%s11422_s9 + $0x528] sm:$0xff]   ;;  %v1219_v8 = vld [vmem:[%s11422_s9 + $0x530] sm:$0xff]  }
 0x100   : > { %988 = vst [vmem:[%s11427_s25 + $0xe0] sm:$0xff] %v987_v14   ;;  %v1223_v9 = vld [vmem:[%s11422_s9 + $0x538] sm:$0xff]   ;;  %v1227_v10 = vld [vmem:[%s11422_s9 + $0x540] sm:$0xff]   ;;  %v1231_v11 = vld [vmem:[%s11422_s9 + $0x548] sm:$0xff]  }
 0x101   : > { %992 = vst [vmem:[%s11427_s25 + $0xe8] sm:$0xff] %v991_v15   ;;  %v1235_v12 = vld [vmem:[%s11422_s9 + $0x550] sm:$0xff]   ;;  %v1239_v13 = vld [vmem:[%s11422_s9 + $0x558] sm:$0xff]   ;;  %v1243_v14 = vld [vmem:[%s11422_s9 + $0x560] sm:$0xff]  }
 0x102   : > { %996 = vst [vmem:[%s11427_s25 + $0xf0] sm:$0xff] %v995_v16   ;;  %v1247_v15 = vld [vmem:[%s11422_s9 + $0x568] sm:$0xff]   ;;  %v1251_v16 = vld [vmem:[%s11422_s9 + $0x570] sm:$0xff]  }
 0x103   : > { %1000 = vst [vmem:[%s11427_s25 + $0xf8] sm:$0xff] %v999_v17   ;;  %v1255_v17 = vld [vmem:[%s11422_s9 + $0x578] sm:$0xff]  }
 0x104   : > { %1004 = vst [vmem:[%s11427_s25 + $0x100] sm:$0xff] %v1003_v18   ;;  %v1259_v18 = vld [vmem:[%s11422_s9 + $0x600] sm:$0xff]  }
 0x105   : > { %1008 = vst [vmem:[%s11427_s25 + $0x108] sm:$0xff] %v1007_v19   ;;  %v1263_v19 = vld [vmem:[%s11422_s9 + $0x608] sm:$0xff]  }
 0x106   : > { %1012 = vst [vmem:[%s11427_s25 + $0x110] sm:$0xff] %v1011_v20   ;;  %v1267_v20 = vld [vmem:[%s11422_s9 + $0x610] sm:$0xff]  }
 0x107   : > { %1016 = vst [vmem:[%s11427_s25 + $0x118] sm:$0xff] %v1015_v21   ;;  %v1271_v21 = vld [vmem:[%s11422_s9 + $0x618] sm:$0xff]  }
 0x108   : > { %1020 = vst [vmem:[%s11427_s25 + $0x120] sm:$0xff] %v1019_v22   ;;  %v1275_v22 = vld [vmem:[%s11422_s9 + $0x620] sm:$0xff]  }
 0x109   : > { %1024 = vst [vmem:[%s11427_s25 + $0x128] sm:$0xff] %v1023_v23   ;;  %v1279_v23 = vld [vmem:[%s11422_s9 + $0x628] sm:$0xff]  }
 0x10a   : > { %1028 = vst [vmem:[%s11427_s25 + $0x130] sm:$0xff] %v1027_v24   ;;  %v1283_v24 = vld [vmem:[%s11422_s9 + $0x630] sm:$0xff]  }
 0x10b   : > { %1032 = vst [vmem:[%s11427_s25 + $0x138] sm:$0xff] %v1031_v25   ;;  %v1287_v25 = vld [vmem:[%s11422_s9 + $0x638] sm:$0xff]  }
 0x10c   : > { %1036 = vst [vmem:[%s11427_s25 + $0x140] sm:$0xff] %v1035_v26   ;;  %v1291_v26 = vld [vmem:[%s11422_s9 + $0x640] sm:$0xff]  }
 0x10d   : > { %1040 = vst [vmem:[%s11427_s25 + $0x148] sm:$0xff] %v1039_v27   ;;  %v1295_v27 = vld [vmem:[%s11422_s9 + $0x648] sm:$0xff]  }
 0x10e   : > { %1044 = vst [vmem:[%s11427_s25 + $0x150] sm:$0xff] %v1043_v28   ;;  %v1299_v28 = vld [vmem:[%s11422_s9 + $0x650] sm:$0xff]  }
 0x10f   : > { %1048 = vst [vmem:[%s11427_s25 + $0x158] sm:$0xff] %v1047_v29   ;;  %v1303_v29 = vld [vmem:[%s11422_s9 + $0x658] sm:$0xff]  }
 0x110   : > { %1052 = vst [vmem:[%s11427_s25 + $0x160] sm:$0xff] %v1051_v30   ;;  %v1307_v30 = vld [vmem:[%s11422_s9 + $0x660] sm:$0xff]  }
 0x111   : > { %1056 = vst [vmem:[%s11427_s25 + $0x168] sm:$0xff] %v1055_v31   ;;  %v1311_v31 = vld [vmem:[%s11422_s9 + $0x668] sm:$0xff]  }
 0x112   : > { %1060 = vst [vmem:[%s11427_s25 + $0x170] sm:$0xff] %v1059_v32   ;;  %v1315_v32 = vld [vmem:[%s11422_s9 + $0x670] sm:$0xff]  }
 0x113   : > { %1064 = vst [vmem:[%s11427_s25 + $0x178] sm:$0xff] %v1063_v33   ;;  %v1319_v33 = vld [vmem:[%s11422_s9 + $0x678] sm:$0xff]  }
 0x114   : > { %1068 = vst [vmem:[%s11427_s25 + $0x180] sm:$0xff] %v1067_v34   ;;  %v1323_v34 = vld [vmem:[%s11422_s9 + $0x700] sm:$0xff]  }
 0x115   : > { %1072 = vst [vmem:[%s11427_s25 + $0x188] sm:$0xff] %v1071_v35   ;;  %v1327_v35 = vld [vmem:[%s11422_s9 + $0x708] sm:$0xff]  }
 0x116   : > { %1076 = vst [vmem:[%s11427_s25 + $0x190] sm:$0xff] %v1075_v36   ;;  %v1331_v36 = vld [vmem:[%s11422_s9 + $0x710] sm:$0xff]  }
 0x117   : > { %1080 = vst [vmem:[%s11427_s25 + $0x198] sm:$0xff] %v1079_v37   ;;  %v1335_v37 = vld [vmem:[%s11422_s9 + $0x718] sm:$0xff]  }
 0x118   : > { %1084 = vst [vmem:[%s11427_s25 + $0x1a0] sm:$0xff] %v1083_v38   ;;  %v1339_v38 = vld [vmem:[%s11422_s9 + $0x720] sm:$0xff]  }
 0x119   : > { %1088 = vst [vmem:[%s11427_s25 + $0x1a8] sm:$0xff] %v1087_v39   ;;  %v1343_v39 = vld [vmem:[%s11422_s9 + $0x728] sm:$0xff]  }
 0x11a   : > { %1092 = vst [vmem:[%s11427_s25 + $0x1b0] sm:$0xff] %v1091_v40   ;;  %v1347_v40 = vld [vmem:[%s11422_s9 + $0x730] sm:$0xff]  }
 0x11b   : > { %1096 = vst [vmem:[%s11427_s25 + $0x1b8] sm:$0xff] %v1095_v41   ;;  %v1351_v41 = vld [vmem:[%s11422_s9 + $0x738] sm:$0xff]  }
 0x11c   : > { %1100 = vst [vmem:[%s11427_s25 + $0x1c0] sm:$0xff] %v1099_v42   ;;  %v1355_v42 = vld [vmem:[%s11422_s9 + $0x740] sm:$0xff]  }
 0x11d   : > { %1104 = vst [vmem:[%s11427_s25 + $0x1c8] sm:$0xff] %v1103_v43   ;;  %v1359_v43 = vld [vmem:[%s11422_s9 + $0x748] sm:$0xff]  }
 0x11e   : > { %1108 = vst [vmem:[%s11427_s25 + $0x1d0] sm:$0xff] %v1107_v44   ;;  %v1363_v44 = vld [vmem:[%s11422_s9 + $0x750] sm:$0xff]  }
 0x11f   : > { %1112 = vst [vmem:[%s11427_s25 + $0x1d8] sm:$0xff] %v1111_v45   ;;  %v1367_v45 = vld [vmem:[%s11422_s9 + $0x758] sm:$0xff]  }
 0x120   : > { %1116 = vst [vmem:[%s11427_s25 + $0x1e0] sm:$0xff] %v1115_v46   ;;  %v1371_v46 = vld [vmem:[%s11422_s9 + $0x760] sm:$0xff]  }
 0x121   : > { %1120 = vst [vmem:[%s11427_s25 + $0x1e8] sm:$0xff] %v1119_v47   ;;  %v1375_v47 = vld [vmem:[%s11422_s9 + $0x768] sm:$0xff]  }
 0x122   : > { %1124 = vst [vmem:[%s11427_s25 + $0x1f0] sm:$0xff] %v1123_v48   ;;  %v1379_v48 = vld [vmem:[%s11422_s9 + $0x770] sm:$0xff]  }
 0x123   : > { %1128 = vst [vmem:[%s11427_s25 + $0x1f8] sm:$0xff] %v1127_v49   ;;  %v1383_v49 = vld [vmem:[%s11422_s9 + $0x778] sm:$0xff]  }
 0x124   : > { %1132 = vst [vmem:[%s11427_s25 + $0x200] sm:$0xff] %v1131_v50   ;;  %v1387_v50 = vld [vmem:[%s11422_s9 + $0x800] sm:$0xff]  }
 0x125   : > { %1136 = vst [vmem:[%s11427_s25 + $0x208] sm:$0xff] %v1135_v51   ;;  %v1391_v51 = vld [vmem:[%s11422_s9 + $0x808] sm:$0xff]  }
 0x126   : > { %1140 = vst [vmem:[%s11427_s25 + $0x210] sm:$0xff] %v1139_v52   ;;  %v1395_v52 = vld [vmem:[%s11422_s9 + $0x810] sm:$0xff]  }
 0x127   : > { %1144 = vst [vmem:[%s11427_s25 + $0x218] sm:$0xff] %v1143_v53   ;;  %v1399_v53 = vld [vmem:[%s11422_s9 + $0x818] sm:$0xff]  }
 0x128   : > { %1148 = vst [vmem:[%s11427_s25 + $0x220] sm:$0xff] %v1147_v54   ;;  %v1403_v54 = vld [vmem:[%s11422_s9 + $0x820] sm:$0xff]  }
 0x129   : > { %1152 = vst [vmem:[%s11427_s25 + $0x228] sm:$0xff] %v1151_v55   ;;  %v1407_v55 = vld [vmem:[%s11422_s9 + $0x828] sm:$0xff]  }
 0x12a   : > { %1156 = vst [vmem:[%s11427_s25 + $0x230] sm:$0xff] %v1155_v56   ;;  %v1411_v56 = vld [vmem:[%s11422_s9 + $0x830] sm:$0xff]  }
 0x12b   : > { %1160 = vst [vmem:[%s11427_s25 + $0x238] sm:$0xff] %v1159_v57   ;;  %v1415_v57 = vld [vmem:[%s11422_s9 + $0x838] sm:$0xff]  }
 0x12c   : > { %1164 = vst [vmem:[%s11427_s25 + $0x240] sm:$0xff] %v1163_v58   ;;  %v1419_v58 = vld [vmem:[%s11422_s9 + $0x840] sm:$0xff]  }
 0x12d   : > { %1168 = vst [vmem:[%s11427_s25 + $0x248] sm:$0xff] %v1167_v59   ;;  %v1423_v59 = vld [vmem:[%s11422_s9 + $0x848] sm:$0xff]  }
 0x12e   : > { %1172 = vst [vmem:[%s11427_s25 + $0x250] sm:$0xff] %v1171_v60   ;;  %v1427_v60 = vld [vmem:[%s11422_s9 + $0x850] sm:$0xff]  }
 0x12f   : > { %1176 = vst [vmem:[%s11427_s25 + $0x258] sm:$0xff] %v1175_v61   ;;  %v1431_v61 = vld [vmem:[%s11422_s9 + $0x858] sm:$0xff]  }
 0x130   : > { %1180 = vst [vmem:[%s11427_s25 + $0x260] sm:$0xff] %v1179_v62   ;;  %v1435_v62 = vld [vmem:[%s11422_s9 + $0x860] sm:$0xff]  }
 0x131   : > { %1184 = vst [vmem:[%s11427_s25 + $0x268] sm:$0xff] %v1183_v63   ;;  %v1439_v63 = vld [vmem:[%s11422_s9 + $0x868] sm:$0xff]  }
 0x132   : > { %1188 = vst [vmem:[%s11427_s25 + $0x270] sm:$0xff] %v1187_v0   ;;  %v1443_v0 = vld [vmem:[%s11422_s9 + $0x870] sm:$0xff]  }
 0x133   : > { %1192 = vst [vmem:[%s11427_s25 + $0x278] sm:$0xff] %v1191_v1   ;;  %v1447_v1 = vld [vmem:[%s11422_s9 + $0x878] sm:$0xff]  }
 0x134   : > { %1196 = vst [vmem:[%s11427_s25 + $0x280] sm:$0xff] %v1195_v2  }
 0x135   : > { %1200 = vst [vmem:[%s11427_s25 + $0x288] sm:$0xff] %v1199_v3  }
 0x136   : > { %1204 = vst [vmem:[%s11427_s25 + $0x290] sm:$0xff] %v1203_v4  }
 0x137   : > { %1208 = vst [vmem:[%s11427_s25 + $0x298] sm:$0xff] %v1207_v5  }
 0x138   : > { %1212 = vst [vmem:[%s11427_s25 + $0x2a0] sm:$0xff] %v1211_v6  }
 0x139   : > { %1216 = vst [vmem:[%s11427_s25 + $0x2a8] sm:$0xff] %v1215_v7  }
 0x13a   : > { %1220 = vst [vmem:[%s11427_s25 + $0x2b0] sm:$0xff] %v1219_v8  }
 0x13b   : > { %1224 = vst [vmem:[%s11427_s25 + $0x2b8] sm:$0xff] %v1223_v9  }
 0x13c   : > { %1228 = vst [vmem:[%s11427_s25 + $0x2c0] sm:$0xff] %v1227_v10  }
 0x13d   : > { %1232 = vst [vmem:[%s11427_s25 + $0x2c8] sm:$0xff] %v1231_v11  }
 0x13e   : > { %1236 = vst [vmem:[%s11427_s25 + $0x2d0] sm:$0xff] %v1235_v12  }
 0x13f   : > { %1240 = vst [vmem:[%s11427_s25 + $0x2d8] sm:$0xff] %v1239_v13  }
 0x140   : > { %1244 = vst [vmem:[%s11427_s25 + $0x2e0] sm:$0xff] %v1243_v14  }
 0x141   : > { %1248 = vst [vmem:[%s11427_s25 + $0x2e8] sm:$0xff] %v1247_v15  }
 0x142   : > { %1252 = vst [vmem:[%s11427_s25 + $0x2f0] sm:$0xff] %v1251_v16  }
 0x143   : > { %1256 = vst [vmem:[%s11427_s25 + $0x2f8] sm:$0xff] %v1255_v17  }
 0x144   : > { %1260 = vst [vmem:[%s11427_s25 + $0x300] sm:$0xff] %v1259_v18  }
 0x145   : > { %1264 = vst [vmem:[%s11427_s25 + $0x308] sm:$0xff] %v1263_v19  }
 0x146   : > { %1268 = vst [vmem:[%s11427_s25 + $0x310] sm:$0xff] %v1267_v20  }
 0x147   : > { %1272 = vst [vmem:[%s11427_s25 + $0x318] sm:$0xff] %v1271_v21  }
 0x148   : > { %1276 = vst [vmem:[%s11427_s25 + $0x320] sm:$0xff] %v1275_v22  }
 0x149   : > { %1280 = vst [vmem:[%s11427_s25 + $0x328] sm:$0xff] %v1279_v23  }
 0x14a   : > { %1284 = vst [vmem:[%s11427_s25 + $0x330] sm:$0xff] %v1283_v24  }
 0x14b   : > { %1288 = vst [vmem:[%s11427_s25 + $0x338] sm:$0xff] %v1287_v25  }
 0x14c   : > { %1292 = vst [vmem:[%s11427_s25 + $0x340] sm:$0xff] %v1291_v26  }
 0x14d   : > { %1296 = vst [vmem:[%s11427_s25 + $0x348] sm:$0xff] %v1295_v27  }
 0x14e   : > { %1300 = vst [vmem:[%s11427_s25 + $0x350] sm:$0xff] %v1299_v28  }
 0x14f   : > { %1304 = vst [vmem:[%s11427_s25 + $0x358] sm:$0xff] %v1303_v29  }
 0x150   : > { %1308 = vst [vmem:[%s11427_s25 + $0x360] sm:$0xff] %v1307_v30  }
 0x151   : > { %1312 = vst [vmem:[%s11427_s25 + $0x368] sm:$0xff] %v1311_v31  }
 0x152   : > { %1316 = vst [vmem:[%s11427_s25 + $0x370] sm:$0xff] %v1315_v32  }
 0x153   : > { %1320 = vst [vmem:[%s11427_s25 + $0x378] sm:$0xff] %v1319_v33  }
 0x154   : > { %1324 = vst [vmem:[%s11427_s25 + $0x380] sm:$0xff] %v1323_v34  }
 0x155   : > { %1328 = vst [vmem:[%s11427_s25 + $0x388] sm:$0xff] %v1327_v35  }
 0x156   : > { %1332 = vst [vmem:[%s11427_s25 + $0x390] sm:$0xff] %v1331_v36  }
 0x157   : > { %1336 = vst [vmem:[%s11427_s25 + $0x398] sm:$0xff] %v1335_v37  }
 0x158   : > { %1340 = vst [vmem:[%s11427_s25 + $0x3a0] sm:$0xff] %v1339_v38  }
 0x159   : > { %1344 = vst [vmem:[%s11427_s25 + $0x3a8] sm:$0xff] %v1343_v39  }
 0x15a   : > { %1348 = vst [vmem:[%s11427_s25 + $0x3b0] sm:$0xff] %v1347_v40  }
 0x15b   : > { %1352 = vst [vmem:[%s11427_s25 + $0x3b8] sm:$0xff] %v1351_v41  }
 0x15c   : > { %1356 = vst [vmem:[%s11427_s25 + $0x3c0] sm:$0xff] %v1355_v42  }
 0x15d   : > { %1360 = vst [vmem:[%s11427_s25 + $0x3c8] sm:$0xff] %v1359_v43  }
 0x15e   : > { %1364 = vst [vmem:[%s11427_s25 + $0x3d0] sm:$0xff] %v1363_v44  }
 0x15f   : > { %1368 = vst [vmem:[%s11427_s25 + $0x3d8] sm:$0xff] %v1367_v45  }
 0x160   : > { %1372 = vst [vmem:[%s11427_s25 + $0x3e0] sm:$0xff] %v1371_v46  }
 0x161   : > { %1376 = vst [vmem:[%s11427_s25 + $0x3e8] sm:$0xff] %v1375_v47  }
 0x162   : > { %1380 = vst [vmem:[%s11427_s25 + $0x3f0] sm:$0xff] %v1379_v48  }
 0x163   : > { %1384 = vst [vmem:[%s11427_s25 + $0x3f8] sm:$0xff] %v1383_v49  }
 0x164   : > { %1388 = vst [vmem:[%s11427_s25 + $0x400] sm:$0xff] %v1387_v50  }
 0x165   : > { %1392 = vst [vmem:[%s11427_s25 + $0x408] sm:$0xff] %v1391_v51  }
 0x166   : > { %1396 = vst [vmem:[%s11427_s25 + $0x410] sm:$0xff] %v1395_v52  }
 0x167   : > { %1400 = vst [vmem:[%s11427_s25 + $0x418] sm:$0xff] %v1399_v53  }
 0x168   : > { %1404 = vst [vmem:[%s11427_s25 + $0x420] sm:$0xff] %v1403_v54  }
 0x169   : > { %1408 = vst [vmem:[%s11427_s25 + $0x428] sm:$0xff] %v1407_v55  }
 0x16a   : > { %1412 = vst [vmem:[%s11427_s25 + $0x430] sm:$0xff] %v1411_v56  }
 0x16b   : > { %1416 = vst [vmem:[%s11427_s25 + $0x438] sm:$0xff] %v1415_v57  }
 0x16c   : > { %1420 = vst [vmem:[%s11427_s25 + $0x440] sm:$0xff] %v1419_v58  }
 0x16d   : > { %1424 = vst [vmem:[%s11427_s25 + $0x448] sm:$0xff] %v1423_v59  }
 0x16e   : > { %1428 = vst [vmem:[%s11427_s25 + $0x450] sm:$0xff] %v1427_v60  }
 0x16f   : > { %1432 = vst [vmem:[%s11427_s25 + $0x458] sm:$0xff] %v1431_v61  }
 0x170   : > { %1436 = vst [vmem:[%s11427_s25 + $0x460] sm:$0xff] %v1435_v62  }
 0x171   : > { %1440 = vst [vmem:[%s11427_s25 + $0x468] sm:$0xff] %v1439_v63  }
 0x172   : > { %1444 = vst [vmem:[%s11427_s25 + $0x470] sm:$0xff] %v1443_v0  }
 0x173   : > { %1448 = vst [vmem:[%s11427_s25 + $0x478] sm:$0xff] %v1447_v1  }
 0x174 PF: > { %p8687_p4 = scmp.ge.s32.totalorder %s10872_s24, 1  ;;  %p3322_p1 = scmp.lt.s32.totalorder %s10872_s24, 13 }
 0x176   : > { %p3323_p2 = pnand %p8687_p4, %p3322_p1 }
 0x177   : > { %s13582_s4 = sld [smem:[#allocation18_spill]] (!%p3323_p2)  ;;  %s3329_s27 = sand.u32 (!%p3323_p2), 1, %s10840_s16  }
 0x178   : > { %3326 = sbr.rel (%p3323_p2) target bundleno = 1820 (0x71c), region = 192  ;;  %s3336_s30 = sand.u32 (!%p3323_p2), 1, %s10832_s14  }
 0x179   : > { %s10290_s7 = smul.u32 (!%p3323_p2), 192, %s3329_s27  ;;  %s3343_s18 = sand.u32 (!%p3323_p2), 1, %s10824_s12  }
 0x17a   : > { %s10291_s21 = smul.u32 (!%p3323_p2), 192, %s3336_s30  ;;  %s11720_s28 = sand.u32 (!%p3323_p2), 1, %s10816_s10  }
 0x17b   : > { %s10292_s26 = smul.u32 (!%p3323_p2), 1152, %s3343_s18  ;;  %s8688_s8 = sshll.u32 (!%p3323_p2), %s11720_s28, 6 }
 0x17c   : > { %s8695_s17 = sshll.u32 (!%p3323_p2), %s10852_s19, 3  ;;  %s13583_s5 = sld [smem:[#allocation51_spill]] (!%p3323_p2) }
 0x17d   : > { %p3492_p3 = scmp.lt.s32.totalorder %s13582_s4, 1  ;;  %p3494_p5 = scmp.lt.s32.totalorder %s8695_s17, 17 }
 0x17e   : > { %s9998_s3 = sadd.s32 8, %s8695_s17  ;;  %s13584_s0 = sld [smem:[#allocation52_spill]] }
 0x17f   : > { %s13686_s4 = smov (!%p3492_p3, %s13582_s4), 1  ;;  %s13688_s17 = smov (!%p3494_p5, %s8695_s17), 17 }
 0x180   : > { %s10294_s6 = smul.u32 54, %s13686_s4  ;;  %p3529_p0 = scmp.lt.s32.totalorder %s9998_s3, 17 }
 0x181   : > { %s10293_s16 = smul.u32 3, %s13688_s17  ;;  %s11736_s4 = scalar_lea.vmem [#allocation4], %s10290_s7 }
 0x182   : > { %s13690_s3 = smov (!%p3529_p0, %s9998_s3), 17  ;;  %s11738_s2 = scalar_lea.vmem [#allocation5], %s10291_s21 }
 0x183   : > { %s3501_s14 = sadd.s32 %s10294_s6, %s10293_s16  ;;  %s10295_s29 = smul.u32 3, %s13690_s3 }
 0x184   : > { %s8696_s12 = sshll.u32 %s3501_s14, 2  ;;  %s11740_s17 = scalar_lea.vmem [#allocation6], %s10292_s26 }
 0x185   : > { %s11729_s9 = scalar_lea.vmem %s13583_s5, %s8696_s12  ;;  %s3536_s25 = sadd.s32 %s10295_s29, %s10294_s6 }
 0x186   : > { %s8704_s27 = sshll.u32 %s3536_s25, 2  ;;  %s11742_s16 = scalar_lea.vmem [#allocation7], %s8688_s8 }
 0x187   : > { %s11734_s1 = scalar_lea.vmem %s13584_s0, %s8704_s27  ;;  %s3444_s3 = scalar_lea.vmem [#allocation9], %s11720_s28 }
 0x188   : > { %s13530_s14 = scalar_lea.vmem [#allocation11], %s11720_s28  ;;  %s13585_s20 = sld [smem:[#allocation17_spill]] }
 0x18e   : > { %p8713_p7 = scmp.ne.s32.totalorder %s13585_s20, 0 }
 0x190   : > { %3572 = sbr.rel (%p8713_p7) target bundleno = 422 (0x1a6), region = 208 }
 0x195   : > { %v10939_v2 = vmov 0.0  }
 0x196   : > { %3573 = vst [vmem:[#allocation2 + $0x30] sm:$0xff] %v10939_v2 }
 0x197   : > { %3574 = vst [vmem:[#allocation2] sm:$0xff] %v10939_v2 }
 0x198   : > { %3575 = vst [vmem:[#allocation2 + $0x58] sm:$0xff] %v10939_v2 }
 0x199   : > { %3576 = vst [vmem:[#allocation2 + $0x18] sm:$0xff] %v10939_v2 }
 0x19a   : > { %3577 = vst [vmem:[#allocation2 + $0x50] sm:$0xff] %v10939_v2 }
 0x19b   : > { %3578 = vst [vmem:[#allocation2 + $0x68] sm:$0xff] %v10939_v2 }
 0x19c   : > { %3579 = vst [vmem:[#allocation2 + $0x8] sm:$0xff] %v10939_v2 }
 0x19d   : > { %3580 = vst [vmem:[#allocation2 + $0x48] sm:$0xff] %v10939_v2 }
 0x19e   : > { %3581 = vst [vmem:[#allocation2 + $0x40] sm:$0xff] %v10939_v2 }
 0x19f   : > { %3582 = vst [vmem:[#allocation2 + $0x20] sm:$0xff] %v10939_v2 }
 0x1a0   : > { %3583 = vst [vmem:[#allocation2 + $0x10] sm:$0xff] %v10939_v2 }
 0x1a1   : > { %3584 = vst [vmem:[#allocation2 + $0x38] sm:$0xff] %v10939_v2 }
 0x1a2   : > { %3585 = vst [vmem:[#allocation2 + $0x60] sm:$0xff] %v10939_v2 }
 0x1a3   : > { %3586 = vst [vmem:[#allocation2 + $0x70] sm:$0xff] %v10939_v2 }
 0x1a4   : > { %3587 = vst [vmem:[#allocation2 + $0x78] sm:$0xff] %v10939_v2 }
 0x1a5   : > { %3588 = vst [vmem:[#allocation2 + $0x28] sm:$0xff] %v10939_v2 }
 0x1a6 PF: > { %s13586_s0 = sld [smem:[#allocation17_spill]] }
 0x1ac   : > { %p3589_p9 = scmp.ge.s32.totalorder %s13586_s0, 0  ;;  %p3590_p8 = scmp.lt.s32.totalorder %s13586_s0, 2 }
 0x1ae   : > { %p3591_p10 = pnand %p3590_p8, %p3589_p9 }
 0x1b0   : > { %3594 = sbr.rel (%p3591_p10) target bundleno = 1181 (0x49d), region = 212 }
 0x1b5   : > { %v10042_v3 = vld [vmem:[%s11740_s17 + $0xb8] sm:$0xff]  ;;  %v10041_v5 = vld [vmem:[%s11740_s17 + $0xb0] sm:$0xff]  ;;  %v10040_v7 = vld [vmem:[%s11740_s17 + $0xa8] sm:$0xff]  ;;  %vm3718_vm0 = vsmask.f32 3328  ;;  %vm4486_vm3 = vcmask 1042432  }
 0x1b6   : > { %v10050_v4 = vld [vmem:[%s11740_s17 + $0xf8] sm:$0xff]  ;;  %4106 = vmatpush.bf16.msra.mxu0 %v10042_v3  ;;  %10257 = vmatpush.bf16.msra.mxu2 %v10042_v3  ;;  %v10049_v6 = vld [vmem:[%s11740_s17 + $0xf0] sm:$0xff]  ;;  %v10048_v8 = vld [vmem:[%s11740_s17 + $0xe8] sm:$0xff]  ;;  %vm3719_vm1 = vsmask.f32 7440  ;;  %vm4487_vm4 = vcmask 1046532  }
 0x1b7   : > { %4155 = vmatpush.bf16.msra.mxu1 %v10050_v4  ;;  %10265 = vmatpush.bf16.msra.mxu3 %v10050_v4  ;;  %v11756_v9 = vld [vmem:[%s11736_s4] sm:$0xff]  ;;  %v11759_v10 = vld [vmem:[%s11736_s4 + $0x8] sm:$0xff]  ;;  %v3597_v11 = vld [vmem:[%s11736_s4 + $0x10] sm:$0x11] }
 0x1b8   : > { %3619 = vst [vmem:[#allocation3] sm:$0xff] %v11756_v9  ;;  %v3722_v12 = vshrl.u32 %v11756_v9, 16  ;;  %v3725_v13 = vshll.u32 %v11756_v9, 16  ;;  %v3731_v14 = vshll.u32 %v11759_v10, 16  ;;  %v3735_v15 = vshrl.u32 %v11759_v10, 16  ;;  %v11769_v16 = vld [vmem:[%s11736_s4 + $0x60] sm:$0xff]  ;;  %vm11798_vm2 = vmor %vm3718_vm0, %vm3719_vm1 }
 0x1b9   : > { %3620 = vst [vmem:[#allocation3 + $0x8] sm:$0xff] %v11759_v10  ;;  %v11772_v17 = vld [vmem:[%s11736_s4 + $0x68] sm:$0xff]  ;;  %v3609_v18 = vld [vmem:[%s11736_s4 + $0x70] sm:$0x11]  ;;  %v3818_v21 = vshrl.u32 %v11769_v16, 16  ;;  %v3821_v22 = vshll.u32 %v11769_v16, 16  ;;  %vm11998_vm5 = vmor %vm4486_vm3, %vm4487_vm4 }
 0x1ba   : > { %4107 = vmatpush.bf16.msra.mxu0 %v10041_v5  ;;  %10258 = vmatpush.bf16.msra.mxu2 %v10041_v5  ;;  %3621 = vst [vmem:[#allocation3 + $0x10] sm:$0x11] %v3597_v11  ;;  %v3724_v19 = vrot.slane %v3722_v12, 4  ;;  %v3727_v20 = vrot.slane %v3725_v13, 5  ;;  %v3827_v23 = vshll.u32 %v11772_v17, 16  ;;  %v3831_v24 = vshrl.u32 %v11772_v17, 16 }
 0x1bb   : > { %4156 = vmatpush.bf16.msra.mxu1 %v10049_v6  ;;  %10266 = vmatpush.bf16.msra.mxu3 %v10049_v6  ;;  %3631 = vst [vmem:[#allocation3 + $0x60] sm:$0xff] %v11769_v16  ;;  %v10039_v25 = vld [vmem:[%s11740_s17 + $0xa0] sm:$0xff]  ;;  %v3733_v26 = vrot.slane %v3731_v14, 5  ;;  %v3737_v27 = vrot.slane %v3735_v15, 4  ;;  %v3820_v28 = vrot.slane %v3818_v21, 4  ;;  %v3823_v31 = vrot.slane %v3821_v22, 5 }
 0x1bc   : > { %3632 = vst [vmem:[#allocation3 + $0x68] sm:$0xff] %v11772_v17  ;;  %v10047_v29 = vld [vmem:[%s11740_s17 + $0xe0] sm:$0xff]  ;;  %v3728_v30 = vor.u32 %v3727_v20, %v3724_v19  ;;  %v3829_v32 = vrot.slane %v3827_v23, 5  ;;  %v3833_v33 = vrot.slane %v3831_v24, 4  ;;  %v11784_v34 = vld [vmem:[%s11736_s4 + $0x18] sm:$0xff]  ;;  %v10037_v48 = vld [vmem:[%s11740_s17 + $0x90] sm:$0xff] }
 0x1bd   : > { %3633 = vst [vmem:[#allocation3 + $0x70] sm:$0x11] %v3609_v18  ;;  %v3824_v35 = vor.u32 %v3823_v31, %v3820_v28  ;;  %v11787_v36 = vld [vmem:[%s11736_s4 + $0x20] sm:$0xff]  ;;  %v3600_v37 = vld [vmem:[%s11736_s4 + $0x28] sm:$0x11]  ;;  %v10038_v38 = vld [vmem:[%s11740_s17 + $0x98] sm:$0xff]  ;;  %v3738_v39 = vor.u32 %v3737_v27, %v3733_v26 }
 0x1be   : > { %4108 = vmatpush.bf16.msra.mxu0 %v10040_v7  ;;  %10259 = vmatpush.bf16.msra.mxu2 %v10040_v7  ;;  %3622 = vst [vmem:[#allocation3 + $0x18] sm:$0xff] %v11784_v34  ;;  %v10046_v40 = vld [vmem:[%s11740_s17 + $0xd8] sm:$0xff]  ;;  %v3729_v42 = vrot.slane %v3728_v30, 4  ;;  %v3834_v43 = vor.u32 %v3833_v33, %v3829_v32  ;;  %v3612_v47 = vld [vmem:[%s11736_s4 + $0x88] sm:$0x11]  ;;  %v11809_v50 = vld [vmem:[%s11736_s4 + $0x80] sm:$0xff] }
 0x1bf   : > { %4157 = vmatpush.bf16.msra.mxu1 %v10048_v8  ;;  %10267 = vmatpush.bf16.msra.mxu3 %v10048_v8  ;;  %3623 = vst [vmem:[#allocation3 + $0x20] sm:$0xff] %v11787_v36  ;;  %v11804_v46 = vld [vmem:[%s11736_s4 + $0x78] sm:$0xff]  ;;  %v3825_v49 = vrot.slane %v3824_v35, 4  ;;  %v3739_v51 = vrot.slane %v3738_v39, 4  ;;  %v3746_v54 = vshrl.u32 %v11784_v34, 16  ;;  %v10045_v55 = vld [vmem:[%s11740_s17 + $0xd0] sm:$0xff] }
 0x1c0   : > { %3624 = vst [vmem:[#allocation3 + $0x28] sm:$0x11] %v3600_v37  ;;  %v11819_v56 = vsel %vm11798_vm2, %v3729_v42, %v3733_v26  ;;  %v3835_v57 = vrot.slane %v3834_v43, 4  ;;  %v3749_v59 = vshll.u32 %v11784_v34, 16  ;;  %v3755_v60 = vshll.u32 %v11787_v36, 16  ;;  %v11830_v2 = vld [vmem:[%s11736_s4 + $0x30] sm:$0xff] }
 0x1c1   : > { %v11794_v41 = vld [vmem:[#allocation3 + $0x10] sm:$0x11]  ;;  %3634 = vst [vmem:[#allocation3 + $0x78] sm:$0xff] %v11804_v46  ;;  %v3759_v61 = vshrl.u32 %v11787_v36, 16  ;;  %v3830_v62 = vsel %vm11798_vm2, %v3825_v49, %v3829_v32  ;;  %v3842_v0 = vshrl.u32 %v11804_v46, 16  ;;  %v3845_v1 = vshll.u32 %v11804_v46, 16 }
 0x1c2   : > { %4109 = vmatpush.bf16.msra.mxu0 %v10039_v25  ;;  %10260 = vmatpush.bf16.msra.mxu2 %v10039_v25  ;;  %v3741_v45 = vshll.u32 %v11794_v41, 16  ;;  %3635 = vst [vmem:[#allocation3 + $0x80] sm:$0xff] %v11809_v50  ;;  %v10036_v3 = vld [vmem:[%s11740_s17 + $0x88] sm:$0xff]  ;;  %v3946_v5 = vunpack.c.l.b16 %v11819_v56  ;;  %v3851_v6 = vshll.u32 %v11809_v50, 16  ;;  %v3855_v7 = vshrl.u32 %v11809_v50, 16  ;;  %v11845_v18 = vld [vmem:[%s11736_s4 + $0x38] sm:$0xff] }
 0x1c3   : > { %4158 = vmatpush.bf16.msra.mxu1 %v10047_v29  ;;  %10268 = vmatpush.bf16.msra.mxu3 %v10047_v29  ;;  %3636 = vst [vmem:[#allocation3 + $0x88] sm:$0x11] %v3612_v47  ;;  %v3603_v8 = vld [vmem:[%s11736_s4 + $0x40] sm:$0x11]  ;;  %v10044_v11 = vld [vmem:[%s11740_s17 + $0xc8] sm:$0xff]  ;;  %v3947_v13 = vunpack.c.h.b16 %v11819_v56  ;;  %v3748_v14 = vrot.slane %v3746_v54, 4  ;;  %v3962_v19 = vunpack.c.l.b16 %v3830_v62  ;;  %v3963_v20 = vunpack.c.h.b16 %v3830_v62 }
 0x1c4   : > { %v3743_v52 = vrot.slane %v3741_v45, 5  ;;  %v11812_v53 = vld [vmem:[#allocation3 + $0x70] sm:$0x11]  ;;  %3625 = vst [vmem:[#allocation3 + $0x30] sm:$0xff] %v11830_v2  ;;  %v3751_v15 = vrot.slane %v3749_v59, 5  ;;  %v11847_v21 = vrot.slane %v3755_v60, 5 }
 0x1c5   : > { %v3837_v58 = vshll.u32 %v11812_v53, 16  ;;  %v3761_v22 = vrot.slane %v3759_v61, 4  ;;  %3626 = vst [vmem:[#allocation3 + $0x38] sm:$0xff] %v11845_v18  ;;  %v3844_v26 = vrot.slane %v3842_v0, 4  ;;  %v3847_v27 = vrot.slane %v3845_v1, 5  ;;  %v10035_v28 = vld [vmem:[%s11740_s17 + $0x80] sm:$0xff] }
 0x1c6   : > { %4110 = vmatpush.bf16.msra.mxu0 %v10038_v38  ;;  %10261 = vmatpush.bf16.msra.mxu2 %v10038_v38  ;;  %v3744_v4 = vsel %vm11798_vm2, %v3739_v51, %v3743_v52  ;;  %3627 = vst [vmem:[#allocation3 + $0x40] sm:$0x11] %v3603_v8  ;;  %v11853_v31 = vrot.slane %v3851_v6, 5  ;;  %v3857_v32 = vrot.slane %v3855_v7, 4  ;;  %v11856_v33 = vld [vmem:[%s11736_s4 + $0x90] sm:$0xff]  ;;  %v10043_v37 = vld [vmem:[%s11740_s17 + $0xc0] sm:$0xff]  ;;  %v3752_v43 = vor.u32 %v3751_v15, %v3748_v14 }
 0x1c7   : > { %4159 = vmatpush.bf16.msra.mxu1 %v10046_v40  ;;  %10269 = vmatpush.bf16.msra.mxu3 %v10046_v40  ;;  %v3839_v63 = vrot.slane %v3837_v58, 5  ;;  %v3948_v23 = vunpack.c.l.b16 %v3744_v4  ;;  %v11850_v25 = vld [vmem:[#allocation3 + $0x28] sm:$0x11]  ;;  %v3949_v29 = vunpack.c.h.b16 %v3744_v4  ;;  %v3615_v35 = vld [vmem:[%s11736_s4 + $0xa0] sm:$0x11]  ;;  %3637 = vst [vmem:[#allocation3 + $0x90] sm:$0xff] %v11856_v33  ;;  %v3762_v45 = vor.u32 %v3761_v22, %v11847_v21 }
 0x1c8   : > { %v11863_v39 = vld [vmem:[%s11736_s4 + $0x98] sm:$0xff]  ;;  %v3765_v49 = vshll.u32 %v11850_v25, 16  ;;  %v3848_v51 = vor.u32 %v3847_v27, %v3844_v26  ;;  %3639 = vst [vmem:[#allocation3 + $0xa0] sm:$0x11] %v3615_v35  ;;  %v10025_v59 = vld [vmem:[%s11740_s17 + $0x30] sm:$0xff]  ;;  %v3753_v61 = vrot.slane %v3752_v43, 4 }
 0x1c9   : > { %v3840_v12 = vsel %vm11798_vm2, %v3835_v57, %v3839_v63  ;;  %v10026_v40 = vld [vmem:[%s11740_s17 + $0x38] sm:$0xff]  ;;  %3638 = vst [vmem:[#allocation3 + $0x98] sm:$0xff] %v11863_v39  ;;  %v3978_v47 = vpack.c.b16 %v3948_v23, %v3946_v5  ;;  %v3979_v52 = vpack.c.b16 %v3949_v29, %v3947_v13  ;;  %v10033_v60 = vld [vmem:[%s11740_s17 + $0x70] sm:$0xff]  ;;  %v3763_v62 = vrot.slane %v3762_v45, 4  ;;  %v10024_v15 = vld [vmem:[%s11740_s17 + $0x28] sm:$0xff] }
 0x1ca   : > { %4111 = vmatpush.bf16.msra.mxu0 %v10037_v48  ;;  %10262 = vmatpush.bf16.msra.mxu2 %v10037_v48  ;;  %v3964_v24 = vunpack.c.l.b16 %v3840_v12  ;;  %v3965_v30 = vunpack.c.h.b16 %v3840_v12  ;;  %v11860_v38 = vld [vmem:[#allocation3 + $0x88] sm:$0x11]  ;;  %v3767_v0 = vrot.slane %v3765_v49, 5  ;;  %v3849_v1 = vrot.slane %v3848_v51, 4  ;;  %v10065_v12 = vld [vmem:[%s11740_s17 + $0x170] sm:$0xff]  ;;  %v10056_v27 = vld [vmem:[%s11740_s17 + $0x128] sm:$0xff] }
 0x1cb   : > { %4160 = vmatpush.bf16.msra.mxu1 %v10045_v55  ;;  %10270 = vmatpush.bf16.msra.mxu3 %v10045_v55  ;;  %v10034_v42 = vld [vmem:[%s11740_s17 + $0x78] sm:$0xff]  ;;  %v3858_v55 = vor.u32 %v3857_v32, %v11853_v31  ;;  %v3861_v56 = vshll.u32 %v11860_v38, 16  ;;  %v3773_v4 = vshll.u32 %v11830_v2, 16  ;;  %v3779_v7 = vshll.u32 %v11845_v18, 16  ;;  %v11906_v29 = vld [vmem:[%s11736_s4 + $0x48] sm:$0xff]  ;;  %v10023_v32 = vld [vmem:[%s11740_s17 + $0x20] sm:$0xff] }
 0x1cc   : > { %v11870_v48 = vpack.c.b16 %v3964_v24, %v3962_v19  ;;  %v11873_v54 = vpack.c.b16 %v3965_v30, %v3963_v20  ;;  %v10058_v57 = vld [vmem:[%s11740_s17 + $0x138] sm:$0xff]  ;;  %v3783_v8 = vshrl.u32 %v11845_v18, 16  ;;  %v3866_v13 = vshrl.u32 %v11856_v33, 16  ;;  %v10032_v19 = vld [vmem:[%s11740_s17 + $0x68] sm:$0xff]  ;;  %v10031_v35 = vld [vmem:[%s11740_s17 + $0x60] sm:$0xff]  ;;  %3628 = vst [vmem:[#allocation3 + $0x48] sm:$0xff] %v11906_v29 }
 0x1cd   : > { %v10066_v58 = vld [vmem:[%s11740_s17 + $0x178] sm:$0xff]  ;;  %v3859_v5 = vrot.slane %v3858_v55, 4  ;;  %v3863_v6 = vrot.slane %v3861_v56, 5  ;;  %v3869_v14 = vshll.u32 %v11856_v33, 16  ;;  %v3875_v20 = vshll.u32 %v11863_v39, 16  ;;  %v11916_v43 = vld [vmem:[%s11736_s4 + $0x50] sm:$0xff] }
 0x1ce   : > { %4112 = vmatpush.bf16.msra.mxu0 %v10036_v3  ;;  %10263 = vmatpush.bf16.msra.mxu2 %v10036_v3  ;;  %13589 = vst [vmem:[#allocation31_spill] sm:$0xff] %v11870_v48  ;;  %v3606_v63 = vld [vmem:[%s11736_s4 + $0x58] sm:$0x11]  ;;  %v3770_v3 = vshrl.u32 %v11830_v2, 16  ;;  %v3879_v22 = vshrl.u32 %v11863_v39, 16  ;;  %v3758_v23 = vsel %vm11798_vm2, %v3753_v61, %v11847_v21  ;;  %v3768_v24 = vsel %vm11798_vm2, %v3763_v62, %v3767_v0 }
 0x1cf   : > { %4161 = vmatpush.bf16.msra.mxu1 %v10044_v11  ;;  %10271 = vmatpush.bf16.msra.mxu3 %v10044_v11  ;;  %13590 = vst [vmem:[#allocation32_spill] sm:$0xff] %v11873_v54  ;;  %v10057_v11 = vld [vmem:[%s11740_s17 + $0x130] sm:$0xff]  ;;  %v3854_v26 = vsel %vm11798_vm2, %v3849_v1, %v11853_v31  ;;  %v3864_v30 = vsel %vm11798_vm2, %v3859_v5, %v3863_v6  ;;  %v3775_v21 = vrot.slane %v3773_v4, 5  ;;  %v3868_v31 = vrot.slane %v3866_v13, 4  ;;  %v3618_v49 = vld [vmem:[%s11736_s4 + $0xb8] sm:$0x11] }
 0x1d0   : > { %3630 = vst [vmem:[#allocation3 + $0x58] sm:$0x11] %v3606_v63  ;;  %v3871_v45 = vrot.slane %v3869_v14, 5  ;;  %v3950_v51 = vunpack.c.l.b16 %v3758_v23  ;;  %v3877_v55 = vrot.slane %v3875_v20, 5  ;;  %v3881_v56 = vrot.slane %v3879_v22, 4  ;;  %v10022_v13 = vld [vmem:[%s11740_s17 + $0x18] sm:$0xff] }
 0x1d1   : > { %3629 = vst [vmem:[#allocation3 + $0x50] sm:$0xff] %v11916_v43  ;;  %v3951_v61 = vunpack.c.h.b16 %v3758_v23  ;;  %v11930_v62 = vld [vmem:[#allocation3 + $0xa0] sm:$0x11]  ;;  %v3953_v63 = vunpack.c.h.b16 %v3768_v24  ;;  %v3967_v0 = vunpack.c.h.b16 %v3854_v26  ;;  %v3969_v1 = vunpack.c.h.b16 %v3864_v30  ;;  %v10030_v14 = vld [vmem:[%s11740_s17 + $0x58] sm:$0xff] }
 0x1d2   : > { %4113 = vmatpush.bf16.msra.mxu0 %v10035_v28  ;;  %10264 = vmatpush.bf16.msra.mxu2 %v10035_v28  ;;  %v3772_v28 = vrot.slane %v3770_v3, 4  ;;  %3642 = vst [vmem:[#allocation3 + $0xb8] sm:$0x11] %v3618_v49  ;;  %v3872_v6 = vor.u32 %v3871_v45, %v3868_v31  ;;  %v3794_v49 = vshrl.u32 %v11906_v29, 16 }
 0x1d3   : > { %4162 = vmatpush.bf16.msra.mxu1 %v10043_v37  ;;  %10272 = vmatpush.bf16.msra.mxu3 %v10043_v37  ;;  %v10064_v37 = vld [vmem:[%s11740_s17 + $0x168] sm:$0xff]  ;;  %v11944_v20 = vpack.c.b16 %v3953_v63, %v3951_v61  ;;  %v11946_v22 = vpack.c.b16 %v3969_v1, %v3967_v0 }
 0x1d4   : > { %v3776_v3 = vor.u32 %v3775_v21, %v3772_v28  ;;  %v10054_v28 = vld [vmem:[%s11740_s17 + $0x118] sm:$0xff]  ;;  %v10029_v21 = vld [vmem:[%s11740_s17 + $0x50] sm:$0xff]  ;;  %v10028_v63 = vld [vmem:[%s11740_s17 + $0x48] sm:$0xff] }
 0x1d5   : > { %4114 = vmatmul.bf16.vlgmr.msra.gmra.mxu0 %v3978_v47  ;;  %4134 = vmatmul.bf16.vlgmr.msra.gmra.mxu2 %v11870_v48  ;;  %v11921_v47 = vld [vmem:[%s11736_s4 + $0xa8] sm:$0xff]  ;;  %13592 = vst [vmem:[#allocation34_spill] sm:$0xff] %v11946_v22 }
 0x1d6   : > { %4380 = vmatpush.bf16.msrb.mxu2 %v10026_v40  ;;  %4163 = vmatmul.bf16.vlgmr.msra.gmra.mxu1 %v3979_v52  ;;  %v11913_v40 = vrot.slane %v3779_v7, 5  ;;  %v11924_v52 = vld [vmem:[#allocation3 + $0x40] sm:$0x11]  ;;  %3640 = vst [vmem:[#allocation3 + $0xa8] sm:$0xff] %v11921_v47  ;;  %v10055_v7 = vld [vmem:[%s11740_s17 + $0x120] sm:$0xff]  ;;  %v3777_v23 = vrot.slane %v3776_v3, 4 }
 0x1d7   : > { %4429 = vmatpush.bf16.msrb.mxu3 %v10034_v42  ;;  %4738 = vmatpush.bf16.msrb.mxu0 %v10058_v57  ;;  %v3785_v42 = vrot.slane %v3783_v8, 4  ;;  %v11927_v57 = vld [vmem:[%s11736_s4 + $0xb0] sm:$0xff]  ;;  %v3789_v5 = vshll.u32 %v11924_v52, 16  ;;  %v10063_v8 = vld [vmem:[%s11740_s17 + $0x160] sm:$0xff]  ;;  %v3890_v61 = vshrl.u32 %v11921_v47, 16  ;;  %v3893_v1 = vshll.u32 %v11921_v47, 16 }
 0x1d8   : > { %4183 = vmatmul.bf16.vlgmr.msra.gmra.mxu3 %v11873_v54  ;;  %4787 = vmatpush.bf16.msrb.mxu1 %v10066_v58  ;;  %v3952_v58 = vunpack.c.l.b16 %v3768_v24  ;;  %3641 = vst [vmem:[#allocation3 + $0xb0] sm:$0xff] %v11927_v57  ;;  %v3899_v3 = vshll.u32 %v11927_v57, 16 }
 0x1d9   : > { %v3786_v4 = vor.u32 %v3785_v42, %v11913_v40  ;;  %v3782_v42 = vsel %vm11798_vm2, %v3777_v23, %v11913_v40  ;;  %v3803_v40 = vshll.u32 %v11916_v43, 16 }
 0x1da   : > { %4381 = vmatpush.bf16.msrb.mxu2 %v10025_v59  ;;  %v3966_v59 = vunpack.c.l.b16 %v3854_v26  ;;  %v3791_v26 = vrot.slane %v3789_v5, 5  ;;  %v3954_v0 = vunpack.c.l.b16 %v3782_v42 }
 0x1db   : > { %4430 = vmatpush.bf16.msrb.mxu3 %v10033_v60  ;;  %4739 = vmatpush.bf16.msrb.mxu0 %v10057_v11  ;;  %v3968_v60 = vunpack.c.l.b16 %v3864_v30  ;;  %v3882_v11 = vor.u32 %v3881_v56, %v3877_v55  ;;  %v3787_v24 = vrot.slane %v3786_v4, 4  ;;  %v10062_v30 = vld [vmem:[%s11740_s17 + $0x158] sm:$0xff]  ;;  %v10053_v56 = vld [vmem:[%s11740_s17 + $0x110] sm:$0xff]  ;;  %v3903_v4 = vshrl.u32 %v11927_v57, 16 }
 0x1dc   : > { %4788 = vmatpush.bf16.msrb.mxu1 %v10065_v12  ;;  %v3885_v12 = vshll.u32 %v11930_v62, 16 }
 0x1dd   : > { %v3792_v31 = vsel %vm11798_vm2, %v3787_v24, %v3791_v26  ;;  %v10052_v24 = vld [vmem:[%s11740_s17 + $0x108] sm:$0xff] }
 0x1de   : > { %4382 = vmatpush.bf16.msrb.mxu2 %v10024_v15  ;;  %v11940_v15 = vpack.c.b16 %v3952_v58, %v3950_v51  ;;  %v3797_v51 = vshll.u32 %v11906_v29, 16  ;;  %v10061_v58 = vld [vmem:[%s11740_s17 + $0x150] sm:$0xff]  ;;  %v3956_v5 = vunpack.c.l.b16 %v3792_v31  ;;  %v10060_v26 = vld [vmem:[%s11740_s17 + $0x148] sm:$0xff] }
 0x1df   : > { %4431 = vmatpush.bf16.msrb.mxu3 %v10032_v19  ;;  %4740 = vmatpush.bf16.msrb.mxu0 %v10056_v27  ;;  %v11942_v19 = vpack.c.b16 %v3968_v60, %v3966_v59  ;;  %v3873_v27 = vrot.slane %v3872_v6, 4  ;;  %v3807_v60 = vshrl.u32 %v11916_v43, 16 }
 0x1e0   : > { %4789 = vmatpush.bf16.msrb.mxu1 %v10064_v37  ;;  %v10021_v37 = vld [vmem:[%s11740_s17 + $0x10] sm:$0xff]  ;;  %v3799_v23 = vrot.slane %v3797_v51, 5 }
 0x1e1   : > { %13591 = vst [vmem:[#allocation33_spill] sm:$0xff] %v11942_v19  ;;  %v3878_v45 = vsel %vm11798_vm2, %v3873_v27, %v3877_v55  ;;  %v10020_v55 = vld [vmem:[%s11740_s17 + $0x8] sm:$0xff] }
 0x1e2   : > { %4383 = vmatpush.bf16.msrb.mxu2 %v10023_v32  ;;  %v3883_v32 = vrot.slane %v3882_v11, 4  ;;  %v3970_v6 = vunpack.c.l.b16 %v3878_v45 }
 0x1e3   : > { %4432 = vmatpush.bf16.msrb.mxu3 %v10031_v35  ;;  %4741 = vmatpush.bf16.msrb.mxu0 %v10055_v7  ;;  %v3887_v35 = vrot.slane %v3885_v12, 5  ;;  %v3955_v7 = vunpack.c.h.b16 %v3782_v42  ;;  %v3971_v12 = vunpack.c.h.b16 %v3878_v45  ;;  %v3901_v42 = vrot.slane %v3899_v3, 5 }
 0x1e4   : > { %4790 = vmatpush.bf16.msrb.mxu1 %v10063_v8  ;;  %v3957_v8 = vunpack.c.h.b16 %v3792_v31  ;;  %v3905_v31 = vrot.slane %v3903_v4, 4  ;;  %v4491_v45 = vrot.slane %v11759_v10, 5 }
 0x1e5   : > { %4119 = vmatmul.bf16.gmra.mxu0 %v11940_v15  ;;  %4139 = vmatmul.bf16.gmra.mxu2 %v11942_v19  ;;  %v3888_v59 = vsel %vm11798_vm2, %v3883_v32, %v3887_v35  ;;  %v3892_v32 = vrot.slane %v3890_v61, 4  ;;  %v10019_v35 = vld [vmem:[%s11740_s17] sm:$0xff] }
 0x1e6   : > { %4384 = vmatpush.bf16.msrb.mxu2 %v10022_v13  ;;  %4168 = vmatmul.bf16.gmra.mxu1 %v11944_v20  ;;  %v3972_v11 = vunpack.c.l.b16 %v3888_v59  ;;  %v11977_v13 = vld [vmem:[#allocation3 + $0x58] sm:$0x11]  ;;  %v3973_v27 = vunpack.c.h.b16 %v3888_v59  ;;  %v11986_v51 = vpack.c.b16 %v3957_v8, %v3955_v7  ;;  %v10051_v59 = vld [vmem:[%s11740_s17 + $0x100] sm:$0xff]  ;;  %v4493_v61 = vrot.slane %v4491_v45, 4 }
 0x1e7   : > { %4433 = vmatpush.bf16.msrb.mxu3 %v10030_v14  ;;  %4742 = vmatpush.bf16.msrb.mxu0 %v10054_v28  ;;  %v3796_v14 = vrot.slane %v3794_v49, 4  ;;  %v3805_v28 = vrot.slane %v3803_v40, 5  ;;  %v11984_v49 = vpack.c.b16 %v3956_v5, %v3954_v0  ;;  %v10059_v40 = vld [vmem:[%s11740_s17 + $0x140] sm:$0xff]  ;;  %v13595_v0 = vmov 0 }
 0x1e8   : > { %4188 = vmatmul.bf16.gmra.mxu3 %v11946_v22  ;;  %4791 = vmatpush.bf16.msrb.mxu1 %v10062_v30  ;;  %v3809_v30 = vrot.slane %v3807_v60, 4  ;;  %v8938_v60 = vrot.slane %v11756_v9, 9  ;;  %v11996_v10 = vpack.c.b16 %v3973_v27, %v3971_v12  ;;  %v13596_v0 = vsel %vm11998_vm5, 4294967295, %v13595_v0 }
 0x1e9   : > { %13597 = vst [vmem:[#allocation37_spill] sm:$0xff] %v13596_v0  ;;  %v3906_v5 = vor.u32 %v3905_v31, %v3901_v42  ;;  %v10090_v31 = vld [vmem:[%s11740_s17 + $0x238] sm:$0xff] }
 0x1ea   : > { %4385 = vmatpush.bf16.msrb.mxu2 %v10021_v37  ;;  %v10027_v37 = vld [vmem:[%s11740_s17 + $0x40] sm:$0xff]  ;;  %13594 = vst [vmem:[#allocation36_spill] sm:$0xff] %v11996_v10  ;;  %v3810_v3 = vor.u32 %v3809_v30, %v3805_v28  ;;  %v4492_v9 = vsel %vm11998_vm5, %v8938_v60, %v4491_v45  ;;  %v10098_v45 = vld [vmem:[%s11740_s17 + $0x278] sm:$0xff] }
 0x1eb   : > { %4434 = vmatpush.bf16.msrb.mxu3 %v10029_v21  ;;  %4743 = vmatpush.bf16.msrb.mxu0 %v10053_v56  ;;  %v3895_v21 = vrot.slane %v3893_v1, 5  ;;  %v3813_v56 = vshll.u32 %v11977_v13, 16  ;;  %v4494_v1 = vrot.slane %v11794_v41, 5  ;;  %v4578_v8 = vunpack.c.l.b16 %v4492_v9 }
 0x1ec   : > { %4792 = vmatpush.bf16.msrb.mxu1 %v10061_v58  ;;  %v11989_v58 = vld [vmem:[#allocation3 + $0xb8] sm:$0x11] }
 0x1ed   : > { %v3896_v4 = vor.u32 %v3895_v21, %v3892_v32  ;;  %v4495_v7 = vsel %vm11998_vm5, %v4493_v61, %v4494_v1  ;;  %v3907_v32 = vrot.slane %v3906_v5, 4  ;;  %v10082_v21 = vld [vmem:[%s11740_s17 + $0x1f8] sm:$0xff] }
 0x1ee   : > { %4386 = vmatpush.bf16.msrb.mxu2 %v10020_v55  ;;  %v11994_v55 = vpack.c.b16 %v3972_v11, %v3970_v6  ;;  %v3909_v6 = vshll.u32 %v11989_v58, 16  ;;  %v4579_v11 = vunpack.c.h.b16 %v4492_v9  ;;  %v4580_v12 = vunpack.c.l.b16 %v4495_v7 }
 0x1ef   : > { %4435 = vmatpush.bf16.msrb.mxu3 %v10028_v63  ;;  %4744 = vmatpush.bf16.msrb.mxu0 %v10052_v24  ;;  %v3800_v63 = vor.u32 %v3799_v23, %v3796_v14  ;;  %v4581_v41 = vunpack.c.h.b16 %v4495_v7  ;;  %v3815_v23 = vrot.slane %v3813_v56, 5  ;;  %v3811_v24 = vrot.slane %v3810_v3, 4 }
 0x1f0   : > { %4793 = vmatpush.bf16.msrb.mxu1 %v10060_v26  ;;  %13593 = vst [vmem:[#allocation35_spill] sm:$0xff] %v11994_v55  ;;  %v3897_v26 = vrot.slane %v3896_v4, 4  ;;  %v4610_v27 = vpack.c.b16 %v4580_v12, %v4578_v8  ;;  %v8939_v7 = vrot.slane %v11784_v34, 9 }
 0x1f1   : > { %v3801_v14 = vrot.slane %v3800_v63, 4  ;;  %v4611_v30 = vpack.c.b16 %v4581_v41, %v4579_v11 }
 0x1f2   : > { %4387 = vmatpush.bf16.msrb.mxu2 %v10019_v35  ;;  %v3911_v35 = vrot.slane %v3909_v6, 5  ;;  %v4498_v6 = vrot.slane %v11787_v36, 5 }
 0x1f3   : > { %4436 = vmatpush.bf16.msrb.mxu3 %v10027_v37  ;;  %4745 = vmatpush.bf16.msrb.mxu0 %v10051_v59  ;;  %v10074_v37 = vld [vmem:[%s11740_s17 + $0x1b8] sm:$0xff]  ;;  %v3806_v56 = vsel %vm11798_vm2, %v3801_v14, %v3805_v28  ;;  %v3816_v59 = vsel %vm11798_vm2, %v3811_v24, %v3815_v23 }
 0x1f4   : > { %4794 = vmatpush.bf16.msrb.mxu1 %v10059_v40  ;;  %v3902_v40 = vsel %vm11798_vm2, %v3897_v26, %v3901_v42  ;;  %v3912_v60 = vsel %vm11798_vm2, %v3907_v32, %v3911_v35  ;;  %v3958_v61 = vunpack.c.l.b16 %v3806_v56  ;;  %v3960_v63 = vunpack.c.l.b16 %v3816_v59 }
 0x1f5   : > { %4124 = vmatmul.bf16.gmra.mxu0 %v11984_v49  ;;  %4144 = vmatmul.bf16.gmra.mxu2 %v11994_v55  ;;  %v3974_v1 = vunpack.c.l.b16 %v3902_v40  ;;  %v3959_v3 = vunpack.c.h.b16 %v3806_v56  ;;  %v3961_v4 = vunpack.c.h.b16 %v3816_v59  ;;  %v3976_v5 = vunpack.c.l.b16 %v3912_v60  ;;  %v8812_v56 = vld [vmem:[#allocation3] sm:$0xf]  ;;  %v10000_v59 = vld [vmem:[#allocation3 + $0x4] sm:$0xf0] }
 0x1f6   : > { %4173 = vmatmul.bf16.gmra.mxu1 %v11986_v51  ;;  %4991 = vmatpush.bf16.msra.mxu2 %v10074_v37  ;;  %v3975_v28 = vunpack.c.h.b16 %v3902_v40  ;;  %v3977_v9 = vunpack.c.h.b16 %v3912_v60  ;;  %v4500_v8 = vrot.slane %v4498_v6, 4  ;;  %v4501_v42 = vrot.slane %v11850_v25, 5  ;;  %v10073_v37 = vld [vmem:[%s11740_s17 + $0x1b0] sm:$0xff]  ;;  %v8814_v60 = vld [vmem:[#allocation3 + $0x8] sm:$0xf0] }
 0x1f7   : > { %5040 = vmatpush.bf16.msra.mxu3 %v10082_v21  ;;  %5266 = vmatpush.bf16.msra.mxu0 %v10090_v31  ;;  %v12027_v11 = vpack.c.b16 %v3960_v63, %v3958_v61  ;;  %v12029_v12 = vpack.c.b16 %v3961_v4, %v3959_v3  ;;  %v12031_v41 = vpack.c.b16 %v3976_v5, %v3974_v1  ;;  %v10081_v21 = vld [vmem:[%s11740_s17 + $0x1f0] sm:$0xff]  ;;  %v10072_v1 = vld [vmem:[%s11740_s17 + $0x1a8] sm:$0xff] }
 0x1f8   : > { %4193 = vmatmul.bf16.gmra.mxu3 %v11996_v10  ;;  %5315 = vmatpush.bf16.msra.mxu1 %v10098_v45  ;;  %v12033_v14 = vpack.c.b16 %v3977_v9, %v3975_v28  ;;  %v4499_v36 = vsel %vm11998_vm5, %v8939_v7, %v4498_v6  ;;  %v4502_v34 = vsel %vm11998_vm5, %v4500_v8, %v4501_v42  ;;  %v10089_v31 = vld [vmem:[%s11740_s17 + $0x230] sm:$0xff]  ;;  %v10080_v3 = vld [vmem:[%s11740_s17 + $0x1e8] sm:$0xff]  ;;  %v8940_v42 = vrot.slane %v11830_v2, 9  ;;  %v8828_v2 = vld [vmem:[#allocation3 + $0x30] sm:$0xf] }
 0x1f9   : > { %13598 = vst [vmem:[#allocation38_spill] sm:$0xff] %v12031_v41  ;;  %v4582_v23 = vunpack.c.l.b16 %v4499_v36  ;;  %v4584_v25 = vunpack.c.l.b16 %v4502_v34  ;;  %v4583_v24 = vunpack.c.h.b16 %v4499_v36  ;;  %v4585_v26 = vunpack.c.h.b16 %v4502_v34  ;;  %v10097_v45 = vld [vmem:[%s11740_s17 + $0x270] sm:$0xff]  ;;  %v10088_v4 = vld [vmem:[%s11740_s17 + $0x228] sm:$0xff] }
 0x1fa   : > { %13599 = vst [vmem:[#allocation39_spill] sm:$0xff] %v12033_v14  ;;  %4992 = vmatpush.bf16.msra.mxu2 %v10073_v37  ;;  %v9999_v40 = vld [vmem:[#allocation3 + $0x4] sm:$0xf]  ;;  %v8813_v61 = vor.u32 %v10000_v59, %v8812_v56  ;;  %v10096_v5 = vld [vmem:[%s11740_s17 + $0x268] sm:$0xff]  ;;  %v10002_v9 = vld [vmem:[#allocation3 + $0x1c] sm:$0xf0] }
 0x1fb   : > { %v12039_v32 = vpack.c.b16 %v4584_v25, %v4582_v23  ;;  %v12041_v35 = vpack.c.b16 %v4585_v26, %v4583_v24  ;;  %5041 = vmatpush.bf16.msra.mxu3 %v10081_v21  ;;  %5267 = vmatpush.bf16.msra.mxu0 %v10089_v31  ;;  %v8817_v63 = vor.u32 %v9999_v40, %v8814_v60  ;;  %v8820_v28 = vld [vmem:[#allocation3 + $0x18] sm:$0xf]  ;;  %v10001_v6 = vld [vmem:[#allocation3 + $0x1c] sm:$0xf]  ;;  %v8822_v7 = vld [vmem:[#allocation3 + $0x20] sm:$0xf0] }
 0x1fc   : > { %5316 = vmatpush.bf16.msra.mxu1 %v10097_v45  ;;  %v12055_v8 = vor.u32 %v10002_v9, %v8820_v28  ;;  %v4508_v34 = vrot.slane %v11924_v52, 5  ;;  %v10071_v23 = vld [vmem:[%s11740_s17 + $0x1a0] sm:$0xff]  ;;  %v10004_v45 = vld [vmem:[#allocation3 + $0x34] sm:$0xf0]  ;;  %v8830_v40 = vld [vmem:[#allocation3 + $0x38] sm:$0xf0] }
 0x1fd   : > { %v10079_v25 = vld [vmem:[%s11740_s17 + $0x1e0] sm:$0xff]  ;;  %v12074_v60 = vor.u32 %v10004_v45, %v8828_v2  ;;  %v4515_v28 = vrot.slane %v11977_v13, 5  ;;  %v10070_v9 = vld [vmem:[%s11740_s17 + $0x198] sm:$0xff]  ;;  %v4519_v2 = vrot.slane %v11772_v17, 5  ;;  %v8942_v45 = vrot.slane %v11769_v16, 9 }
 0x1fe   : > { %4993 = vmatpush.bf16.msra.mxu2 %v10072_v1  ;;  %v10087_v24 = vld [vmem:[%s11740_s17 + $0x220] sm:$0xff]  ;;  %v10005_v13 = vld [vmem:[#allocation3 + $0x4c] sm:$0xf] }
 0x1ff   : > { %5042 = vmatpush.bf16.msra.mxu3 %v10080_v3  ;;  %5268 = vmatpush.bf16.msra.mxu0 %v10088_v4  ;;  %v10095_v26 = vld [vmem:[%s11740_s17 + $0x260] sm:$0xff]  ;;  %v4512_v3 = vrot.slane %v11916_v43, 5  ;;  %v8941_v4 = vrot.slane %v11906_v29, 9  ;;  %v4520_v17 = vsel %vm11998_vm5, %v8942_v45, %v4519_v2  ;;  %v4529_v45 = vrot.slane %v11860_v38, 5  ;;  %v10092_v38 = vld [vmem:[%s11740_s17 + $0x248] sm:$0xff] }
 0x200   : > { %5317 = vmatpush.bf16.msra.mxu1 %v10096_v5  ;;  %v10003_v59 = vld [vmem:[#allocation3 + $0x34] sm:$0xf]  ;;  %v4595_v16 = vunpack.c.h.b16 %v4520_v17 }
 0x201   : > { %v4514_v5 = vrot.slane %v4512_v3, 4  ;;  %v4513_v43 = vsel %vm11998_vm5, %v8941_v4, %v4512_v3  ;;  %v10085_v4 = vld [vmem:[%s11740_s17 + $0x210] sm:$0xff] }
 0x202   : > { %4994 = vmatpush.bf16.msra.mxu2 %v10071_v23  ;;  %v8836_v23 = vld [vmem:[#allocation3 + $0x48] sm:$0xf]  ;;  %v4591_v29 = vunpack.c.h.b16 %v4513_v43 }
 0x203   : > { %5043 = vmatpush.bf16.msra.mxu3 %v10079_v25  ;;  %5269 = vmatpush.bf16.msra.mxu0 %v10087_v24  ;;  %v10006_v25 = vld [vmem:[#allocation3 + $0x4c] sm:$0xf0] }
 0x204   : > { %5318 = vmatpush.bf16.msra.mxu1 %v10095_v26  ;;  %v8838_v26 = vld [vmem:[#allocation3 + $0x50] sm:$0xf0] }
 0x205   : > { %4129 = vmatmul.bf16.gmra.mxu0 %v12027_v11  ;;  %4149 = vmatmul.bf16.gmra.mxu2 %v12031_v41 }
 0x206   : > { %4178 = vmatmul.bf16.gmra.mxu1 %v12029_v12  ;;  %4995 = vmatpush.bf16.msra.mxu2 %v10070_v9 }
 0x208   : > { %4198 = vmatmul.bf16.gmra.mxu3 %v12033_v14 }
 0x215   : > { %4388 = vmatmul.bf16.vlgmr.msrb.gmra.mxu2 %v8813_v61  ;;  %4746 = vmatmul.bf16.vlgmr.msrb.gmra.mxu0 %v4610_v27  ;;  %v12057_v27 = vor.u32 %v10001_v6, %v8822_v7  ;;  %v10078_v6 = vld [vmem:[%s11740_s17 + $0x1d8] sm:$0xff]  ;;  %v4516_v7 = vsel %vm11998_vm5, %v4514_v5, %v4515_v28  ;;  %v10093_v5 = vld [vmem:[%s11740_s17 + $0x250] sm:$0xff]  ;;  %v4594_v28 = vunpack.c.l.b16 %v4520_v17 }
 0x216   : > { %4795 = vmatmul.bf16.vlgmr.msrb.gmra.mxu1 %v4611_v30  ;;  %v4505_v30 = vrot.slane %v11845_v18, 5  ;;  %5044 = vmatpush.bf16.msra.mxu3 %v10078_v6  ;;  %v4593_v24 = vunpack.c.h.b16 %v4516_v7  ;;  %v8844_v6 = vld [vmem:[#allocation3 + $0x60] sm:$0xf] }
 0x218   : > { %4437 = vmatmul.bf16.vlgmr.msrb.gmra.mxu3 %v8817_v63  ;;  %v4507_v36 = vrot.slane %v4505_v30, 4  ;;  %v4506_v18 = vsel %vm11998_vm5, %v8940_v42, %v4505_v30  ;;  %v12078_v63 = vor.u32 %v10003_v59, %v8830_v40  ;;  %v10086_v30 = vld [vmem:[%s11740_s17 + $0x218] sm:$0xff]  ;;  %v10069_v59 = vld [vmem:[%s11740_s17 + $0x190] sm:$0xff] }
 0x219   : > { %v4586_v21 = vunpack.c.l.b16 %v4506_v18  ;;  %v4587_v56 = vunpack.c.h.b16 %v4506_v18  ;;  %v10094_v42 = vld [vmem:[%s11740_s17 + $0x258] sm:$0xff]  ;;  %5270 = vmatpush.bf16.msra.mxu0 %v10086_v30  ;;  %v12097_v18 = vor.u32 %v10006_v25, %v8836_v23  ;;  %v10077_v40 = vld [vmem:[%s11740_s17 + $0x1d0] sm:$0xff]  ;;  %4996 = vmatpush.bf16.msra.mxu2 %v10069_v59 }
 0x21a   : > { %v4509_v37 = vsel %vm11998_vm5, %v4507_v36, %v4508_v34  ;;  %v4590_v36 = vunpack.c.l.b16 %v4513_v43  ;;  %v4592_v34 = vunpack.c.l.b16 %v4516_v7  ;;  %5319 = vmatpush.bf16.msra.mxu1 %v10094_v42  ;;  %5045 = vmatpush.bf16.msra.mxu3 %v10077_v40  ;;  %v10008_v43 = vld [vmem:[#allocation3 + $0x64] sm:$0xf0]  ;;  %v8846_v30 = vld [vmem:[#allocation3 + $0x68] sm:$0xf0] }
 0x21b   : > { %v4588_v31 = vunpack.c.l.b16 %v4509_v37  ;;  %v4589_v52 = vunpack.c.h.b16 %v4509_v37  ;;  %v12120_v42 = vor.u32 %v10008_v43, %v8844_v6  ;;  %v8852_v43 = vld [vmem:[#allocation3 + $0x78] sm:$0xf] }
 0x21c   : > { %v12099_v37 = vpack.c.b16 %v4592_v34, %v4590_v36 }
 0x21d   : > { %v12076_v61 = vpack.c.b16 %v4588_v31, %v4586_v21  ;;  %v12080_v1 = vpack.c.b16 %v4589_v52, %v4587_v56  ;;  %v12101_v21 = vor.u32 %v10005_v13, %v8838_v26  ;;  %v12103_v31 = vpack.c.b16 %v4593_v24, %v4591_v29  ;;  %5271 = vmatpush.bf16.msra.mxu0 %v10085_v4 }
 0x21e   : > { %v4521_v56 = vrot.slane %v4519_v2, 4  ;;  %v4522_v52 = vrot.slane %v11812_v53, 5  ;;  %5320 = vmatpush.bf16.msra.mxu1 %v10093_v5  ;;  %v10007_v53 = vld [vmem:[#allocation3 + $0x64] sm:$0xf]  ;;  %v4526_v29 = vrot.slane %v11809_v50, 5  ;;  %v8943_v26 = vrot.slane %v11804_v46, 9 }
 0x21f   : > { %v12124_v23 = vor.u32 %v10007_v53, %v8846_v30  ;;  %v10076_v50 = vld [vmem:[%s11740_s17 + $0x1c8] sm:$0xff] }
 0x220   : > { %v4523_v3 = vsel %vm11998_vm5, %v4521_v56, %v4522_v52  ;;  %v4528_v2 = vrot.slane %v4526_v29, 4  ;;  %v10068_v56 = vld [vmem:[%s11740_s17 + $0x188] sm:$0xff]  ;;  %5046 = vmatpush.bf16.msra.mxu3 %v10076_v50 }
 0x221   : > { %v4596_v9 = vunpack.c.l.b16 %v4523_v3  ;;  %v4597_v7 = vunpack.c.h.b16 %v4523_v3  ;;  %4997 = vmatpush.bf16.msra.mxu2 %v10068_v56  ;;  %v4527_v3 = vsel %vm11998_vm5, %v8943_v26, %v4526_v29  ;;  %v10009_v30 = vld [vmem:[#allocation3 + $0x7c] sm:$0xf] }
 0x222   : > { %v4530_v4 = vsel %vm11998_vm5, %v4528_v2, %v4529_v45  ;;  %5321 = vmatpush.bf16.msra.mxu1 %v10092_v38  ;;  %v10067_v38 = vld [vmem:[%s11740_s17 + $0x180] sm:$0xff] }
 0x223   : > { %v12122_v36 = vpack.c.b16 %v4596_v9, %v4594_v28  ;;  %v12126_v25 = vpack.c.b16 %v4597_v7, %v4595_v16  ;;  %v10084_v28 = vld [vmem:[%s11740_s17 + $0x208] sm:$0xff]  ;;  %v4598_v9 = vunpack.c.l.b16 %v4527_v3  ;;  %v4600_v6 = vunpack.c.l.b16 %v4530_v4  ;;  %v10010_v16 = vld [vmem:[#allocation3 + $0x7c] sm:$0xf0] }
 0x224   : > { %v4599_v7 = vunpack.c.h.b16 %v4527_v3  ;;  %v4601_v53 = vunpack.c.h.b16 %v4530_v4  ;;  %5272 = vmatpush.bf16.msra.mxu0 %v10084_v28  ;;  %v12149_v26 = vor.u32 %v10010_v16, %v8852_v43  ;;  %v8944_v4 = vrot.slane %v11856_v33, 9 }
 0x225   : > { %4393 = vmatmul.bf16.gmra.mxu2 %v12055_v8  ;;  %4751 = vmatmul.bf16.gmra.mxu0 %v12039_v32  ;;  %13600 = vst [vmem:[#allocation40_spill] sm:$0xff] %v12122_v36  ;;  %v12151_v2 = vpack.c.b16 %v4600_v6, %v4598_v9  ;;  %v4536_v28 = vrot.slane %v11930_v62, 5  ;;  %v10091_v62 = vld [vmem:[%s11740_s17 + $0x240] sm:$0xff] }
 0x226   : > { %4800 = vmatmul.bf16.gmra.mxu1 %v12041_v35  ;;  %13601 = vst [vmem:[#allocation41_spill] sm:$0xff] %v12126_v25  ;;  %4998 = vmatpush.bf16.msra.mxu2 %v10067_v38 }
 0x227   : > { %13602 = vst [vmem:[#allocation42_spill] sm:$0xff] %v12151_v2  ;;  %5322 = vmatpush.bf16.msra.mxu1 %v10091_v62 }
 0x228   : > { %4442 = vmatmul.bf16.gmra.mxu3 %v12057_v27 }
 0x235   : > { %4398 = vmatmul.bf16.gmra.mxu2 %v12074_v60  ;;  %4756 = vmatmul.bf16.gmra.mxu0 %v12076_v61 }
 0x236   : > { %4805 = vmatmul.bf16.gmra.mxu1 %v12080_v1 }
 0x238   : > { %4447 = vmatmul.bf16.gmra.mxu3 %v12078_v63 }
 0x245   : > { %4403 = vmatmul.bf16.gmra.mxu2 %v12097_v18  ;;  %4761 = vmatmul.bf16.gmra.mxu0 %v12099_v37 }
 0x246   : > { %4810 = vmatmul.bf16.gmra.mxu1 %v12103_v31 }
 0x248   : > { %4452 = vmatmul.bf16.gmra.mxu3 %v12101_v21 }
 0x252   : > { %v4115_v34 = vpop.f32.mrf.mxu0 }
 0x253   : > { %v4164_v24 = vpop.f32.mrf.mxu1 }
 0x254   : > { %v12129_v13 = vadd.f32 %v4164_v24, %v4115_v34  ;;  %v8854_v34 = vld [vmem:[#allocation3 + $0x80] sm:$0xf0] }
 0x255   : > { %4408 = vmatmul.bf16.gmra.mxu2 %v12120_v42  ;;  %4766 = vmatmul.bf16.gmra.mxu0 %v12122_v36  ;;  %v12155_v50 = vor.u32 %v10009_v30, %v8854_v34  ;;  %v10083_v34 = vld [vmem:[%s11740_s17 + $0x200] sm:$0xff] }
 0x256   : > { %4815 = vmatmul.bf16.gmra.mxu1 %v12126_v25  ;;  %5273 = vmatpush.bf16.msra.mxu0 %v10083_v34 }
 0x258   : > { %4457 = vmatmul.bf16.gmra.mxu3 %v12124_v23  ;;  %v4135_v52 = vpop.f32.mrf.mxu2 }
 0x25a   : > { %v4117_v17 = vpop.f32.mrf.mxu0 }
 0x25b   : > { %v4184_v59 = vpop.f32.mrf.mxu3  ;;  %v4166_v46 = vpop.f32.mrf.mxu1 }
 0x25c   : > { %v12139_v40 = vadd.f32 %v4184_v59, %v4135_v52  ;;  %v12145_v5 = vadd.f32 %v4166_v46, %v4117_v17  ;;  %v12157_v52 = vpack.c.b16 %v4601_v53, %v4599_v7  ;;  %v4533_v59 = vrot.slane %v11863_v39, 5  ;;  %v10075_v39 = vld [vmem:[%s11740_s17 + $0x1c0] sm:$0xff] }
 0x25d   : > { %5047 = vmatpush.bf16.msra.mxu3 %v10075_v39 }
 0x25e   : > { %13603 = vst [vmem:[#allocation43_spill] sm:$0xff] %v12157_v52  ;;  %v4535_v46 = vrot.slane %v4533_v59, 4  ;;  %v4534_v7 = vsel %vm11998_vm5, %v8944_v4, %v4533_v59 }
 0x25f   : > { %v4603_v38 = vunpack.c.h.b16 %v4534_v7 }
 0x260   : > { %v4137_v24 = vpop.f32.mrf.mxu2  ;;  %v4537_v53 = vsel %vm11998_vm5, %v4535_v46, %v4536_v28 }
 0x261   : > { %v4605_v39 = vunpack.c.h.b16 %v4537_v53 }
 0x262   : > { %v4120_v56 = vpop.f32.mrf.mxu0 }
 0x263   : > { %v4186_v29 = vpop.f32.mrf.mxu3  ;;  %v4169_v17 = vpop.f32.mrf.mxu1 }
 0x264   : > { %v12153_v45 = vadd.f32 %v4186_v29, %v4137_v24  ;;  %v12160_v3 = vadd.f32 %v4169_v17, %v4120_v56  ;;  %v4602_v24 = vunpack.c.l.b16 %v4534_v7  ;;  %v4604_v29 = vunpack.c.l.b16 %v4537_v53  ;;  %v8860_v56 = vld [vmem:[#allocation3 + $0x90] sm:$0xf]  ;;  %v10012_v17 = vld [vmem:[#allocation3 + $0x94] sm:$0xf0] }
 0x265   : > { %4413 = vmatmul.bf16.gmra.mxu2 %v12149_v26  ;;  %4771 = vmatmul.bf16.gmra.mxu0 %v12151_v2  ;;  %v12180_v4 = vor.u32 %v10012_v17, %v8860_v56  ;;  %v12188_v2 = vpack.c.b16 %v4605_v39, %v4603_v38  ;;  %v4540_v7 = vrot.slane %v11927_v57, 5  ;;  %v10114_v57 = vld [vmem:[%s11740_s17 + $0x2f8] sm:$0xff] }
 0x266   : > { %4820 = vmatmul.bf16.gmra.mxu1 %v12157_v52  ;;  %v12182_v46 = vpack.c.b16 %v4604_v29, %v4602_v24  ;;  %v4543_v24 = vrot.slane %v11989_v58, 5  ;;  %v10106_v29 = vld [vmem:[%s11740_s17 + $0x2b8] sm:$0xff]  ;;  %5574 = vmatpush.bf16.msrb.mxu3 %v10114_v57 }
 0x267   : > { %13605 = vst [vmem:[#allocation45_spill] sm:$0xff] %v12188_v2  ;;  %v4542_v62 = vrot.slane %v4540_v7, 4  ;;  %5525 = vmatpush.bf16.msrb.mxu2 %v10106_v29  ;;  %v10014_v29 = vld [vmem:[#allocation3 + $0xac] sm:$0xf0] }
 0x268   : > { %4462 = vmatmul.bf16.gmra.mxu3 %v12155_v50  ;;  %v4140_v9 = vpop.f32.mrf.mxu2  ;;  %13604 = vst [vmem:[#allocation44_spill] sm:$0xff] %v12182_v46 }
 0x26a   : > { %v4122_v16 = vpop.f32.mrf.mxu0 }
 0x26b   : > { %v4189_v6 = vpop.f32.mrf.mxu3  ;;  %v4171_v33 = vpop.f32.mrf.mxu1 }
 0x26c   : > { %v12170_v43 = vadd.f32 %v4189_v6, %v4140_v9  ;;  %v12176_v30 = vadd.f32 %v4171_v33, %v4122_v16  ;;  %v10011_v9 = vld [vmem:[#allocation3 + $0x94] sm:$0xf]  ;;  %v8862_v6 = vld [vmem:[#allocation3 + $0x98] sm:$0xf0] }
 0x26d   : > { %v12186_v33 = vor.u32 %v10011_v9, %v8862_v6 }
 0x270   : > { %v4142_v52 = vpop.f32.mrf.mxu2 }
 0x272   : > { %v4125_v16 = vpop.f32.mrf.mxu0 }
 0x273   : > { %v4191_v59 = vpop.f32.mrf.mxu3  ;;  %v4174_v53 = vpop.f32.mrf.mxu1 }
 0x274   : > { %v12184_v28 = vadd.f32 %v4191_v59, %v4142_v52  ;;  %v12191_v34 = vadd.f32 %v4174_v53, %v4125_v16  ;;  %v8945_v52 = vrot.slane %v11921_v47, 9  ;;  %v4544_v47 = vsel %vm11998_vm5, %v4542_v62, %v4543_v24  ;;  %v10122_v53 = vld [vmem:[%s11740_s17 + $0x338] sm:$0xff] }
 0x275   : > { %4418 = vmatmul.bf16.gmra.mxu2 %v12180_v4  ;;  %4776 = vmatmul.bf16.gmra.mxu0 %v12182_v46  ;;  %v4608_v16 = vunpack.c.l.b16 %v4544_v47  ;;  %v8868_v46 = vld [vmem:[#allocation3 + $0xa8] sm:$0xf]  ;;  %v4609_v25 = vunpack.c.h.b16 %v4544_v47 }
 0x276   : > { %4825 = vmatmul.bf16.gmra.mxu1 %v12188_v2  ;;  %v4541_v9 = vsel %vm11998_vm5, %v8945_v52, %v4540_v7  ;;  %v10130_v2 = vld [vmem:[%s11740_s17 + $0x378] sm:$0xff]  ;;  %5778 = vmatpush.bf16.msrb.mxu0 %v10122_v53  ;;  %v12211_v62 = vor.u32 %v10014_v29, %v8868_v46  ;;  %v10113_v46 = vld [vmem:[%s11740_s17 + $0x2f0] sm:$0xff] }
 0x277   : > { %v4606_v58 = vunpack.c.l.b16 %v4541_v9  ;;  %v4607_v57 = vunpack.c.h.b16 %v4541_v9  ;;  %5827 = vmatpush.bf16.msrb.mxu1 %v10130_v2  ;;  %v10105_v2 = vld [vmem:[%s11740_s17 + $0x2b0] sm:$0xff]  ;;  %5575 = vmatpush.bf16.msrb.mxu3 %v10113_v46 }
 0x278   : > { %4467 = vmatmul.bf16.gmra.mxu3 %v12186_v33  ;;  %v4145_v56 = vpop.f32.mrf.mxu2  ;;  %5526 = vmatpush.bf16.msrb.mxu2 %v10105_v2 }
 0x279   : > { %v12213_v24 = vpack.c.b16 %v4608_v16, %v4606_v58  ;;  %v12219_v36 = vpack.c.b16 %v4609_v25, %v4607_v57 }
 0x27a   : > { %v4127_v39 = vpop.f32.mrf.mxu0 }
 0x27b   : > { %v4194_v17 = vpop.f32.mrf.mxu3  ;;  %v4176_v6 = vpop.f32.mrf.mxu1  ;;  %13606 = vst [vmem:[#allocation46_spill] sm:$0xff] %v12213_v24 }
 0x27c   : > { %v12201_v38 = vadd.f32 %v4194_v17, %v4145_v56  ;;  %v12207_v59 = vadd.f32 %v4176_v6, %v4127_v39  ;;  %v10013_v56 = vld [vmem:[#allocation3 + $0xac] sm:$0xf]  ;;  %v8870_v17 = vld [vmem:[#allocation3 + $0xb0] sm:$0xf0]  ;;  %13607 = vst [vmem:[#allocation47_spill] sm:$0xff] %v12219_v36 }
 0x27d   : > { %v12217_v0 = vor.u32 %v10013_v56, %v8870_v17  ;;  %v10121_v56 = vld [vmem:[%s11740_s17 + $0x330] sm:$0xff] }
 0x27e   : > { %v10129_v17 = vld [vmem:[%s11740_s17 + $0x370] sm:$0xff]  ;;  %5779 = vmatpush.bf16.msrb.mxu0 %v10121_v56 }
 0x27f   : > { %5828 = vmatpush.bf16.msrb.mxu1 %v10129_v17 }
 0x280   : > { %v4147_v7 = vpop.f32.mrf.mxu2 }
 0x282   : > { %v4130_v6 = vpop.f32.mrf.mxu0 }
 0x283   : > { %v4196_v52 = vpop.f32.mrf.mxu3  ;;  %v4179_v9 = vpop.f32.mrf.mxu1 }
 0x284   : > { %v12215_v39 = vadd.f32 %v4196_v52, %v4147_v7  ;;  %v12221_v47 = vadd.f32 %v4179_v9, %v4130_v6 }
 0x285   : > { %4423 = vmatmul.bf16.gmra.mxu2 %v12211_v62  ;;  %4781 = vmatmul.bf16.gmra.mxu0 %v12213_v24 }
 0x286   : > { %4830 = vmatmul.bf16.gmra.mxu1 %v12219_v36 }
 0x288   : > { %4472 = vmatmul.bf16.gmra.mxu3 %v12217_v0  ;;  %v4150_v58 = vpop.f32.mrf.mxu2 }
 0x28a   : > { %v4132_v53 = vpop.f32.mrf.mxu0 }
 0x28b   : > { %v4199_v25 = vpop.f32.mrf.mxu3  ;;  %v4181_v29 = vpop.f32.mrf.mxu1 }
 0x28c   : > { %v12229_v16 = vadd.f32 %v4199_v25, %v4150_v58  ;;  %v12231_v57 = vadd.f32 %v4181_v29, %v4132_v53  ;;  %v10104_v58 = vld [vmem:[%s11740_s17 + $0x2a8] sm:$0xff] }
 0x28d   : > { %v10112_v25 = vld [vmem:[%s11740_s17 + $0x2e8] sm:$0xff]  ;;  %5527 = vmatpush.bf16.msrb.mxu2 %v10104_v58 }
 0x28e   : > { %5576 = vmatpush.bf16.msrb.mxu3 %v10112_v25 }
 0x290   : > { %v4152_v7 = vpop.f32.mrf.mxu2 }
 0x292   : > { %v4747_v9 = vpop.f32.mrf.mxu0 }
 0x293   : > { %v4201_v52 = vpop.f32.mrf.mxu3  ;;  %v4796_v2 = vpop.f32.mrf.mxu1 }
 0x294   : > { %v12235_v6 = vadd.f32 %v4201_v52, %v4152_v7  ;;  %v4797_v46 = vadd.f32 %v4796_v2, %v4747_v9  ;;  %v10128_v2 = vld [vmem:[%s11740_s17 + $0x368] sm:$0xff] }
 0x295   : > { %4999 = vmatmul.bf16.vlgmr.msra.gmra.mxu2 %v12055_v8  ;;  %5274 = vmatmul.bf16.vlgmr.msra.gmra.mxu0 %v11940_v15  ;;  %v10120_v15 = vld [vmem:[%s11740_s17 + $0x328] sm:$0xff] }
 0x296   : > { %5323 = vmatmul.bf16.vlgmr.msra.gmra.mxu1 %v11944_v20  ;;  %5780 = vmatpush.bf16.msrb.mxu0 %v10120_v15 }
 0x297   : > { %5829 = vmatpush.bf16.msrb.mxu1 %v10128_v2  ;;  %v10119_v2 = vld [vmem:[%s11740_s17 + $0x320] sm:$0xff] }
 0x298   : > { %5048 = vmatmul.bf16.vlgmr.msra.gmra.mxu3 %v12057_v27  ;;  %v4389_v53 = vpop.f32.mrf.mxu2 }
 0x299   : > { %v4390_v29 = vadd.f32 %v4389_v53, %v12129_v13 }
 0x29a   : > { %v4749_v17 = vpop.f32.mrf.mxu0  ;;  %5781 = vmatpush.bf16.msrb.mxu0 %v10119_v2 }
 0x29b   : > { %v4438_v56 = vpop.f32.mrf.mxu3  ;;  %v4798_v52 = vpop.f32.mrf.mxu1 }
 0x29c   : > { %v4439_v7 = vadd.f32 %v4438_v56, %v4390_v29  ;;  %v4799_v8 = vadd.f32 %v4798_v52, %v4749_v17  ;;  %v10111_v29 = vld [vmem:[%s11740_s17 + $0x2e0] sm:$0xff] }
 0x29d   : > { %5577 = vmatpush.bf16.msrb.mxu3 %v10111_v29 }
 0x29e   : > { %v12244_v9 = vadd.f32 %v4797_v46, %v4439_v7  ;;  %v10103_v46 = vld [vmem:[%s11740_s17 + $0x2a0] sm:$0xff] }
 0x29f   : > { %5528 = vmatpush.bf16.msrb.mxu2 %v10103_v46 }
 0x2a0   : > { %v4391_v20 = vpop.f32.mrf.mxu2 }
 0x2a1   : > { %v4392_v27 = vadd.f32 %v4391_v20, %v12145_v5  ;;  %v10127_v20 = vld [vmem:[%s11740_s17 + $0x360] sm:$0xff] }
 0x2a2   : > { %v4752_v25 = vpop.f32.mrf.mxu0  ;;  %5830 = vmatpush.bf16.msrb.mxu1 %v10127_v20 }
 0x2a3   : > { %v4440_v58 = vpop.f32.mrf.mxu3  ;;  %v4801_v13 = vpop.f32.mrf.mxu1 }
 0x2a4   : > { %v4441_v36 = vadd.f32 %v4440_v58, %v4392_v27  ;;  %v4802_v53 = vadd.f32 %v4801_v13, %v4752_v25 }
 0x2a5   : > { %5004 = vmatmul.bf16.gmra.mxu2 %v12074_v60  ;;  %5279 = vmatmul.bf16.gmra.mxu0 %v11984_v49 }
 0x2a6   : > { %v12249_v24 = vadd.f32 %v4799_v8, %v4441_v36  ;;  %5328 = vmatmul.bf16.gmra.mxu1 %v11986_v51 }
 0x2a8   : > { %5053 = vmatmul.bf16.gmra.mxu3 %v12078_v63  ;;  %v4394_v5 = vpop.f32.mrf.mxu2 }
 0x2a9   : > { %v4395_v56 = vadd.f32 %v4394_v5, %v12160_v3 }
 0x2aa   : > { %v4754_v36 = vpop.f32.mrf.mxu0 }
 0x2ab   : > { %v4443_v17 = vpop.f32.mrf.mxu3  ;;  %v4803_v52 = vpop.f32.mrf.mxu1 }
 0x2ac   : > { %v4444_v7 = vadd.f32 %v4443_v17, %v4395_v56  ;;  %v4804_v8 = vadd.f32 %v4803_v52, %v4754_v36  ;;  %v10110_v56 = vld [vmem:[%s11740_s17 + $0x2d8] sm:$0xff] }
 0x2ad   : > { %5578 = vmatpush.bf16.msrb.mxu3 %v10110_v56 }
 0x2ae   : > { %v12258_v15 = vadd.f32 %v4802_v53, %v4444_v7  ;;  %v10102_v53 = vld [vmem:[%s11740_s17 + $0x298] sm:$0xff] }
 0x2af   : > { %5529 = vmatpush.bf16.msrb.mxu2 %v10102_v53 }
 0x2b0   : > { %v4396_v27 = vpop.f32.mrf.mxu2 }
 0x2b1   : > { %v4397_v58 = vadd.f32 %v4396_v27, %v12176_v30  ;;  %v10118_v27 = vld [vmem:[%s11740_s17 + $0x318] sm:$0xff] }
 0x2b2   : > { %v4757_v13 = vpop.f32.mrf.mxu0  ;;  %5782 = vmatpush.bf16.msrb.mxu0 %v10118_v27 }
 0x2b3   : > { %v4445_v25 = vpop.f32.mrf.mxu3  ;;  %v4806_v3 = vpop.f32.mrf.mxu1 }
 0x2b4   : > { %v4446_v46 = vadd.f32 %v4445_v25, %v4397_v58  ;;  %v4807_v29 = vadd.f32 %v4806_v3, %v4757_v13  ;;  %v10126_v58 = vld [vmem:[%s11740_s17 + $0x358] sm:$0xff] }
 0x2b5   : > { %5009 = vmatmul.bf16.gmra.mxu2 %v12097_v18  ;;  %5284 = vmatmul.bf16.gmra.mxu0 %v12027_v11 }
 0x2b6   : > { %v12263_v5 = vadd.f32 %v4804_v8, %v4446_v46  ;;  %5333 = vmatmul.bf16.gmra.mxu1 %v12029_v12 }
 0x2b7   : > { %5831 = vmatpush.bf16.msrb.mxu1 %v10126_v58 }
 0x2b8   : > { %5058 = vmatmul.bf16.gmra.mxu3 %v12101_v21  ;;  %v4399_v30 = vpop.f32.mrf.mxu2 }
 0x2b9   : > { %v4400_v17 = vadd.f32 %v4399_v30, %v12191_v34 }
 0x2ba   : > { %v4759_v7 = vpop.f32.mrf.mxu0 }
 0x2bb   : > { %v4448_v36 = vpop.f32.mrf.mxu3  ;;  %v4808_v8 = vpop.f32.mrf.mxu1 }
 0x2bc   : > { %v4449_v52 = vadd.f32 %v4448_v36, %v4400_v17  ;;  %v4809_v2 = vadd.f32 %v4808_v8, %v4759_v7  ;;  %v10109_v17 = vld [vmem:[%s11740_s17 + $0x2d0] sm:$0xff] }
 0x2bd   : > { %5579 = vmatpush.bf16.msrb.mxu3 %v10109_v17 }
 0x2be   : > { %v12272_v20 = vadd.f32 %v4807_v29, %v4449_v52  ;;  %v10101_v29 = vld [vmem:[%s11740_s17 + $0x290] sm:$0xff] }
 0x2bf   : > { %5530 = vmatpush.bf16.msrb.mxu2 %v10101_v29 }
 0x2c0   : > { %v4401_v25 = vpop.f32.mrf.mxu2 }
 0x2c1   : > { %v4402_v13 = vadd.f32 %v4401_v25, %v12207_v59  ;;  %v10117_v25 = vld [vmem:[%s11740_s17 + $0x310] sm:$0xff] }
 0x2c2   : > { %v4762_v3 = vpop.f32.mrf.mxu0  ;;  %5783 = vmatpush.bf16.msrb.mxu0 %v10117_v25 }
 0x2c3   : > { %v4450_v46 = vpop.f32.mrf.mxu3  ;;  %v4811_v34 = vpop.f32.mrf.mxu1 }
 0x2c4   : > { %v4451_v53 = vadd.f32 %v4450_v46, %v4402_v13  ;;  %v4812_v56 = vadd.f32 %v4811_v34, %v4762_v3  ;;  %v10125_v13 = vld [vmem:[%s11740_s17 + $0x350] sm:$0xff] }
 0x2c5   : > { %5014 = vmatmul.bf16.gmra.mxu2 %v12120_v42  ;;  %5289 = vmatmul.bf16.gmra.mxu0 %v11870_v48 }
 0x2c6   : > { %v12277_v30 = vadd.f32 %v4809_v2, %v4451_v53  ;;  %5338 = vmatmul.bf16.gmra.mxu1 %v11873_v54 }
 0x2c7   : > { %5832 = vmatpush.bf16.msrb.mxu1 %v10125_v13 }
 0x2c8   : > { %5063 = vmatmul.bf16.gmra.mxu3 %v12124_v23  ;;  %v4404_v59 = vpop.f32.mrf.mxu2 }
 0x2c9   : > { %v4405_v36 = vadd.f32 %v4404_v59, %v12221_v47  ;;  %v3645_v59 = vld [vmem:[%s11738_s2 + $0x10] sm:$0x11] }
 0x2ca   : > { %v4764_v52 = vpop.f32.mrf.mxu0  ;;  %3652 = vst [vmem:[#allocation3 + $0xd0] sm:$0x11] %v3645_v59 }
 0x2cb   : > { %v4453_v7 = vpop.f32.mrf.mxu3  ;;  %v4813_v2 = vpop.f32.mrf.mxu1 }
 0x2cc   : > { %v4454_v8 = vadd.f32 %v4453_v7, %v4405_v36  ;;  %v4814_v27 = vadd.f32 %v4813_v2, %v4764_v52  ;;  %v12301_v52 = vld [vmem:[%s11738_s2] sm:$0xff] }
 0x2cd   : > { %3650 = vst [vmem:[#allocation3 + $0xc0] sm:$0xff] %v12301_v52 }
 0x2ce   : > { %v12286_v58 = vadd.f32 %v4812_v56, %v4454_v8  ;;  %v10108_v56 = vld [vmem:[%s11740_s17 + $0x2c8] sm:$0xff] }
 0x2cf   : > { %5580 = vmatpush.bf16.msrb.mxu3 %v10108_v56 }
 0x2d0   : > { %v4406_v46 = vpop.f32.mrf.mxu2 }
 0x2d1   : > { %v4407_v3 = vadd.f32 %v4406_v46, %v12231_v57  ;;  %v10100_v57 = vld [vmem:[%s11740_s17 + $0x288] sm:$0xff] }
 0x2d2   : > { %v4767_v34 = vpop.f32.mrf.mxu0  ;;  %5531 = vmatpush.bf16.msrb.mxu2 %v10100_v57 }
 0x2d3   : > { %v4455_v53 = vpop.f32.mrf.mxu3  ;;  %v4816_v29 = vpop.f32.mrf.mxu1 }
 0x2d4   : > { %v4456_v47 = vadd.f32 %v4455_v53, %v4407_v3  ;;  %v4817_v17 = vadd.f32 %v4816_v29, %v4767_v34  ;;  %v10116_v34 = vld [vmem:[%s11740_s17 + $0x308] sm:$0xff] }
 0x2d5   : > { %5019 = vmatmul.bf16.gmra.mxu2 %v12149_v26  ;;  %5294 = vmatmul.bf16.gmra.mxu0 %v11942_v19 }
 0x2d6   : > { %v12292_v36 = vadd.f32 %v4814_v27, %v4456_v47  ;;  %5343 = vmatmul.bf16.gmra.mxu1 %v11946_v22  ;;  %v12305_v27 = vld [vmem:[%s11738_s2 + $0x8] sm:$0xff]  ;;  %5784 = vmatpush.bf16.msrb.mxu0 %v10116_v34 }
 0x2d7   : > { %3651 = vst [vmem:[#allocation3 + $0xc8] sm:$0xff] %v12305_v27  ;;  %v10124_v47 = vld [vmem:[%s11740_s17 + $0x348] sm:$0xff]  ;;  %v5115_v34 = vshll.u32 %v12305_v27, 16 }
 0x2d8   : > { %5068 = vmatmul.bf16.gmra.mxu3 %v12155_v50  ;;  %v4409_v7 = vpop.f32.mrf.mxu2  ;;  %5833 = vmatpush.bf16.msrb.mxu1 %v10124_v47  ;;  %v5119_v47 = vshrl.u32 %v12305_v27, 16 }
 0x2d9   : > { %v4410_v8 = vadd.f32 %v4409_v7, %v12139_v40 }
 0x2da   : > { %v4769_v25 = vpop.f32.mrf.mxu0 }
 0x2db   : > { %v4458_v2 = vpop.f32.mrf.mxu3  ;;  %v4818_v46 = vpop.f32.mrf.mxu1 }
 0x2dc   : > { %v4459_v13 = vadd.f32 %v4458_v2, %v4410_v8  ;;  %v4819_v3 = vadd.f32 %v4818_v46, %v4769_v25  ;;  %v10107_v8 = vld [vmem:[%s11740_s17 + $0x2c0] sm:$0xff]  ;;  %v5106_v46 = vshrl.u32 %v12301_v52, 16 }
 0x2dd   : > { %5581 = vmatpush.bf16.msrb.mxu3 %v10107_v8 }
 0x2de   : > { %v12309_v53 = vadd.f32 %v4817_v17, %v4459_v13  ;;  %v10099_v17 = vld [vmem:[%s11740_s17 + $0x280] sm:$0xff] }
 0x2df   : > { %5532 = vmatpush.bf16.msrb.mxu2 %v10099_v17  ;;  %v5108_v17 = vrot.slane %v5106_v46, 4 }
 0x2e0   : > { %v4411_v40 = vpop.f32.mrf.mxu2 }
 0x2e1   : > { %v4412_v29 = vadd.f32 %v4411_v40, %v12153_v45 }
 0x2e2   : > { %v4772_v57 = vpop.f32.mrf.mxu0 }
 0x2e3   : > { %v4460_v59 = vpop.f32.mrf.mxu3  ;;  %v4821_v7 = vpop.f32.mrf.mxu1 }
 0x2e4   : > { %v4461_v56 = vadd.f32 %v4460_v59, %v4412_v29  ;;  %v4822_v22 = vadd.f32 %v4821_v7, %v4772_v57  ;;  %v10123_v7 = vld [vmem:[%s11740_s17 + $0x340] sm:$0xff] }
 0x2e5   : > { %5024 = vmatmul.bf16.gmra.mxu2 %v12180_v4  ;;  %5299 = vmatmul.bf16.gmra.mxu0 %v11994_v55 }
 0x2e6   : > { %v12314_v19 = vadd.f32 %v4819_v3, %v4461_v56  ;;  %5348 = vmatmul.bf16.gmra.mxu1 %v11996_v10  ;;  %v5109_v3 = vshll.u32 %v12301_v52, 16  ;;  %v10115_v56 = vld [vmem:[%s11740_s17 + $0x300] sm:$0xff] }
 0x2e7   : > { %v12331_v10 = vld [vmem:[#allocation3 + $0xd0] sm:$0x11]  ;;  %5785 = vmatpush.bf16.msrb.mxu0 %v10115_v56  ;;  %5834 = vmatpush.bf16.msrb.mxu1 %v10123_v7  ;;  %v10146_v56 = vld [vmem:[%s11740_s17 + $0x3f8] sm:$0xff] }
 0x2e8   : > { %5073 = vmatmul.bf16.gmra.mxu3 %v12186_v33  ;;  %v4414_v45 = vpop.f32.mrf.mxu2  ;;  %v5111_v8 = vrot.slane %v5109_v3, 5 }
 0x2e9   : > { %v4415_v2 = vadd.f32 %v4414_v45, %v12170_v43  ;;  %v5117_v43 = vrot.slane %v5115_v34, 5  ;;  %v5121_v45 = vrot.slane %v5119_v47, 4  ;;  %6102 = vmatpush.bf16.msra.mxu3 %v10146_v56  ;;  %v9076_v56 = vld [vmem:[#allocation3 + $0xc0] sm:$0xf] }
 0x2ea   : > { %v4774_v13 = vpop.f32.mrf.mxu0 }
 0x2eb   : > { %v4463_v25 = vpop.f32.mrf.mxu3  ;;  %v4823_v29 = vpop.f32.mrf.mxu1 }
 0x2ec   : > { %v4464_v40 = vadd.f32 %v4463_v25, %v4415_v2  ;;  %v4824_v59 = vadd.f32 %v4823_v29, %v4774_v13  ;;  %v5112_v25 = vor.u32 %v5111_v8, %v5108_v17  ;;  %v5125_v13 = vshll.u32 %v12331_v10, 16  ;;  %v10138_v29 = vld [vmem:[%s11740_s17 + $0x3b8] sm:$0xff] }
 0x2ed   : > { %6053 = vmatpush.bf16.msra.mxu2 %v10138_v29 }
 0x2ee   : > { %v12327_v57 = vadd.f32 %v4822_v22, %v4464_v40  ;;  %v5122_v22 = vor.u32 %v5121_v45, %v5117_v43  ;;  %v5127_v47 = vrot.slane %v5125_v13, 5  ;;  %v10162_v13 = vld [vmem:[%s11740_s17 + $0x478] sm:$0xff] }
 0x2ef   : > { %6361 = vmatpush.bf16.msra.mxu1 %v10162_v13 }
 0x2f0   : > { %v4416_v55 = vpop.f32.mrf.mxu2 }
 0x2f1   : > { %v4417_v54 = vadd.f32 %v4416_v55, %v12184_v28  ;;  %v5113_v55 = vrot.slane %v5112_v25, 4  ;;  %v5123_v28 = vrot.slane %v5122_v22, 4  ;;  %v10154_v22 = vld [vmem:[%s11740_s17 + $0x438] sm:$0xff] }
 0x2f2   : > { %v4777_v2 = vpop.f32.mrf.mxu0  ;;  %6312 = vmatpush.bf16.msra.mxu0 %v10154_v22 }
 0x2f3   : > { %v4465_v48 = vpop.f32.mrf.mxu3  ;;  %v4826_v46 = vpop.f32.mrf.mxu1  ;;  %v5118_v17 = vsel %vm11798_vm2, %v5113_v55, %v5117_v43  ;;  %v5128_v8 = vsel %vm11798_vm2, %v5123_v28, %v5127_v47  ;;  %v9078_v43 = vld [vmem:[#allocation3 + $0xc8] sm:$0xf0] }
 0x2f4   : > { %v4466_v40 = vadd.f32 %v4465_v48, %v4417_v54  ;;  %v4827_v3 = vadd.f32 %v4826_v46, %v4777_v2  ;;  %v5162_v46 = vunpack.c.l.b16 %v5118_v17  ;;  %v5164_v29 = vunpack.c.l.b16 %v5128_v8 }
 0x2f5   : > { %5029 = vmatmul.bf16.gmra.mxu2 %v12211_v62  ;;  %5304 = vmatmul.bf16.gmra.mxu0 %v12031_v41  ;;  %v10015_v41 = vld [vmem:[#allocation3 + $0xc4] sm:$0xf] }
 0x2f6   : > { %v12335_v34 = vadd.f32 %v4824_v59, %v4466_v40  ;;  %5353 = vmatmul.bf16.gmra.mxu1 %v12033_v14  ;;  %v10016_v14 = vld [vmem:[#allocation3 + $0xc4] sm:$0xf0] }
 0x2f8   : > { %5078 = vmatmul.bf16.gmra.mxu3 %v12217_v0  ;;  %v4419_v48 = vpop.f32.mrf.mxu2 }
 0x2f9   : > { %v4420_v54 = vadd.f32 %v4419_v48, %v12201_v38  ;;  %v5163_v38 = vunpack.c.h.b16 %v5118_v17  ;;  %v5165_v48 = vunpack.c.h.b16 %v5128_v8 }
 0x2fa   : > { %v4779_v7 = vpop.f32.mrf.mxu0 }
 0x2fb   : > { %v4468_v59 = vpop.f32.mrf.mxu3  ;;  %v4828_v2 = vpop.f32.mrf.mxu1 }
 0x2fc   : > { %v4469_v45 = vadd.f32 %v4468_v59, %v4420_v54  ;;  %v4829_v25 = vadd.f32 %v4828_v2, %v4779_v7  ;;  %v12353_v54 = vor.u32 %v10016_v14, %v9076_v56  ;;  %v12357_v7 = vor.u32 %v10015_v41, %v9078_v43  ;;  %v10137_v14 = vld [vmem:[%s11740_s17 + $0x3b0] sm:$0xff] }
 0x2fd   : > { %v10145_v41 = vld [vmem:[%s11740_s17 + $0x3f0] sm:$0xff]  ;;  %6054 = vmatpush.bf16.msra.mxu2 %v10137_v14 }
 0x2fe   : > { %v12350_v40 = vadd.f32 %v4827_v3, %v4469_v45  ;;  %v12355_v3 = vpack.c.b16 %v5164_v29, %v5162_v46  ;;  %v12359_v45 = vpack.c.b16 %v5165_v48, %v5163_v38  ;;  %6103 = vmatpush.bf16.msra.mxu3 %v10145_v41  ;;  %v10153_v48 = vld [vmem:[%s11740_s17 + $0x430] sm:$0xff] }
 0x2ff   : > { %v10161_v43 = vld [vmem:[%s11740_s17 + $0x470] sm:$0xff]  ;;  %6313 = vmatpush.bf16.msra.mxu0 %v10153_v48  ;;  %v10160_v48 = vld [vmem:[%s11740_s17 + $0x468] sm:$0xff] }
 0x300   : > { %v4421_v55 = vpop.f32.mrf.mxu2  ;;  %6362 = vmatpush.bf16.msra.mxu1 %v10161_v43 }
 0x301   : > { %v4422_v28 = vadd.f32 %v4421_v55, %v12215_v39 }
 0x302   : > { %v4782_v59 = vpop.f32.mrf.mxu0 }
 0x303   : > { %v4470_v47 = vpop.f32.mrf.mxu3  ;;  %v4831_v8 = vpop.f32.mrf.mxu1 }
 0x304   : > { %v4471_v17 = vadd.f32 %v4470_v47, %v4422_v28  ;;  %v4832_v2 = vadd.f32 %v4831_v8, %v4782_v59  ;;  %6363 = vmatpush.bf16.msra.mxu1 %v10160_v48 }
 0x305   : > { %5034 = vmatmul.bf16.gmra.mxu2 %v12353_v54  ;;  %5309 = vmatmul.bf16.gmra.mxu0 %v12355_v3 }
 0x306   : > { %v12361_v22 = vadd.f32 %v4829_v25, %v4471_v17  ;;  %5358 = vmatmul.bf16.gmra.mxu1 %v12359_v45 }
 0x308   : > { %5083 = vmatmul.bf16.gmra.mxu3 %v12357_v7  ;;  %v4424_v39 = vpop.f32.mrf.mxu2 }
 0x309   : > { %v4425_v13 = vadd.f32 %v4424_v39, %v12229_v16  ;;  %v10144_v39 = vld [vmem:[%s11740_s17 + $0x3e8] sm:$0xff] }
 0x30a   : > { %v4784_v25 = vpop.f32.mrf.mxu0  ;;  %6104 = vmatpush.bf16.msra.mxu3 %v10144_v39 }
 0x30b   : > { %v4473_v46 = vpop.f32.mrf.mxu3  ;;  %v4833_v56 = vpop.f32.mrf.mxu1 }
 0x30c   : > { %v4474_v29 = vadd.f32 %v4473_v46, %v4425_v13  ;;  %v4834_v38 = vadd.f32 %v4833_v56, %v4784_v25 }
 0x30e   : > { %v12372_v55 = vadd.f32 %v4832_v2, %v4474_v29  ;;  %v10136_v2 = vld [vmem:[%s11740_s17 + $0x3a8] sm:$0xff] }
 0x30f   : > { %6055 = vmatpush.bf16.msra.mxu2 %v10136_v2 }
 0x310   : > { %v4426_v28 = vpop.f32.mrf.mxu2 }
 0x311   : > { %v4427_v47 = vadd.f32 %v4426_v28, %v12235_v6 }
 0x312   : > { %v5275_v17 = vpop.f32.mrf.mxu0 }
 0x313   : > { %v4475_v59 = vpop.f32.mrf.mxu3  ;;  %v5324_v16 = vpop.f32.mrf.mxu1 }
 0x314   : > { %v4476_v8 = vadd.f32 %v4475_v59, %v4427_v47  ;;  %v5325_v14 = vadd.f32 %v5324_v16, %v5275_v17 }
 0x315   : > { %5533 = vmatmul.bf16.vlgmr.msrb.gmra.mxu2 %v12039_v32  ;;  %5786 = vmatmul.bf16.vlgmr.msrb.gmra.mxu0 %v12074_v60  ;;  %v10152_v32 = vld [vmem:[%s11740_s17 + $0x428] sm:$0xff] }
 0x316   : > { %v12375_v41 = vadd.f32 %v4834_v38, %v4476_v8  ;;  %5835 = vmatmul.bf16.vlgmr.msrb.gmra.mxu1 %v12078_v63  ;;  %6314 = vmatpush.bf16.msra.mxu0 %v10152_v32  ;;  %v10143_v8 = vld [vmem:[%s11740_s17 + $0x3e0] sm:$0xff] }
 0x317   : > { %6105 = vmatpush.bf16.msra.mxu3 %v10143_v8 }
 0x318   : > { %5582 = vmatmul.bf16.vlgmr.msrb.gmra.mxu3 %v12041_v35  ;;  %v5000_v6 = vpop.f32.mrf.mxu2 }
 0x31a   : > { %v5277_v25 = vpop.f32.mrf.mxu0 }
 0x31b   : > { %v5049_v13 = vpop.f32.mrf.mxu3  ;;  %v5326_v29 = vpop.f32.mrf.mxu1 }
 0x31c   : > { %v5050_v46 = vadd.f32 %v5049_v13, %v5000_v6  ;;  %v5327_v38 = vadd.f32 %v5326_v29, %v5277_v25  ;;  %v10159_v25 = vld [vmem:[%s11740_s17 + $0x460] sm:$0xff] }
 0x31d   : > { %6364 = vmatpush.bf16.msra.mxu1 %v10159_v25 }
 0x31e   : > { %v5089_v56 = vadd.f32 %v5050_v46, %v12244_v9  ;;  %v10135_v9 = vld [vmem:[%s11740_s17 + $0x3a0] sm:$0xff] }
 0x31f   : > { %6056 = vmatpush.bf16.msra.mxu2 %v10135_v9 }
 0x320   : > { %v12386_v35 = vadd.f32 %v5325_v14, %v5089_v56  ;;  %v5002_v60 = vpop.f32.mrf.mxu2 }
 0x322   : > { %v5280_v28 = vpop.f32.mrf.mxu0 }
 0x323   : > { %v5051_v63 = vpop.f32.mrf.mxu3  ;;  %v5329_v47 = vpop.f32.mrf.mxu1 }
 0x324   : > { %v5052_v43 = vadd.f32 %v5051_v63, %v5002_v60  ;;  %v5330_v17 = vadd.f32 %v5329_v47, %v5280_v28 }
 0x325   : > { %5538 = vmatmul.bf16.gmra.mxu2 %v12076_v61  ;;  %5791 = vmatmul.bf16.gmra.mxu0 %v12097_v18  ;;  %v10151_v18 = vld [vmem:[%s11740_s17 + $0x420] sm:$0xff] }
 0x326   : > { %v5090_v59 = vadd.f32 %v5052_v43, %v12249_v24  ;;  %5840 = vmatmul.bf16.gmra.mxu1 %v12101_v21  ;;  %6315 = vmatpush.bf16.msra.mxu0 %v10151_v18  ;;  %v10142_v43 = vld [vmem:[%s11740_s17 + $0x3d8] sm:$0xff] }
 0x327   : > { %6106 = vmatpush.bf16.msra.mxu3 %v10142_v43 }
 0x328   : > { %5587 = vmatmul.bf16.gmra.mxu3 %v12080_v1  ;;  %v12395_v16 = vadd.f32 %v5327_v38, %v5090_v59  ;;  %v5005_v14 = vpop.f32.mrf.mxu2 }
 0x32a   : > { %v5282_v39 = vpop.f32.mrf.mxu0 }
 0x32b   : > { %v5054_v2 = vpop.f32.mrf.mxu3  ;;  %v5331_v6 = vpop.f32.mrf.mxu1 }
 0x32c   : > { %v5055_v24 = vadd.f32 %v5054_v2, %v5005_v14  ;;  %v5332_v46 = vadd.f32 %v5331_v6, %v5282_v39  ;;  %v10158_v2 = vld [vmem:[%s11740_s17 + $0x458] sm:$0xff] }
 0x32d   : > { %6365 = vmatpush.bf16.msra.mxu1 %v10158_v2 }
 0x32e   : > { %v5091_v13 = vadd.f32 %v5055_v24, %v12258_v15  ;;  %v10134_v15 = vld [vmem:[%s11740_s17 + $0x398] sm:$0xff] }
 0x32f   : > { %6057 = vmatpush.bf16.msra.mxu2 %v10134_v15 }
 0x330   : > { %v12400_v21 = vadd.f32 %v5330_v17, %v5091_v13  ;;  %v5007_v29 = vpop.f32.mrf.mxu2 }
 0x332   : > { %v5285_v32 = vpop.f32.mrf.mxu0 }
 0x333   : > { %v5056_v56 = vpop.f32.mrf.mxu3  ;;  %v5334_v48 = vpop.f32.mrf.mxu1 }
 0x334   : > { %v5057_v38 = vadd.f32 %v5056_v56, %v5007_v29  ;;  %v5335_v63 = vadd.f32 %v5334_v48, %v5285_v32  ;;  %v13608_v29 = vld [vmem:[#allocation40_spill] sm:$0xff] }
 0x335   : > { %5543 = vmatmul.bf16.gmra.mxu2 %v12099_v37  ;;  %5796 = vmatmul.bf16.gmra.mxu0 %v12120_v42  ;;  %v10150_v42 = vld [vmem:[%s11740_s17 + $0x418] sm:$0xff]  ;;  %v10133_v56 = vld [vmem:[%s11740_s17 + $0x390] sm:$0xff] }
 0x336   : > { %v5092_v60 = vadd.f32 %v5057_v38, %v12263_v5  ;;  %5845 = vmatmul.bf16.gmra.mxu1 %v12124_v23  ;;  %6316 = vmatpush.bf16.msra.mxu0 %v10150_v42  ;;  %v10141_v38 = vld [vmem:[%s11740_s17 + $0x3d0] sm:$0xff] }
 0x337   : > { %6058 = vmatpush.bf16.msra.mxu2 %v10133_v56  ;;  %6107 = vmatpush.bf16.msra.mxu3 %v10141_v38  ;;  %v12440_v38 = vld [vmem:[%s11738_s2 + $0x18] sm:$0xff] }
 0x338   : > { %5592 = vmatmul.bf16.gmra.mxu3 %v12103_v31  ;;  %v12409_v28 = vadd.f32 %v5332_v46, %v5092_v60  ;;  %v5010_v47 = vpop.f32.mrf.mxu2  ;;  %3653 = vst [vmem:[#allocation3 + $0xd8] sm:$0xff] %v12440_v38 }
 0x33a   : > { %v5287_v17 = vpop.f32.mrf.mxu0 }
 0x33b   : > { %v5059_v59 = vpop.f32.mrf.mxu3  ;;  %v5336_v9 = vpop.f32.mrf.mxu1 }
 0x33c   : > { %v5060_v5 = vadd.f32 %v5059_v59, %v5010_v47  ;;  %v5337_v14 = vadd.f32 %v5336_v9, %v5287_v17  ;;  %v10157_v59 = vld [vmem:[%s11740_s17 + $0x450] sm:$0xff] }
 0x33d   : > { %6366 = vmatpush.bf16.msra.mxu1 %v10157_v59 }
 0x33e   : > { %v5093_v8 = vadd.f32 %v5060_v5, %v12272_v20  ;;  %v13609_v20 = vld [vmem:[#allocation41_spill] sm:$0xff] }
 0x340   : > { %v12414_v23 = vadd.f32 %v5335_v63, %v5093_v8  ;;  %v5012_v24 = vpop.f32.mrf.mxu2 }
 0x342   : > { %v5290_v13 = vpop.f32.mrf.mxu0 }
 0x343   : > { %v5061_v39 = vpop.f32.mrf.mxu3  ;;  %v5339_v46 = vpop.f32.mrf.mxu1 }
 0x344   : > { %v5062_v6 = vadd.f32 %v5061_v39, %v5012_v24  ;;  %v5340_v25 = vadd.f32 %v5339_v46, %v5290_v13  ;;  %v13610_v24 = vld [vmem:[#allocation42_spill] sm:$0xff]  ;;  %v10132_v39 = vld [vmem:[%s11740_s17 + $0x388] sm:$0xff] }
 0x345   : > { %5548 = vmatmul.bf16.gmra.mxu2 %v13608_v29  ;;  %5801 = vmatmul.bf16.gmra.mxu0 %v12149_v26  ;;  %v10149_v26 = vld [vmem:[%s11740_s17 + $0x410] sm:$0xff] }
 0x346   : > { %v5094_v18 = vadd.f32 %v5062_v6, %v12277_v30  ;;  %5850 = vmatmul.bf16.gmra.mxu1 %v12155_v50  ;;  %6317 = vmatpush.bf16.msra.mxu0 %v10149_v26  ;;  %v10140_v6 = vld [vmem:[%s11740_s17 + $0x3c8] sm:$0xff] }
 0x347   : > { %6059 = vmatpush.bf16.msra.mxu2 %v10132_v39  ;;  %6108 = vmatpush.bf16.msra.mxu3 %v10140_v6 }
 0x348   : > { %5597 = vmatmul.bf16.gmra.mxu3 %v13609_v20  ;;  %v12423_v32 = vadd.f32 %v5337_v14, %v5094_v18  ;;  %v5015_v48 = vpop.f32.mrf.mxu2 }
 0x34a   : > { %v5292_v63 = vpop.f32.mrf.mxu0 }
 0x34b   : > { %v5064_v60 = vpop.f32.mrf.mxu3  ;;  %v5341_v15 = vpop.f32.mrf.mxu1 }
 0x34c   : > { %v5065_v30 = vadd.f32 %v5064_v60, %v5015_v48  ;;  %v5342_v47 = vadd.f32 %v5341_v15, %v5292_v63 }
 0x34e   : > { %v5095_v43 = vadd.f32 %v5065_v30, %v12286_v58  ;;  %v13611_v58 = vld [vmem:[#allocation43_spill] sm:$0xff] }
 0x34f   : > { %v10156_v30 = vld [vmem:[%s11740_s17 + $0x448] sm:$0xff] }
 0x350   : > { %v12428_v50 = vadd.f32 %v5340_v25, %v5095_v43  ;;  %v5017_v5 = vpop.f32.mrf.mxu2  ;;  %6367 = vmatpush.bf16.msra.mxu1 %v10156_v30  ;;  %v5383_v30 = vrot.slane %v12305_v27, 5 }
 0x352   : > { %v5295_v8 = vpop.f32.mrf.mxu0 }
 0x353   : > { %v5066_v17 = vpop.f32.mrf.mxu3  ;;  %v5344_v14 = vpop.f32.mrf.mxu1 }
 0x354   : > { %v5067_v9 = vadd.f32 %v5066_v17, %v5017_v5  ;;  %v5345_v2 = vadd.f32 %v5344_v14, %v5295_v8  ;;  %v13612_v17 = vld [vmem:[#allocation44_spill] sm:$0xff]  ;;  %v10131_v8 = vld [vmem:[%s11740_s17 + $0x380] sm:$0xff] }
 0x355   : > { %5553 = vmatmul.bf16.gmra.mxu2 %v13610_v24  ;;  %5806 = vmatmul.bf16.gmra.mxu0 %v12180_v4  ;;  %v12443_v4 = vld [vmem:[%s11738_s2 + $0x20] sm:$0xff] }
 0x356   : > { %v5096_v42 = vadd.f32 %v5067_v9, %v12292_v36  ;;  %5855 = vmatmul.bf16.gmra.mxu1 %v12186_v33  ;;  %v10148_v33 = vld [vmem:[%s11740_s17 + $0x408] sm:$0xff]  ;;  %3654 = vst [vmem:[#allocation3 + $0xe0] sm:$0xff] %v12443_v4  ;;  %v13613_v9 = vld [vmem:[#allocation45_spill] sm:$0xff]  ;;  %v10139_v14 = vld [vmem:[%s11740_s17 + $0x3c0] sm:$0xff]  ;;  %6060 = vmatpush.bf16.msra.mxu2 %v10131_v8 }
 0x357   : > { %6318 = vmatpush.bf16.msra.mxu0 %v10148_v33  ;;  %6109 = vmatpush.bf16.msra.mxu3 %v10139_v14 }
 0x358   : > { %5602 = vmatmul.bf16.gmra.mxu3 %v13611_v58  ;;  %v12437_v13 = vadd.f32 %v5342_v47, %v5096_v42  ;;  %v5020_v46 = vpop.f32.mrf.mxu2 }
 0x35a   : > { %v5297_v25 = vpop.f32.mrf.mxu0 }
 0x35b   : > { %v5069_v36 = vpop.f32.mrf.mxu3  ;;  %v5346_v56 = vpop.f32.mrf.mxu1 }
 0x35c   : > { %v5070_v18 = vadd.f32 %v5069_v36, %v5020_v46  ;;  %v5347_v60 = vadd.f32 %v5346_v56, %v5297_v25  ;;  %v10155_v25 = vld [vmem:[%s11740_s17 + $0x440] sm:$0xff] }
 0x35d   : > { %6368 = vmatpush.bf16.msra.mxu1 %v10155_v25  ;;  %v10018_v25 = vld [vmem:[#allocation3 + $0xdc] sm:$0xf0] }
 0x35e   : > { %v5097_v48 = vadd.f32 %v5070_v18, %v12309_v53 }
 0x360   : > { %v12450_v63 = vadd.f32 %v5345_v2, %v5097_v48  ;;  %v5022_v15 = vpop.f32.mrf.mxu2 }
 0x362   : > { %v5300_v26 = vpop.f32.mrf.mxu0 }
 0x363   : > { %v5071_v43 = vpop.f32.mrf.mxu3  ;;  %v5349_v59 = vpop.f32.mrf.mxu1 }
 0x364   : > { %v5072_v47 = vadd.f32 %v5071_v43, %v5022_v15  ;;  %v5350_v5 = vadd.f32 %v5349_v59, %v5300_v26  ;;  %v13614_v26 = vld [vmem:[#allocation46_spill] sm:$0xff]  ;;  %v9242_v59 = vrot.slane %v12301_v52, 9 }
 0x365   : > { %5558 = vmatmul.bf16.gmra.mxu2 %v13612_v17  ;;  %5811 = vmatmul.bf16.gmra.mxu0 %v12211_v62  ;;  %v10147_v62 = vld [vmem:[%s11740_s17 + $0x400] sm:$0xff] }
 0x366   : > { %v5098_v53 = vadd.f32 %v5072_v47, %v12314_v19  ;;  %5860 = vmatmul.bf16.gmra.mxu1 %v12217_v0  ;;  %6319 = vmatpush.bf16.msra.mxu0 %v10147_v62 }
 0x368   : > { %5607 = vmatmul.bf16.gmra.mxu3 %v13613_v9  ;;  %v12459_v42 = vadd.f32 %v5347_v60, %v5098_v53  ;;  %v5025_v2 = vpop.f32.mrf.mxu2  ;;  %v5385_v53 = vrot.slane %v5383_v30, 4 }
 0x36a   : > { %v5302_v6 = vpop.f32.mrf.mxu0 }
 0x36b   : > { %v5074_v39 = vpop.f32.mrf.mxu3  ;;  %v5351_v46 = vpop.f32.mrf.mxu1 }
 0x36c   : > { %v5075_v19 = vadd.f32 %v5074_v39, %v5025_v2  ;;  %v5352_v18 = vadd.f32 %v5351_v46, %v5302_v6 }
 0x36e   : > { %v5099_v36 = vadd.f32 %v5075_v19, %v12327_v57  ;;  %v13615_v57 = vld [vmem:[#allocation47_spill] sm:$0xff]  ;;  %v5384_v19 = vsel %vm11998_vm5, %v9242_v59, %v5383_v30 }
 0x36f   : > { %v5421_v52 = vunpack.c.l.b16 %v5384_v19  ;;  %v5422_v62 = vunpack.c.h.b16 %v5384_v19 }
 0x370   : > { %v12464_v56 = vadd.f32 %v5350_v5, %v5099_v36  ;;  %v5027_v0 = vpop.f32.mrf.mxu2  ;;  %v5386_v5 = vrot.slane %v12331_v10, 5 }
 0x372   : > { %v5305_v33 = vpop.f32.mrf.mxu0 }
 0x373   : > { %v5076_v48 = vpop.f32.mrf.mxu3  ;;  %v5354_v15 = vpop.f32.mrf.mxu1 }
 0x374   : > { %v5077_v60 = vadd.f32 %v5076_v48, %v5027_v0  ;;  %v5355_v47 = vadd.f32 %v5354_v15, %v5305_v33  ;;  %v10017_v48 = vld [vmem:[#allocation3 + $0xdc] sm:$0xf] }
 0x375   : > { %5563 = vmatmul.bf16.gmra.mxu2 %v13614_v26  ;;  %5816 = vmatmul.bf16.gmra.mxu0 %v12353_v54  ;;  %v5387_v54 = vsel %vm11998_vm5, %v5385_v53, %v5386_v5 }
 0x376   : > { %v5100_v43 = vadd.f32 %v5077_v60, %v12335_v34  ;;  %5865 = vmatmul.bf16.gmra.mxu1 %v12357_v7  ;;  %v5423_v36 = vunpack.c.l.b16 %v5387_v54  ;;  %v5424_v10 = vunpack.c.h.b16 %v5387_v54  ;;  %v9375_v60 = vld [vmem:[#allocation3 + $0xe0] sm:$0xf0] }
 0x378   : > { %5612 = vmatmul.bf16.gmra.mxu3 %v13615_v57  ;;  %v12474_v8 = vadd.f32 %v5352_v18, %v5100_v43  ;;  %v5030_v27 = vpop.f32.mrf.mxu2  ;;  %v9373_v18 = vld [vmem:[#allocation3 + $0xd8] sm:$0xf]  ;;  %v12483_v30 = vpack.c.b16 %v5423_v36, %v5421_v52  ;;  %v12485_v5 = vpack.c.b16 %v5424_v10, %v5422_v62 }
 0x379   : > { %v9374_v43 = vor.u32 %v10018_v25, %v9373_v18 }
 0x37a   : > { %v5307_v34 = vpop.f32.mrf.mxu0 }
 0x37b   : > { %v5079_v14 = vpop.f32.mrf.mxu3  ;;  %v5356_v6 = vpop.f32.mrf.mxu1 }
 0x37c   : > { %v5080_v2 = vadd.f32 %v5079_v14, %v5030_v27  ;;  %v5357_v46 = vadd.f32 %v5356_v6, %v5307_v34 }
 0x37e   : > { %v5101_v7 = vadd.f32 %v5080_v2, %v12350_v40  ;;  %v9378_v40 = vor.u32 %v10017_v48, %v9375_v60 }
 0x380   : > { %v12481_v0 = vadd.f32 %v5355_v47, %v5101_v7  ;;  %v5032_v33 = vpop.f32.mrf.mxu2 }
 0x382   : > { %v5310_v53 = vpop.f32.mrf.mxu0 }
 0x383   : > { %v5081_v15 = vpop.f32.mrf.mxu3  ;;  %v5359_v27 = vpop.f32.mrf.mxu1 }
 0x384   : > { %v5082_v59 = vadd.f32 %v5081_v15, %v5032_v33  ;;  %v5360_v2 = vadd.f32 %v5359_v27, %v5310_v53 }
 0x385   : > { %5568 = vmatmul.bf16.gmra.mxu2 %v12483_v30  ;;  %5821 = vmatmul.bf16.gmra.mxu0 %v9374_v43 }
 0x386   : > { %v5102_v14 = vadd.f32 %v5082_v59, %v12361_v22  ;;  %5870 = vmatmul.bf16.gmra.mxu1 %v9378_v40 }
 0x388   : > { %5617 = vmatmul.bf16.gmra.mxu3 %v12485_v5  ;;  %v12490_v47 = vadd.f32 %v5357_v46, %v5102_v14  ;;  %v5035_v34 = vpop.f32.mrf.mxu2 }
 0x38a   : > { %v5312_v6 = vpop.f32.mrf.mxu0 }
 0x38b   : > { %v5084_v19 = vpop.f32.mrf.mxu3  ;;  %v5361_v7 = vpop.f32.mrf.mxu1 }
 0x38c   : > { %v5085_v54 = vadd.f32 %v5084_v19, %v5035_v34  ;;  %v5362_v36 = vadd.f32 %v5361_v7, %v5312_v6 }
 0x38e   : > { %v5103_v52 = vadd.f32 %v5085_v54, %v12372_v55 }
 0x390   : > { %v12493_v62 = vadd.f32 %v5360_v2, %v5103_v52  ;;  %v5037_v22 = vpop.f32.mrf.mxu2 }
 0x392   : > { %v5787_v25 = vpop.f32.mrf.mxu0 }
 0x393   : > { %v5086_v10 = vpop.f32.mrf.mxu3  ;;  %v5836_v48 = vpop.f32.mrf.mxu1 }
 0x394   : > { %v5087_v18 = vadd.f32 %v5086_v10, %v5037_v22  ;;  %v5837_v33 = vadd.f32 %v5836_v48, %v5787_v25  ;;  %v13617_v48 = vld [vmem:[#allocation31_spill] sm:$0xff] }
 0x395   : > { %6061 = vmatmul.bf16.vlgmr.msra.gmra.mxu2 %v11984_v49  ;;  %6320 = vmatmul.bf16.vlgmr.msra.gmra.mxu0 %v12076_v61 }
 0x396   : > { %v5104_v60 = vadd.f32 %v5087_v18, %v12375_v41  ;;  %6369 = vmatmul.bf16.vlgmr.msra.gmra.mxu1 %v12080_v1 }
 0x398   : > { %6110 = vmatmul.bf16.vlgmr.msra.gmra.mxu3 %v11986_v51  ;;  %v12500_v55 = vadd.f32 %v5362_v36, %v5104_v60  ;;  %v5534_v46 = vpop.f32.mrf.mxu2  ;;  %v13618_v60 = vld [vmem:[#allocation32_spill] sm:$0xff] }
 0x39a   : > { %v5789_v59 = vpop.f32.mrf.mxu0 }
 0x39b   : > { %v5583_v15 = vpop.f32.mrf.mxu3  ;;  %v5838_v53 = vpop.f32.mrf.mxu1 }
 0x39c   : > { %v5584_v43 = vadd.f32 %v5583_v15, %v5534_v46  ;;  %v5839_v27 = vadd.f32 %v5838_v53, %v5789_v59 }
 0x39e   : > { %v5623_v40 = vadd.f32 %v5584_v43, %v12386_v35 }
 0x3a0   : > { %v12503_v41 = vadd.f32 %v5837_v33, %v5623_v40  ;;  %v5536_v14 = vpop.f32.mrf.mxu2 }
 0x3a2   : > { %v5792_v61 = vpop.f32.mrf.mxu0 }
 0x3a3   : > { %v5585_v49 = vpop.f32.mrf.mxu3  ;;  %v5841_v34 = vpop.f32.mrf.mxu1 }
 0x3a4   : > { %v5586_v2 = vadd.f32 %v5585_v49, %v5536_v14  ;;  %v5842_v1 = vadd.f32 %v5841_v34, %v5792_v61  ;;  %v13619_v34 = vld [vmem:[#allocation33_spill] sm:$0xff] }
 0x3a5   : > { %6066 = vmatmul.bf16.gmra.mxu2 %v12027_v11  ;;  %6325 = vmatmul.bf16.gmra.mxu0 %v12099_v37 }
 0x3a6   : > { %v5624_v51 = vadd.f32 %v5586_v2, %v12395_v16  ;;  %6374 = vmatmul.bf16.gmra.mxu1 %v12103_v31 }
 0x3a8   : > { %6115 = vmatmul.bf16.gmra.mxu3 %v12029_v12  ;;  %v12510_v35 = vadd.f32 %v5839_v27, %v5624_v51  ;;  %v5539_v19 = vpop.f32.mrf.mxu2  ;;  %v13620_v51 = vld [vmem:[#allocation34_spill] sm:$0xff] }
 0x3aa   : > { %v5794_v7 = vpop.f32.mrf.mxu0 }
 0x3ab   : > { %v5588_v54 = vpop.f32.mrf.mxu3  ;;  %v5843_v52 = vpop.f32.mrf.mxu1 }
 0x3ac   : > { %v5589_v6 = vadd.f32 %v5588_v54, %v5539_v19  ;;  %v5844_v22 = vadd.f32 %v5843_v52, %v5794_v7 }
 0x3ae   : > { %v5625_v36 = vadd.f32 %v5589_v6, %v12400_v21 }
 0x3b0   : > { %v12513_v16 = vadd.f32 %v5842_v1, %v5625_v36  ;;  %v5541_v10 = vpop.f32.mrf.mxu2 }
 0x3b2   : > { %v5797_v37 = vpop.f32.mrf.mxu0 }
 0x3b3   : > { %v5590_v11 = vpop.f32.mrf.mxu3  ;;  %v5846_v25 = vpop.f32.mrf.mxu1 }
 0x3b4   : > { %v5591_v18 = vadd.f32 %v5590_v11, %v5541_v10  ;;  %v5847_v31 = vadd.f32 %v5846_v25, %v5797_v37  ;;  %v3648_v25 = vld [vmem:[%s11738_s2 + $0x28] sm:$0x11] }
 0x3b5   : > { %6071 = vmatmul.bf16.gmra.mxu2 %v13617_v48  ;;  %6330 = vmatmul.bf16.gmra.mxu0 %v13608_v29  ;;  %3655 = vst [vmem:[#allocation3 + $0xe8] sm:$0x11] %v3648_v25 }
 0x3b6   : > { %v5626_v12 = vadd.f32 %v5591_v18, %v12409_v28  ;;  %6379 = vmatmul.bf16.gmra.mxu1 %v13609_v20 }
 0x3b8   : > { %6120 = vmatmul.bf16.gmra.mxu3 %v13618_v60  ;;  %v12520_v21 = vadd.f32 %v5844_v22, %v5626_v12  ;;  %v5544_v33 = vpop.f32.mrf.mxu2  ;;  %v13621_v12 = vld [vmem:[#allocation35_spill] sm:$0xff] }
 0x3ba   : > { %v5799_v43 = vpop.f32.mrf.mxu0 }
 0x3bb   : > { %v5593_v46 = vpop.f32.mrf.mxu3  ;;  %v5848_v59 = vpop.f32.mrf.mxu1 }
 0x3bc   : > { %v5594_v15 = vadd.f32 %v5593_v46, %v5544_v33  ;;  %v5849_v40 = vadd.f32 %v5848_v59, %v5799_v43 }
 0x3be   : > { %v5627_v53 = vadd.f32 %v5594_v15, %v12414_v23 }
 0x3c0   : > { %v12523_v28 = vadd.f32 %v5847_v31, %v5627_v53  ;;  %v5546_v27 = vpop.f32.mrf.mxu2  ;;  %v13622_v31 = vld [vmem:[#allocation36_spill] sm:$0xff] }
 0x3c2   : > { %v5802_v29 = vpop.f32.mrf.mxu0 }
 0x3c3   : > { %v5595_v14 = vpop.f32.mrf.mxu3  ;;  %v5851_v2 = vpop.f32.mrf.mxu1 }
 0x3c4   : > { %v5596_v49 = vadd.f32 %v5595_v14, %v5546_v27  ;;  %v5852_v20 = vadd.f32 %v5851_v2, %v5802_v29  ;;  %v13623_v29 = vld [vmem:[#allocation38_spill] sm:$0xff]  ;;  %v13624_v2 = vld [vmem:[#allocation39_spill] sm:$0xff] }
 0x3c5   : > { %6076 = vmatmul.bf16.gmra.mxu2 %v13619_v34  ;;  %6335 = vmatmul.bf16.gmra.mxu0 %v13610_v24  ;;  %v5893_v34 = vshrl.u32 %v12440_v38, 16 }
 0x3c6   : > { %v5628_v61 = vadd.f32 %v5596_v49, %v12423_v32  ;;  %6384 = vmatmul.bf16.gmra.mxu1 %v13611_v58 }
 0x3c8   : > { %6125 = vmatmul.bf16.gmra.mxu3 %v13620_v51  ;;  %v12530_v23 = vadd.f32 %v5849_v40, %v5628_v61  ;;  %v5549_v1 = vpop.f32.mrf.mxu2  ;;  %v5896_v51 = vshll.u32 %v12440_v38, 16 }
 0x3ca   : > { %v5804_v6 = vpop.f32.mrf.mxu0 }
 0x3cb   : > { %v5598_v19 = vpop.f32.mrf.mxu3  ;;  %v5853_v7 = vpop.f32.mrf.mxu1 }
 0x3cc   : > { %v5599_v54 = vadd.f32 %v5598_v19, %v5549_v1  ;;  %v5854_v32 = vadd.f32 %v5853_v7, %v5804_v6  ;;  %v5902_v1 = vshll.u32 %v12443_v4, 16 }
 0x3ce   : > { %v5629_v52 = vadd.f32 %v5599_v54, %v12428_v50 }
 0x3d0   : > { %v12533_v36 = vadd.f32 %v5852_v20, %v5629_v52  ;;  %v5551_v22 = vpop.f32.mrf.mxu2  ;;  %v5895_v52 = vrot.slane %v5893_v34, 4 }
 0x3d2   : > { %v5807_v11 = vpop.f32.mrf.mxu0 }
 0x3d3   : > { %v5600_v10 = vpop.f32.mrf.mxu3  ;;  %v5856_v18 = vpop.f32.mrf.mxu1 }
 0x3d4   : > { %v5601_v24 = vadd.f32 %v5600_v10, %v5551_v22  ;;  %v5857_v37 = vadd.f32 %v5856_v18, %v5807_v11  ;;  %v3685_v10 = vld [vmem:[#allocation3 + $0xe8] sm:$0x11] }
 0x3d5   : > { %6081 = vmatmul.bf16.gmra.mxu2 %v13621_v12  ;;  %6340 = vmatmul.bf16.gmra.mxu0 %v13612_v17  ;;  %v5912_v25 = vshll.u32 %v3685_v10, 16 }
 0x3d6   : > { %v5630_v58 = vadd.f32 %v5601_v24, %v12437_v13  ;;  %6389 = vmatmul.bf16.gmra.mxu1 %v13613_v9 }
 0x3d8   : > { %6130 = vmatmul.bf16.gmra.mxu3 %v13622_v31  ;;  %v12541_v50 = vadd.f32 %v5854_v32, %v5630_v58  ;;  %v5554_v48 = vpop.f32.mrf.mxu2  ;;  %v5904_v32 = vrot.slane %v5902_v1, 5 }
 0x3da   : > { %v5809_v46 = vpop.f32.mrf.mxu0 }
 0x3db   : > { %v5603_v60 = vpop.f32.mrf.mxu3  ;;  %v5858_v15 = vpop.f32.mrf.mxu1 }
 0x3dc   : > { %v5604_v33 = vadd.f32 %v5603_v60, %v5554_v48  ;;  %v5859_v43 = vadd.f32 %v5858_v15, %v5809_v46  ;;  %v6170_v48 = vrot.slane %v12443_v4, 5 }
 0x3de   : > { %v5631_v13 = vadd.f32 %v5604_v33, %v12450_v63 }
 0x3e0   : > { %v12544_v59 = vadd.f32 %v5857_v37, %v5631_v13  ;;  %v5556_v53 = vpop.f32.mrf.mxu2  ;;  %v5914_v13 = vrot.slane %v5912_v25, 5 }
 0x3e2   : > { %v5812_v27 = vpop.f32.mrf.mxu0 }
 0x3e3   : > { %v5605_v40 = vpop.f32.mrf.mxu3  ;;  %v5861_v14 = vpop.f32.mrf.mxu1 }
 0x3e4   : > { %v5606_v17 = vadd.f32 %v5605_v40, %v5556_v53  ;;  %v5862_v9 = vadd.f32 %v5861_v14, %v5812_v27  ;;  %v6172_v53 = vrot.slane %v6170_v48, 4  ;;  %v6173_v40 = vrot.slane %v3685_v10, 5 }
 0x3e5   : > { %6086 = vmatmul.bf16.gmra.mxu2 %v13623_v29  ;;  %6345 = vmatmul.bf16.gmra.mxu0 %v13614_v26 }
 0x3e6   : > { %v5632_v49 = vadd.f32 %v5606_v17, %v12459_v42  ;;  %6394 = vmatmul.bf16.gmra.mxu1 %v13615_v57  ;;  %v5906_v42 = vshrl.u32 %v12443_v4, 16  ;;  %v5898_v57 = vrot.slane %v5896_v51, 5 }
 0x3e8   : > { %6135 = vmatmul.bf16.gmra.mxu3 %v13624_v2  ;;  %v12551_v63 = vadd.f32 %v5859_v43, %v5632_v49  ;;  %v5559_v61 = vpop.f32.mrf.mxu2  ;;  %v5908_v22 = vrot.slane %v5906_v42, 4  ;;  %v5899_v58 = vor.u32 %v5898_v57, %v5895_v52  ;;  %v9539_v43 = vrot.slane %v12440_v38, 9 }
 0x3e9   : > { %v6174_v38 = vsel %vm11998_vm5, %v6172_v53, %v6173_v40 }
 0x3ea   : > { %v5814_v54 = vpop.f32.mrf.mxu0  ;;  %v5909_v37 = vor.u32 %v5908_v22, %v5904_v32  ;;  %v5900_v46 = vrot.slane %v5899_v58, 4  ;;  %v6210_v34 = vunpack.c.l.b16 %v6174_v38  ;;  %v6211_v42 = vunpack.c.h.b16 %v6174_v38 }
 0x3eb   : > { %v5608_v20 = vpop.f32.mrf.mxu3  ;;  %v5863_v6 = vpop.f32.mrf.mxu1 }
 0x3ec   : > { %v5609_v19 = vadd.f32 %v5608_v20, %v5559_v61  ;;  %v5864_v7 = vadd.f32 %v5863_v6, %v5814_v54  ;;  %v5910_v15 = vrot.slane %v5909_v37, 4 }
 0x3ee   : > { %v5633_v26 = vadd.f32 %v5609_v19, %v12464_v56  ;;  %v5915_v14 = vsel %vm11798_vm2, %v5910_v15, %v5914_v13 }
 0x3ef   : > { %v5951_v2 = vunpack.c.l.b16 %v5915_v14  ;;  %v5952_v51 = vunpack.c.h.b16 %v5915_v14 }
 0x3f0   : > { %v12558_v24 = vadd.f32 %v5862_v9, %v5633_v26  ;;  %v5561_v11 = vpop.f32.mrf.mxu2 }
 0x3f2   : > { %v5817_v31 = vpop.f32.mrf.mxu0 }
 0x3f3   : > { %v5610_v18 = vpop.f32.mrf.mxu3  ;;  %v5866_v60 = vpop.f32.mrf.mxu1 }
 0x3f4   : > { %v5611_v12 = vadd.f32 %v5610_v18, %v5561_v11  ;;  %v5867_v33 = vadd.f32 %v5866_v60, %v5817_v31 }
 0x3f5   : > { %6091 = vmatmul.bf16.gmra.mxu2 %v12355_v3  ;;  %6350 = vmatmul.bf16.gmra.mxu0 %v12483_v30  ;;  %v5905_v3 = vsel %vm11798_vm2, %v5900_v46, %v5904_v32 }
 0x3f6   : > { %v5634_v56 = vadd.f32 %v5611_v12, %v12474_v8  ;;  %6399 = vmatmul.bf16.gmra.mxu1 %v12485_v5  ;;  %v5949_v29 = vunpack.c.l.b16 %v5905_v3  ;;  %v5950_v61 = vunpack.c.h.b16 %v5905_v3 }
 0x3f8   : > { %6140 = vmatmul.bf16.gmra.mxu3 %v12359_v45  ;;  %v12567_v4 = vadd.f32 %v5864_v7, %v5634_v56  ;;  %v5564_v17 = vpop.f32.mrf.mxu2  ;;  %v6171_v45 = vsel %vm11998_vm5, %v9539_v43, %v6170_v48  ;;  %v5953_v6 = vpack.c.b16 %v5951_v2, %v5949_v29  ;;  %v5954_v52 = vpack.c.b16 %v5952_v51, %v5950_v61  ;;  %v6427_v2 = vld [vmem:[#allocation2] sm:$0xff] }
 0x3f9   : > { %v6208_v20 = vunpack.c.l.b16 %v6171_v45  ;;  %v6209_v1 = vunpack.c.h.b16 %v6171_v45 }
 0x3fa   : > { %v5819_v30 = vpop.f32.mrf.mxu0 }
 0x3fb   : > { %v5613_v8 = vpop.f32.mrf.mxu3  ;;  %v5868_v5 = vpop.f32.mrf.mxu1  ;;  %v6212_v26 = vpack.c.b16 %v6210_v34, %v6208_v20  ;;  %v6213_v57 = vpack.c.b16 %v6211_v42, %v6209_v1 }
 0x3fc   : > { %v5614_v27 = vadd.f32 %v5613_v8, %v5564_v17  ;;  %v5869_v9 = vadd.f32 %v5868_v5, %v5819_v30 }
 0x3fe   : > { %v5635_v49 = vadd.f32 %v5614_v27, %v12481_v0  ;;  %v6426_v27 = vld [vmem:[#allocation2 + $0x30] sm:$0xff] }
 0x400   : > { %v12578_v44 = vadd.f32 %v5867_v33, %v5635_v49  ;;  %v5566_v19 = vpop.f32.mrf.mxu2 }
 0x402   : > { %v5822_v7 = vpop.f32.mrf.mxu0 }
 0x403   : > { %v5615_v54 = vpop.f32.mrf.mxu3  ;;  %v5871_v0 = vpop.f32.mrf.mxu1 }
 0x404   : > { %v5616_v39 = vadd.f32 %v5615_v54, %v5566_v19  ;;  %v5872_v22 = vadd.f32 %v5871_v0, %v5822_v7 }
 0x405   : > { %6096 = vmatmul.bf16.gmra.mxu2 %v5953_v6  ;;  %6355 = vmatmul.bf16.gmra.mxu0 %v6212_v26  ;;  %v6428_v6 = vld [vmem:[#allocation2 + $0x58] sm:$0xff] }
 0x406   : > { %v5636_v32 = vadd.f32 %v5616_v39, %v12490_v47  ;;  %6404 = vmatmul.bf16.gmra.mxu1 %v6213_v57 }
 0x408   : > { %6145 = vmatmul.bf16.gmra.mxu3 %v5954_v52  ;;  %v12581_v10 = vadd.f32 %v5869_v9, %v5636_v32  ;;  %v5569_v11 = vpop.f32.mrf.mxu2 }
 0x40a   : > { %v5824_v37 = vpop.f32.mrf.mxu0 }
 0x40b   : > { %v5618_v18 = vpop.f32.mrf.mxu3  ;;  %v5873_v25 = vpop.f32.mrf.mxu1 }
 0x40c   : > { %v5619_v58 = vadd.f32 %v5618_v18, %v5569_v11  ;;  %v5874_v31 = vadd.f32 %v5873_v25, %v5824_v37  ;;  %v6429_v11 = vld [vmem:[#allocation2 + $0x18] sm:$0xff] }
 0x40e   : > { %v5637_v12 = vadd.f32 %v5619_v58, %v12493_v62 }
 0x410   : > { %v12584_v48 = vadd.f32 %v5872_v22, %v5637_v12  ;;  %v5571_v60 = vpop.f32.mrf.mxu2 }
 0x412   : > { %v6321_v33 = vpop.f32.mrf.mxu0 }
 0x413   : > { %v5620_v56 = vpop.f32.mrf.mxu3  ;;  %v6370_v46 = vpop.f32.mrf.mxu1 }
 0x414   : > { %v5621_v47 = vadd.f32 %v5620_v56, %v5571_v60  ;;  %v6371_v40 = vadd.f32 %v6370_v46, %v6321_v33 }
 0x416   : > { %v5638_v15 = vadd.f32 %v5621_v47, %v12500_v55  ;;  %v6430_v47 = vld [vmem:[#allocation2 + $0x50] sm:$0xff] }
 0x418   : > { %v12587_v13 = vadd.f32 %v5874_v31, %v5638_v15  ;;  %v6062_v43 = vpop.f32.mrf.mxu2 }
 0x41a   : > { %v6323_v8 = vpop.f32.mrf.mxu0 }
 0x41b   : > { %v6111_v53 = vpop.f32.mrf.mxu3  ;;  %v6372_v3 = vpop.f32.mrf.mxu1 }
 0x41c   : > { %v6112_v17 = vadd.f32 %v6111_v53, %v6062_v43  ;;  %v6373_v55 = vadd.f32 %v6372_v3, %v6323_v8  ;;  %v6431_v3 = vld [vmem:[#allocation2 + $0x68] sm:$0xff] }
 0x41e   : > { %v6151_v62 = vadd.f32 %v6112_v17, %v12503_v41 }
 0x420   : > { %v6410_v30 = vadd.f32 %v6371_v40, %v6151_v62  ;;  %v6064_v45 = vpop.f32.mrf.mxu2 }
 0x422   : > { %v6442_v14 = vadd.f32 %v6426_v27, %v6410_v30  ;;  %v6326_v49 = vpop.f32.mrf.mxu0 }
 0x423   : > { %v6113_v38 = vpop.f32.mrf.mxu3  ;;  %v6375_v9 = vpop.f32.mrf.mxu1 }
 0x424   : > { %6458 = vst [vmem:[#allocation2 + $0x30] sm:$0xff] %v6442_v14  ;;  %v6114_v5 = vadd.f32 %v6113_v38, %v6064_v45  ;;  %v6376_v1 = vadd.f32 %v6375_v9, %v6326_v49  ;;  %v6432_v9 = vld [vmem:[#allocation2 + $0x8] sm:$0xff] }
 0x426   : > { %v6152_v29 = vadd.f32 %v6114_v5, %v12510_v35 }
 0x428   : > { %v6411_v61 = vadd.f32 %v6373_v55, %v6152_v29  ;;  %v6067_v34 = vpop.f32.mrf.mxu2 }
 0x42a   : > { %v6443_v20 = vadd.f32 %v6427_v2, %v6411_v61  ;;  %v6328_v42 = vpop.f32.mrf.mxu0 }
 0x42b   : > { %v6116_v51 = vpop.f32.mrf.mxu3  ;;  %v6377_v19 = vpop.f32.mrf.mxu1 }
 0x42c   : > { %6459 = vst [vmem:[#allocation2] sm:$0xff] %v6443_v20  ;;  %v6117_v41 = vadd.f32 %v6116_v51, %v6067_v34  ;;  %v6378_v32 = vadd.f32 %v6377_v19, %v6328_v42 }
 0x42e   : > { %v6153_v54 = vadd.f32 %v6117_v41, %v12513_v16  ;;  %v6433_v41 = vld [vmem:[#allocation2 + $0x48] sm:$0xff] }
 0x430   : > { %v6412_v26 = vadd.f32 %v6376_v1, %v6153_v54  ;;  %v6069_v7 = vpop.f32.mrf.mxu2 }
 0x432   : > { %v6444_v39 = vadd.f32 %v6428_v6, %v6412_v26  ;;  %v6331_v35 = vpop.f32.mrf.mxu0 }
 0x433   : > { %v6118_v52 = vpop.f32.mrf.mxu3  ;;  %v6380_v0 = vpop.f32.mrf.mxu1 }
 0x434   : > { %6460 = vst [vmem:[#allocation2 + $0x58] sm:$0xff] %v6444_v39  ;;  %v6119_v57 = vadd.f32 %v6118_v52, %v6069_v7  ;;  %v6381_v12 = vadd.f32 %v6380_v0, %v6331_v35 }
 0x436   : > { %v6154_v22 = vadd.f32 %v6119_v57, %v12520_v21  ;;  %v6434_v57 = vld [vmem:[#allocation2 + $0x40] sm:$0xff] }
 0x438   : > { %v6413_v18 = vadd.f32 %v6378_v32, %v6154_v22  ;;  %v6072_v37 = vpop.f32.mrf.mxu2 }
 0x43a   : > { %v6445_v58 = vadd.f32 %v6429_v11, %v6413_v18  ;;  %v6333_v31 = vpop.f32.mrf.mxu0 }
 0x43b   : > { %v6121_v25 = vpop.f32.mrf.mxu3  ;;  %v6382_v60 = vpop.f32.mrf.mxu1 }
 0x43c   : > { %6461 = vst [vmem:[#allocation2 + $0x18] sm:$0xff] %v6445_v58  ;;  %v6122_v16 = vadd.f32 %v6121_v25, %v6072_v37  ;;  %v6383_v17 = vadd.f32 %v6382_v60, %v6333_v31  ;;  %v6435_v25 = vld [vmem:[#allocation2 + $0x20] sm:$0xff] }
 0x43e   : > { %v6155_v56 = vadd.f32 %v6122_v16, %v12523_v28 }
 0x440   : > { %v6414_v33 = vadd.f32 %v6381_v12, %v6155_v56  ;;  %v6074_v15 = vpop.f32.mrf.mxu2 }
 0x442   : > { %v6446_v46 = vadd.f32 %v6430_v47, %v6414_v33  ;;  %v6336_v21 = vpop.f32.mrf.mxu0 }
 0x443   : > { %v6123_v43 = vpop.f32.mrf.mxu3  ;;  %v6385_v40 = vpop.f32.mrf.mxu1 }
 0x444   : > { %6462 = vst [vmem:[#allocation2 + $0x50] sm:$0xff] %v6446_v46  ;;  %v6124_v53 = vadd.f32 %v6123_v43, %v6074_v15  ;;  %v6386_v45 = vadd.f32 %v6385_v40, %v6336_v21  ;;  %v6436_v15 = vld [vmem:[#allocation2 + $0x10] sm:$0xff] }
 0x446   : > { %v6156_v8 = vadd.f32 %v6124_v53, %v12530_v23 }
 0x448   : > { %v6415_v62 = vadd.f32 %v6383_v17, %v6156_v8  ;;  %v6077_v30 = vpop.f32.mrf.mxu2 }
 0x44a   : > { %v6447_v27 = vadd.f32 %v6431_v3, %v6415_v62  ;;  %v6338_v38 = vpop.f32.mrf.mxu0 }
 0x44b   : > { %v6126_v14 = vpop.f32.mrf.mxu3  ;;  %v6387_v5 = vpop.f32.mrf.mxu1 }
 0x44c   : > { %6463 = vst [vmem:[#allocation2 + $0x68] sm:$0xff] %v6447_v27  ;;  %v6127_v28 = vadd.f32 %v6126_v14, %v6077_v30  ;;  %v6388_v51 = vadd.f32 %v6387_v5, %v6338_v38  ;;  %v6437_v27 = vld [vmem:[#allocation2 + $0x38] sm:$0xff] }
 0x44e   : > { %v6157_v49 = vadd.f32 %v6127_v28, %v12533_v36 }
 0x450   : > { %v6416_v55 = vadd.f32 %v6386_v45, %v6157_v49  ;;  %v6079_v2 = vpop.f32.mrf.mxu2 }
 0x452   : > { %v6448_v29 = vadd.f32 %v6432_v9, %v6416_v55  ;;  %v6341_v23 = vpop.f32.mrf.mxu0  ;;  %v6438_v9 = vld [vmem:[#allocation2 + $0x60] sm:$0xff] }
 0x453   : > { %v6128_v61 = vpop.f32.mrf.mxu3  ;;  %v6390_v34 = vpop.f32.mrf.mxu1 }
 0x454   : > { %6464 = vst [vmem:[#allocation2 + $0x8] sm:$0xff] %v6448_v29  ;;  %v6129_v20 = vadd.f32 %v6128_v61, %v6079_v2  ;;  %v6391_v26 = vadd.f32 %v6390_v34, %v6341_v23 }
 0x456   : > { %v6158_v1 = vadd.f32 %v6129_v20, %v12541_v50 }
 0x458   : > { %v6417_v42 = vadd.f32 %v6388_v51, %v6158_v1  ;;  %v6082_v54 = vpop.f32.mrf.mxu2  ;;  %v6439_v51 = vld [vmem:[#allocation2 + $0x70] sm:$0xff] }
 0x45a   : > { %v6449_v19 = vadd.f32 %v6433_v41, %v6417_v42  ;;  %v6343_v39 = vpop.f32.mrf.mxu0 }
 0x45b   : > { %v6131_v6 = vpop.f32.mrf.mxu3  ;;  %v6392_v7 = vpop.f32.mrf.mxu1 }
 0x45c   : > { %6465 = vst [vmem:[#allocation2 + $0x48] sm:$0xff] %v6449_v19  ;;  %v6132_v36 = vadd.f32 %v6131_v6, %v6082_v54  ;;  %v6393_v58 = vadd.f32 %v6392_v7, %v6343_v39  ;;  %v6440_v39 = vld [vmem:[#allocation2 + $0x78] sm:$0xff] }
 0x45e   : > { %v6159_v52 = vadd.f32 %v6132_v36, %v12544_v59 }
 0x460   : > { %v6418_v35 = vadd.f32 %v6391_v26, %v6159_v52  ;;  %v6084_v32 = vpop.f32.mrf.mxu2 }
 0x462   : > { %v6450_v0 = vadd.f32 %v6434_v57, %v6418_v35  ;;  %v6346_v50 = vpop.f32.mrf.mxu0 }
 0x463   : > { %v6133_v22 = vpop.f32.mrf.mxu3  ;;  %v6395_v18 = vpop.f32.mrf.mxu1 }
 0x464   : > { %6466 = vst [vmem:[#allocation2 + $0x40] sm:$0xff] %v6450_v0  ;;  %v6134_v11 = vadd.f32 %v6133_v22, %v6084_v32  ;;  %v6396_v56 = vadd.f32 %v6395_v18, %v6346_v50  ;;  %v6441_v50 = vld [vmem:[#allocation2 + $0x28] sm:$0xff] }
 0x466   : > { %v6160_v37 = vadd.f32 %v6134_v11, %v12551_v63 }
 0x468   : > { %v6419_v12 = vadd.f32 %v6393_v58, %v6160_v37  ;;  %v6087_v31 = vpop.f32.mrf.mxu2 }
 0x46a   : > { %v6451_v16 = vadd.f32 %v6435_v25, %v6419_v12  ;;  %v6348_v47 = vpop.f32.mrf.mxu0 }
 0x46b   : > { %v6136_v60 = vpop.f32.mrf.mxu3  ;;  %v6397_v33 = vpop.f32.mrf.mxu1 }
 0x46c   : > { %6467 = vst [vmem:[#allocation2 + $0x20] sm:$0xff] %v6451_v16  ;;  %v6137_v59 = vadd.f32 %v6136_v60, %v6087_v31  ;;  %v6398_v3 = vadd.f32 %v6397_v33, %v6348_v47 }
 0x46e   : > { %v6161_v46 = vadd.f32 %v6137_v59, %v12558_v24 }
 0x470   : > { %v6420_v43 = vadd.f32 %v6396_v56, %v6161_v46  ;;  %v6089_v21 = vpop.f32.mrf.mxu2 }
 0x472   : > { %v6452_v53 = vadd.f32 %v6436_v15, %v6420_v43  ;;  %v6351_v63 = vpop.f32.mrf.mxu0 }
 0x473   : > { %v6138_v40 = vpop.f32.mrf.mxu3  ;;  %v6400_v8 = vpop.f32.mrf.mxu1 }
 0x474   : > { %6468 = vst [vmem:[#allocation2 + $0x10] sm:$0xff] %v6452_v53  ;;  %v6139_v17 = vadd.f32 %v6138_v40, %v6089_v21  ;;  %v6401_v38 = vadd.f32 %v6400_v8, %v6351_v63 }
 0x476   : > { %v6162_v62 = vadd.f32 %v6139_v17, %v12567_v4 }
 0x478   : > { %v6421_v30 = vadd.f32 %v6398_v3, %v6162_v62  ;;  %v6092_v45 = vpop.f32.mrf.mxu2 }
 0x47a   : > { %v6453_v14 = vadd.f32 %v6437_v27, %v6421_v30  ;;  %v6353_v49 = vpop.f32.mrf.mxu0 }
 0x47b   : > { %v6141_v28 = vpop.f32.mrf.mxu3  ;;  %v6402_v55 = vpop.f32.mrf.mxu1 }
 0x47c   : > { %6469 = vst [vmem:[#allocation2 + $0x38] sm:$0xff] %v6453_v14  ;;  %v6142_v24 = vadd.f32 %v6141_v28, %v6092_v45  ;;  %v6403_v4 = vadd.f32 %v6402_v55, %v6353_v49 }
 0x47e   : > { %v6163_v5 = vadd.f32 %v6142_v24, %v12578_v44 }
 0x480   : > { %v6422_v29 = vadd.f32 %v6401_v38, %v6163_v5  ;;  %v6094_v61 = vpop.f32.mrf.mxu2 }
 0x482   : > { %v6454_v2 = vadd.f32 %v6438_v9, %v6422_v29  ;;  %v6356_v41 = vpop.f32.mrf.mxu0 }
 0x483   : > { %v6143_v20 = vpop.f32.mrf.mxu3  ;;  %v6405_v42 = vpop.f32.mrf.mxu1 }
 0x484   : > { %6470 = vst [vmem:[#allocation2 + $0x60] sm:$0xff] %v6454_v2  ;;  %v6144_v23 = vadd.f32 %v6143_v20, %v6094_v61  ;;  %v6406_v44 = vadd.f32 %v6405_v42, %v6356_v41 }
 0x486   : > { %v6164_v34 = vadd.f32 %v6144_v23, %v12581_v10 }
 0x488   : > { %v6423_v1 = vadd.f32 %v6403_v4, %v6164_v34  ;;  %v6097_v54 = vpop.f32.mrf.mxu2 }
 0x48a   : > { %v6455_v19 = vadd.f32 %v6439_v51, %v6423_v1  ;;  %v6358_v57 = vpop.f32.mrf.mxu0 }
 0x48b   : > { %v6146_v6 = vpop.f32.mrf.mxu3  ;;  %v6407_v0 = vpop.f32.mrf.mxu1 }
 0x48c   : > { %6471 = vst [vmem:[#allocation2 + $0x70] sm:$0xff] %v6455_v19  ;;  %v6147_v26 = vadd.f32 %v6146_v6, %v6097_v54  ;;  %v6408_v22 = vadd.f32 %v6407_v0, %v6358_v57 }
 0x48e   : > { %v6165_v36 = vadd.f32 %v6147_v26, %v12584_v48 }
 0x490   : > { %v6424_v7 = vadd.f32 %v6406_v44, %v6165_v36  ;;  %v6099_v35 = vpop.f32.mrf.mxu2 }
 0x492   : > { %v6456_v52 = vadd.f32 %v6440_v39, %v6424_v7 }
 0x493   : > { %v6148_v32 = vpop.f32.mrf.mxu3 }
 0x494   : > { %6472 = vst [vmem:[#allocation2 + $0x78] sm:$0xff] %v6456_v52  ;;  %v6149_v10 = vadd.f32 %v6148_v32, %v6099_v35 }
 0x496   : > { %v6166_v11 = vadd.f32 %v6149_v10, %v12587_v13 }
 0x498   : > { %v6425_v18 = vadd.f32 %v6408_v22, %v6166_v11 }
 0x49a   : > { %v6457_v58 = vadd.f32 %v6441_v50, %v6425_v18 }
 0x49c   : > { %6473 = vst [vmem:[#allocation2 + $0x28] sm:$0xff] %v6457_v58 }
 0x49d PF: > { %s13625_s2 = sld [smem:[#allocation17_spill]] }
 0x4a3   : > { %p6474_p12 = scmp.ge.s32.totalorder %s13625_s2, 2  ;;  %p6475_p13 = scmp.lt.s32.totalorder %s13625_s2, 3 }
 0x4a5   : > { %p6476_p4 = pnand %p6475_p13, %p6474_p12 }
 0x4a6   : > { %s13626_s26 = sld [smem:[#allocation53_spill]] (!%p6476_p4) }
 0x4a7   : > { %6479 = sbr.rel (%p6476_p4) target bundleno = 1654 (0x676), region = 216 }
 0x4ac   : > { %v10180_v48 = vld [vmem:[%s13626_s26 + $0x38] sm:$0xff]  ;;  %vm6504_vm6 = vcmask 519168   ;;  %vm6507_vm7 = vcmask 516096   ;;  %v10179_v25 = vld [vmem:[%s13626_s26 + $0x30] sm:$0xff]  ;;  %v6488_v12 = vld [vmem:[%s11729_s9 + $0x20] sm:$0x1] }
 0x4ad   : > { %v6486_v13 = vld [vmem:[%s11729_s9 + $0x18] sm:$0xf]  ;;  %v6487_v37 = vld [vmem:[%s11729_s9 + $0x1c] sm:$0xf]  ;;  %10273 = vmatpush.bf16.msra.mxu1 %v10180_v48  ;;  %10274 = vmatpush.bf16.msra.mxu2 %v10180_v48  ;;  %v6492_v16 = vld [vmem:[%s11729_s9 + $0x30] sm:$0xf] }
 0x4ae   : > { %6512 = vst.msk [vmem:[#allocation3 + $0x30] sm:$0xf] %vm6504_vm6, %v6486_v13  ;;  %10275 = vmatpush.bf16.msra.mxu3 %v10180_v48  ;;  %6862 = vmatpush.bf16.msra.mxu0 %v10180_v48  ;;  %v6493_v31 = vld [vmem:[%s11729_s9 + $0x34] sm:$0xf]  ;;  %v6494_v60 = vld [vmem:[%s11729_s9 + $0x38] sm:$0x1] }
 0x4af   : > { %6513 = vst.msk [vmem:[#allocation3 + $0x38] sm:$0xf] %vm6504_vm6, %v6487_v37  ;;  %v6498_v56 = vld [vmem:[%s11729_s9 + $0x48] sm:$0xf]  ;;  %v6499_v47 = vld [vmem:[%s11729_s9 + $0x4c] sm:$0xf] }
 0x4b0   : > { %6514 = vst.msk [vmem:[#allocation3 + $0x40] sm:$0x1] %vm6507_vm7, %v6488_v12  ;;  %v10178_v59 = vld [vmem:[%s13626_s26 + $0x28] sm:$0xff]  ;;  %v6500_v33 = vld [vmem:[%s11729_s9 + $0x50] sm:$0x1]  ;;  %v10177_v46 = vld [vmem:[%s13626_s26 + $0x20] sm:$0xff] }
 0x4b1   : > { %6518 = vst.msk [vmem:[#allocation3 + $0x60] sm:$0xf] %vm6504_vm6, %v6492_v16  ;;  %10276 = vmatpush.bf16.msra.mxu1 %v10179_v25  ;;  %10277 = vmatpush.bf16.msra.mxu2 %v10179_v25  ;;  %vm6581_vm8 = vsmask.f32 3328  ;;  %v6480_v15 = vld [vmem:[%s11729_s9] sm:$0xf] }
 0x4b2   : > { %6519 = vst.msk [vmem:[#allocation3 + $0x68] sm:$0xf] %vm6504_vm6, %v6493_v31  ;;  %10278 = vmatpush.bf16.msra.mxu3 %v10179_v25  ;;  %6863 = vmatpush.bf16.msra.mxu0 %v10179_v25  ;;  %vm6582_vm9 = vsmask.f32 7440  ;;  %v10184_v17 = vld [vmem:[%s13626_s26 + $0x58] sm:$0xff]  ;;  %vm6833_vm10 = vcmask 523264  }
 0x4b3   : > { %6520 = vst.msk [vmem:[#allocation3 + $0x70] sm:$0x1] %vm6507_vm7, %v6494_v60  ;;  %v10188_v63 = vld [vmem:[%s13626_s26 + $0x78] sm:$0xff]  ;;  %v6481_v29 = vld [vmem:[%s11729_s9 + $0x4] sm:$0xf]  ;;  %v10183_v51 = vld [vmem:[%s13626_s26 + $0x50] sm:$0xff] }
 0x4b4   : > { %6524 = vst.msk [vmem:[#allocation3 + $0x90] sm:$0xf] %vm6504_vm6, %v6498_v56  ;;  %v10176_v27 = vld [vmem:[%s13626_s26 + $0x18] sm:$0xff]  ;;  %v6482_v34 = vld [vmem:[%s11729_s9 + $0x8] sm:$0x1]  ;;  %vm12679_vm11 = vmor %vm6581_vm8, %vm6582_vm9  ;;  %vm7052_vm12 = vcmask 1042432  }
 0x4b5   : > { %v12636_v43 = vld [vmem:[#allocation3 + $0x30] sm:$0xf]  ;;  %6525 = vst.msk [vmem:[#allocation3 + $0x98] sm:$0xf] %vm6504_vm6, %v6499_v47  ;;  %10279 = vmatpush.bf16.msra.mxu1 %v10178_v59  ;;  %10280 = vmatpush.bf16.msra.mxu2 %v10178_v59  ;;  %v10192_v38 = vld [vmem:[%s13626_s26 + $0x98] sm:$0xff]  ;;  %vm7053_vm13 = vcmask 1046532  }
 0x4b6   : > { %v12639_v53 = vld [vmem:[#allocation3 + $0x38] sm:$0xf]  ;;  %v6633_v21 = vshrl.u32 %v12636_v43, 16  ;;  %v6636_v40 = vshll.u32 %v12636_v43, 16  ;;  %6526 = vst.msk [vmem:[#allocation3 + $0xa0] sm:$0x1] %vm6507_vm7, %v6500_v33  ;;  %10281 = vmatpush.bf16.msra.mxu3 %v10178_v59  ;;  %6864 = vmatpush.bf16.msra.mxu0 %v10178_v59  ;;  %vm12870_vm14 = vmor %vm7052_vm12, %vm7053_vm13 }
 0x4b7   : > { %v12650_v8 = vld [vmem:[#allocation3 + $0x40] sm:$0x1]  ;;  %v6642_v3 = vshll.u32 %v12639_v53, 16  ;;  %v6646_v62 = vshrl.u32 %v12639_v53, 16  ;;  %6505 = vst.msk [vmem:[#allocation3] sm:$0xf] %vm6504_vm6, %v6480_v15 }
 0x4b8   : > { %v6635_v30 = vrot.slane %v6633_v21, 4  ;;  %v6638_v14 = vrot.slane %v6636_v40, 5  ;;  %v6652_v45 = vshll.u32 %v12650_v8, 16  ;;  %v12659_v28 = vld [vmem:[#allocation3 + $0x60] sm:$0xf]  ;;  %v10187_v44 = vld [vmem:[%s13626_s26 + $0x70] sm:$0xff] }
 0x4b9   : > { %v6644_v24 = vrot.slane %v6642_v3, 5  ;;  %v6648_v5 = vrot.slane %v6646_v62, 4  ;;  %v12664_v49 = vld [vmem:[#allocation3 + $0x68] sm:$0xf]  ;;  %v6681_v9 = vshrl.u32 %v12659_v28, 16  ;;  %v6684_v55 = vshll.u32 %v12659_v28, 16  ;;  %10282 = vmatpush.bf16.msra.mxu1 %v10177_v46  ;;  %10283 = vmatpush.bf16.msra.mxu2 %v10177_v46 }
 0x4ba   : > { %v6639_v2 = vor.u32 %v6638_v14, %v6635_v30  ;;  %v6654_v61 = vrot.slane %v6652_v45, 5  ;;  %v12669_v20 = vld [vmem:[#allocation3 + $0x70] sm:$0x1]  ;;  %v6690_v23 = vshll.u32 %v12664_v49, 16  ;;  %v6694_v4 = vshrl.u32 %v12664_v49, 16  ;;  %10284 = vmatpush.bf16.msra.mxu3 %v10177_v46  ;;  %6865 = vmatpush.bf16.msra.mxu0 %v10177_v46  ;;  %v10182_v45 = vld [vmem:[%s13626_s26 + $0x48] sm:$0xff] }
 0x4bb   : > { %v6649_v41 = vor.u32 %v6648_v5, %v6644_v24  ;;  %v6683_v42 = vrot.slane %v6681_v9, 4  ;;  %v6686_v19 = vrot.slane %v6684_v55, 5  ;;  %v6700_v54 = vshll.u32 %v12669_v20, 16  ;;  %v12684_v6 = vld [vmem:[#allocation3 + $0x90] sm:$0xf] }
 0x4bc   : > { %v6640_v26 = vrot.slane %v6639_v2, 4  ;;  %v6692_v36 = vrot.slane %v6690_v23, 5  ;;  %v6696_v39 = vrot.slane %v6694_v4, 4  ;;  %v12689_v7 = vld [vmem:[#allocation3 + $0x98] sm:$0xf]  ;;  %v6729_v52 = vshrl.u32 %v12684_v6, 16 }
 0x4bd   : > { %7196 = vmatpush.bf16.msrb.mxu2 %v10184_v17  ;;  %v6650_v57 = vrot.slane %v6649_v41, 4  ;;  %v6687_v35 = vor.u32 %v6686_v19, %v6683_v42  ;;  %v6702_v0 = vrot.slane %v6700_v54, 5  ;;  %v12692_v32 = vld [vmem:[#allocation3 + $0xa0] sm:$0x1]  ;;  %v6732_v10 = vshll.u32 %v12684_v6, 16  ;;  %6999 = vmatpush.bf16.msrb.mxu1 %v10176_v27  ;;  %v10175_v22 = vld [vmem:[%s13626_s26 + $0x10] sm:$0xff] }
 0x4be   : > { %7302 = vmatpush.bf16.msrb.mxu3 %v10188_v63  ;;  %7430 = vmatpush.bf16.msrb.mxu0 %v10192_v38  ;;  %v6645_v11 = vsel %vm12679_vm11, %v6640_v26, %v6644_v24  ;;  %v6697_v50 = vor.u32 %v6696_v39, %v6692_v36  ;;  %v6731_v18 = vrot.slane %v6729_v52, 4  ;;  %v6738_v58 = vshll.u32 %v12689_v7, 16  ;;  %6506 = vst.msk [vmem:[#allocation3 + $0x8] sm:$0xf] %vm6504_vm6, %v6481_v29  ;;  %v12702_v48 = vld [vmem:[#allocation3] sm:$0xf] }
 0x4bf   : > { %v6655_v13 = vsel %vm12679_vm11, %v6650_v57, %v6654_v61  ;;  %v6789_v37 = vunpack.c.l.b16 %v6645_v11  ;;  %v6688_v25 = vrot.slane %v6687_v35, 4  ;;  %v6734_v12 = vrot.slane %v6732_v10, 5  ;;  %6508 = vst.msk [vmem:[#allocation3 + $0x10] sm:$0x1] %vm6507_vm7, %v6482_v34  ;;  %v6489_v16 = vld [vmem:[%s11729_s9 + $0x24] sm:$0xf] }
 0x4c0   : > { %v6790_v31 = vunpack.c.l.b16 %v6655_v13  ;;  %v6698_v60 = vrot.slane %v6697_v50, 4  ;;  %v6740_v56 = vrot.slane %v6738_v58, 5  ;;  %v6742_v59 = vshrl.u32 %v12689_v7, 16  ;;  %v6490_v47 = vld [vmem:[%s11729_s9 + $0x28] sm:$0xf]  ;;  %v10191_v50 = vld [vmem:[%s13626_s26 + $0x90] sm:$0xff] }
 0x4c1   : > { %7197 = vmatpush.bf16.msrb.mxu2 %v10183_v51  ;;  %v6693_v33 = vsel %vm12679_vm11, %v6688_v25, %v6692_v36  ;;  %v6735_v46 = vor.u32 %v6734_v12, %v6731_v18  ;;  %v6748_v15 = vshll.u32 %v12692_v32, 16  ;;  %v6585_v21 = vshrl.u32 %v12702_v48, 16  ;;  %7000 = vmatpush.bf16.msrb.mxu1 %v10175_v22  ;;  %v6491_v40 = vld [vmem:[%s11729_s9 + $0x2c] sm:$0x1]  ;;  %6515 = vst.msk [vmem:[#allocation3 + $0x48] sm:$0xf] %vm6504_vm6, %v6489_v16 }
 0x4c2   : > { %7303 = vmatpush.bf16.msrb.mxu3 %v10187_v44  ;;  %v12716_v17 = vpack.c.b16 %v6790_v31, %v6789_v37  ;;  %v6703_v63 = vsel %vm12679_vm11, %v6698_v60, %v6702_v0  ;;  %v6793_v3 = vunpack.c.l.b16 %v6693_v33  ;;  %v6744_v62 = vrot.slane %v6742_v59, 4  ;;  %6516 = vst.msk [vmem:[#allocation3 + $0x50] sm:$0xf] %vm6504_vm6, %v6490_v47  ;;  %v6495_v27 = vld [vmem:[%s11729_s9 + $0x3c] sm:$0xf]  ;;  %v10186_v57 = vld [vmem:[%s13626_s26 + $0x68] sm:$0xff]  ;;  %7431 = vmatpush.bf16.msrb.mxu0 %v10191_v50 }
 0x4c3   : > { %v6794_v30 = vunpack.c.l.b16 %v6703_v63  ;;  %v6736_v14 = vrot.slane %v6735_v46, 4  ;;  %6517 = vst.msk [vmem:[#allocation3 + $0x58] sm:$0x1] %vm6507_vm7, %v6491_v40  ;;  %v6750_v24 = vrot.slane %v6748_v15, 5  ;;  %v6587_v5 = vrot.slane %v6585_v21, 4  ;;  %v10174_v40 = vld [vmem:[%s13626_s26 + $0x8] sm:$0xff] }
 0x4c4   : > { %9662 = vmatmul.msk.bf16.vlgmr.msra.gmra.mxu1 %vm6833_vm10, %v12716_v17  ;;  %v6745_v38 = vor.u32 %v6744_v62, %v6740_v56  ;;  %v6588_v9 = vshll.u32 %v12702_v48, 16  ;;  %v6496_v55 = vld [vmem:[%s11729_s9 + $0x40] sm:$0xf]  ;;  %v6497_v23 = vld [vmem:[%s11729_s9 + $0x44] sm:$0x1] }
 0x4c5   : > { %v12730_v29 = vpack.c.b16 %v6794_v30, %v6793_v3  ;;  %v6741_v2 = vsel %vm12679_vm11, %v6736_v14, %v6740_v56  ;;  %v12734_v61 = vld [vmem:[#allocation3 + $0x8] sm:$0xf]  ;;  %6521 = vst.msk [vmem:[#allocation3 + $0x78] sm:$0xf] %vm6504_vm6, %v6495_v27  ;;  %7198 = vmatpush.bf16.msrb.mxu2 %v10182_v45  ;;  %v6501_v52 = vld [vmem:[%s11729_s9 + $0x54] sm:$0xf]  ;;  %7001 = vmatpush.bf16.msrb.mxu1 %v10174_v40 }
 0x4c6   : > { %v6746_v4 = vrot.slane %v6745_v38, 4  ;;  %v12738_v34 = vld [vmem:[#allocation3 + $0x10] sm:$0x1]  ;;  %v6590_v51 = vrot.slane %v6588_v9, 5  ;;  %v6594_v41 = vshll.u32 %v12734_v61, 16  ;;  %v6797_v42 = vunpack.c.l.b16 %v6741_v2  ;;  %7304 = vmatpush.bf16.msrb.mxu3 %v10186_v57  ;;  %v10181_v27 = vld [vmem:[%s13626_s26 + $0x40] sm:$0xff] }
 0x4c7   : > { %9664 = vmatmul.msk.bf16.vlgmr.msra.gmra.mxu2 %vm6833_vm10, %v12730_v29  ;;  %v6598_v19 = vshrl.u32 %v12734_v61, 16  ;;  %v6604_v54 = vshll.u32 %v12738_v34, 16  ;;  %6522 = vst.msk [vmem:[#allocation3 + $0x80] sm:$0xf] %vm6504_vm6, %v6496_v55  ;;  %v6502_v56 = vld [vmem:[%s11729_s9 + $0x58] sm:$0xf] }
 0x4c8   : > { %v6751_v44 = vsel %vm12679_vm11, %v6746_v4, %v6750_v24  ;;  %v6591_v26 = vor.u32 %v6590_v51, %v6587_v5  ;;  %v6596_v36 = vrot.slane %v6594_v41, 5  ;;  %v12748_v39 = vld [vmem:[#allocation3 + $0x48] sm:$0xf]  ;;  %6523 = vst.msk [vmem:[#allocation3 + $0x88] sm:$0x1] %vm6507_vm7, %v6497_v23  ;;  %v10185_v5 = vld [vmem:[%s13626_s26 + $0x60] sm:$0xff] }
 0x4c9   : > { %v6798_v35 = vunpack.c.l.b16 %v6751_v44  ;;  %v6600_v0 = vrot.slane %v6598_v19, 4  ;;  %v6606_v10 = vrot.slane %v6604_v54, 5  ;;  %v12755_v22 = vld [vmem:[#allocation3 + $0x50] sm:$0xf]  ;;  %v6657_v11 = vshrl.u32 %v12748_v39, 16  ;;  %7199 = vmatpush.bf16.msrb.mxu2 %v10181_v27  ;;  %v10190_v51 = vld [vmem:[%s13626_s26 + $0x88] sm:$0xff] }
 0x4ca   : > { %v6592_v18 = vrot.slane %v6591_v26, 4  ;;  %v12761_v58 = vld [vmem:[#allocation3 + $0x58] sm:$0x1]  ;;  %v6660_v13 = vshll.u32 %v12748_v39, 16  ;;  %v6666_v37 = vshll.u32 %v12755_v22, 16  ;;  %v6670_v25 = vshrl.u32 %v12755_v22, 16  ;;  %7305 = vmatpush.bf16.msrb.mxu3 %v10185_v5  ;;  %7432 = vmatpush.bf16.msrb.mxu0 %v10190_v51 }
 0x4cb   : > { %v12766_v12 = vpack.c.b16 %v6798_v35, %v6797_v42  ;;  %v6601_v16 = vor.u32 %v6600_v0, %v6596_v36  ;;  %v6659_v31 = vrot.slane %v6657_v11, 4  ;;  %v6676_v60 = vshll.u32 %v12761_v58, 16  ;;  %v6503_v59 = vld [vmem:[%s11729_s9 + $0x5c] sm:$0x1]  ;;  %6527 = vst.msk [vmem:[#allocation3 + $0xa8] sm:$0xf] %vm6504_vm6, %v6501_v52 }
 0x4cc   : > { %v6597_v47 = vsel %vm12679_vm11, %v6592_v18, %v6596_v36  ;;  %v6662_v33 = vrot.slane %v6660_v13, 5  ;;  %v6668_v46 = vrot.slane %v6666_v37, 5  ;;  %v6672_v15 = vrot.slane %v6670_v25, 4  ;;  %v12773_v21 = vld [vmem:[#allocation3 + $0x78] sm:$0xf]  ;;  %v10173_v44 = vld [vmem:[%s13626_s26] sm:$0xff] }
 0x4cd   : > { %9666 = vmatmul.msk.bf16.vlgmr.msra.gmra.mxu3 %vm6833_vm10, %v12766_v12  ;;  %v6602_v63 = vrot.slane %v6601_v16, 4  ;;  %v6678_v3 = vrot.slane %v6676_v60, 5  ;;  %v6705_v62 = vshrl.u32 %v12773_v21, 16  ;;  %v6785_v30 = vunpack.c.l.b16 %v6597_v47  ;;  %6528 = vst.msk [vmem:[#allocation3 + $0xb0] sm:$0xf] %vm6504_vm6, %v6502_v56  ;;  %v10189_v35 = vld [vmem:[%s13626_s26 + $0x80] sm:$0xff]  ;;  %7002 = vmatpush.bf16.msrb.mxu1 %v10173_v44 }
 0x4ce   : > { %v6663_v14 = vor.u32 %v6662_v33, %v6659_v31  ;;  %v6673_v45 = vor.u32 %v6672_v15, %v6668_v46  ;;  %v12785_v38 = vld [vmem:[#allocation3 + $0x80] sm:$0xf]  ;;  %v6708_v24 = vshll.u32 %v12773_v21, 16  ;;  %6529 = vst.msk [vmem:[#allocation3 + $0xb8] sm:$0x1] %vm6507_vm7, %v6503_v59  ;;  %v10200_v60 = vld [vmem:[%s13626_s26 + $0xd8] sm:$0xff]  ;;  %7433 = vmatpush.bf16.msrb.mxu0 %v10189_v35 }
 0x4cf   : > { %v6607_v9 = vsel %vm12679_vm11, %v6602_v63, %v6606_v10  ;;  %v12794_v55 = vld [vmem:[#allocation3 + $0x88] sm:$0x1]  ;;  %v6707_v2 = vrot.slane %v6705_v62, 4  ;;  %v6714_v23 = vshll.u32 %v12785_v38, 16  ;;  %v6718_v4 = vshrl.u32 %v12785_v38, 16  ;;  %7648 = vmatpush.bf16.msra.mxu2 %v10200_v60  ;;  %v10196_v51 = vld [vmem:[%s13626_s26 + $0xb8] sm:$0xff] }
 0x4d0   : > { %v6786_v41 = vunpack.c.l.b16 %v6607_v9  ;;  %v6664_v42 = vrot.slane %v6663_v14, 4  ;;  %v6674_v19 = vrot.slane %v6673_v45, 4  ;;  %v6710_v54 = vrot.slane %v6708_v24, 5  ;;  %v6483_v57 = vld [vmem:[%s11729_s9 + $0xc] sm:$0xf] }
 0x4d1   : > { %v6716_v26 = vrot.slane %v6714_v23, 5  ;;  %v6720_v36 = vrot.slane %v6718_v4, 4  ;;  %v6724_v52 = vshll.u32 %v12794_v55, 16  ;;  %v6484_v18 = vld [vmem:[%s11729_s9 + $0x10] sm:$0xf]  ;;  %v7060_v63 = vrot.slane %v12738_v34, 5  ;;  %7542 = vmatpush.bf16.msra.mxu1 %v10196_v51 }
 0x4d2   : > { %v6801_v0 = vpack.c.b16 %v6786_v41, %v6785_v30  ;;  %v6669_v10 = vsel %vm12679_vm11, %v6664_v42, %v6668_v46  ;;  %v6679_v11 = vsel %vm12679_vm11, %v6674_v19, %v6678_v3  ;;  %v6711_v50 = vor.u32 %v6710_v54, %v6707_v2  ;;  %v6485_v13 = vld [vmem:[%s11729_s9 + $0x14] sm:$0x1]  ;;  %6509 = vst.msk [vmem:[#allocation3 + $0x18] sm:$0xf] %vm6504_vm6, %v6483_v57  ;;  %v12822_v59 = vld [vmem:[#allocation3 + $0xa8] sm:$0xf] }
 0x4d3   : > { %v6791_v37 = vunpack.c.l.b16 %v6669_v10  ;;  %v6792_v25 = vunpack.c.l.b16 %v6679_v11  ;;  %v6721_v16 = vor.u32 %v6720_v36, %v6716_v26  ;;  %v6726_v31 = vrot.slane %v6724_v52, 5  ;;  %6510 = vst.msk [vmem:[#allocation3 + $0x20] sm:$0xf] %vm6504_vm6, %v6484_v18  ;;  %v10204_v4 = vld [vmem:[%s13626_s26 + $0xf8] sm:$0xff] }
 0x4d4   : > { %9660 = vmatmul.msk.bf16.vlgmr.msra.gmra.mxu0 %vm6833_vm10, %v6801_v0  ;;  %v6712_v56 = vrot.slane %v6711_v50, 4  ;;  %6511 = vst.msk [vmem:[#allocation3 + $0x28] sm:$0x1] %vm6507_vm7, %v6485_v13  ;;  %v12827_v46 = vld [vmem:[#allocation3 + $0xb0] sm:$0xf]  ;;  %v6753_v15 = vshrl.u32 %v12822_v59, 16  ;;  %7776 = vmatpush.bf16.msra.mxu3 %v10204_v4 }
 0x4d5   : > { %v12825_v47 = vpack.c.b16 %v6792_v25, %v6791_v37  ;;  %v6722_v33 = vrot.slane %v6721_v16, 4  ;;  %v6756_v40 = vshll.u32 %v12822_v59, 16  ;;  %v6762_v62 = vshll.u32 %v12827_v46, 16  ;;  %v12840_v45 = vld [vmem:[#allocation3 + $0xb8] sm:$0x1] }
 0x4d6   : > { %v6717_v3 = vsel %vm12679_vm11, %v6712_v56, %v6716_v26  ;;  %v6766_v27 = vshrl.u32 %v12827_v46, 16  ;;  %v6755_v24 = vrot.slane %v6753_v15, 4  ;;  %v6772_v23 = vshll.u32 %v12840_v45, 16  ;;  %v10208_v41 = vld [vmem:[%s13626_s26 + $0x118] sm:$0xff] }
 0x4d7   : > { %9663 = vmatmul.msk.bf16.gmra.mxu1 %vm6833_vm10, %v12825_v47  ;;  %v6727_v30 = vsel %vm12679_vm11, %v6722_v33, %v6726_v31  ;;  %v6795_v14 = vunpack.c.l.b16 %v6717_v3  ;;  %v6758_v5 = vrot.slane %v6756_v40, 5  ;;  %v6764_v34 = vrot.slane %v6762_v62, 5  ;;  %7888 = vmatpush.bf16.msra.mxu0 %v10208_v41 }
 0x4d8   : > { %v6796_v9 = vunpack.c.l.b16 %v6727_v30  ;;  %v6768_v2 = vrot.slane %v6766_v27, 4  ;;  %v7057_v54 = vrot.slane %v12734_v61, 5  ;;  %v6774_v36 = vrot.slane %v6772_v23, 5  ;;  %v9670_v30 = vld [vmem:[#allocation3] sm:$0xf] }
 0x4d9   : > { %v6759_v42 = vor.u32 %v6758_v5, %v6755_v24  ;;  %v12852_v19 = vld [vmem:[#allocation3 + $0x18] sm:$0xf]  ;;  %v9724_v37 = vrot.slane %v12702_v48, 9 }
 0x4da   : > { %v12855_v44 = vpack.c.b16 %v6796_v9, %v6795_v14  ;;  %v6769_v26 = vor.u32 %v6768_v2, %v6764_v34  ;;  %v12857_v52 = vld [vmem:[#allocation3 + $0x20] sm:$0xf]  ;;  %v6609_v57 = vshrl.u32 %v12852_v19, 16  ;;  %v6612_v10 = vshll.u32 %v12852_v19, 16  ;;  %v10163_v14 = vld [vmem:[#allocation3 + $0x4] sm:$0xf0] }
 0x4db   : > { %v6760_v35 = vrot.slane %v6759_v42, 4  ;;  %v6548_v0 = vld [vmem:[#allocation3 + $0x28] sm:$0x1]  ;;  %v6618_v11 = vshll.u32 %v12857_v52, 16  ;;  %v6622_v50 = vshrl.u32 %v12857_v52, 16  ;;  %v7059_v40 = vrot.slane %v7057_v54, 4 }
 0x4dc   : > { %9665 = vmatmul.msk.bf16.gmra.mxu2 %vm6833_vm10, %v12855_v44  ;;  %v6770_v61 = vrot.slane %v6769_v26, 4  ;;  %v6611_v18 = vrot.slane %v6609_v57, 4  ;;  %v6628_v13 = vshll.u32 %v6548_v0, 16  ;;  %v6614_v16 = vrot.slane %v6612_v10, 5 }
 0x4dd   : > { %v6765_v25 = vsel %vm12679_vm11, %v6760_v35, %v6764_v34  ;;  %v6620_v31 = vrot.slane %v6618_v11, 5  ;;  %v6624_v60 = vrot.slane %v6622_v50, 4  ;;  %v7058_v24 = vsel %vm12870_vm14, %v9724_v37, %v7057_v54  ;;  %v10164_v37 = vld [vmem:[#allocation3 + $0x1c] sm:$0xf0] }
 0x4de   : > { %v6775_v33 = vsel %vm12679_vm11, %v6770_v61, %v6774_v36  ;;  %v6799_v15 = vunpack.c.l.b16 %v6765_v25  ;;  %v6615_v62 = vor.u32 %v6614_v16, %v6611_v18  ;;  %v6630_v27 = vrot.slane %v6628_v13, 5  ;;  %v9674_v13 = vld [vmem:[#allocation3 + $0x18] sm:$0xf] }
 0x4df   : > { %v6800_v3 = vunpack.c.l.b16 %v6775_v33  ;;  %v6625_v48 = vor.u32 %v6624_v60, %v6620_v31  ;;  %v7061_v2 = vsel %vm12870_vm14, %v7059_v40, %v7060_v63  ;;  %v9671_v51 = vor.u32 %v10163_v14, %v9670_v30 }
 0x4e0   : > { %v6616_v9 = vrot.slane %v6615_v62, 4  ;;  %v7120_v54 = vunpack.c.l.b16 %v7058_v24  ;;  %v7121_v26 = vunpack.c.l.b16 %v7061_v2  ;;  %v9726_v57 = vrot.slane %v12636_v43, 9  ;;  %v10195_v62 = vld [vmem:[%s13626_s26 + $0xb0] sm:$0xff] }
 0x4e1   : > { %v12878_v5 = vpack.c.b16 %v6800_v3, %v6799_v15  ;;  %v6626_v34 = vrot.slane %v6625_v48, 4  ;;  %v7071_v35 = vrot.slane %v12639_v53, 5  ;;  %v7074_v10 = vrot.slane %v12650_v8, 5  ;;  %v10199_v15 = vld [vmem:[%s13626_s26 + $0xd0] sm:$0xff]  ;;  %7543 = vmatpush.bf16.msra.mxu1 %v10195_v62 }
 0x4e2   : > { %v6621_v23 = vsel %vm12679_vm11, %v6616_v9, %v6620_v31  ;;  %v7136_v63 = vpack.c.b16 %v7121_v26, %v7120_v54  ;;  %v7064_v11 = vrot.slane %v12857_v52, 5  ;;  %v9725_v43 = vrot.slane %v12852_v19, 9  ;;  %7649 = vmatpush.bf16.msra.mxu2 %v10199_v15  ;;  %v10203_v3 = vld [vmem:[%s13626_s26 + $0xf0] sm:$0xff]  ;;  %v10198_v54 = vld [vmem:[%s13626_s26 + $0xc8] sm:$0xff] }
 0x4e3   : > { %9667 = vmatmul.msk.bf16.gmra.mxu3 %vm6833_vm10, %v12878_v5  ;;  %v6631_v4 = vsel %vm12679_vm11, %v6626_v34, %v6630_v27  ;;  %v6787_v41 = vunpack.c.l.b16 %v6621_v23  ;;  %v7072_v50 = vsel %vm12870_vm14, %v9726_v57, %v7071_v35  ;;  %v7073_v61 = vrot.slane %v7071_v35, 4  ;;  %v10207_v48 = vld [vmem:[%s13626_s26 + $0x110] sm:$0xff]  ;;  %v10165_v23 = vld [vmem:[#allocation3 + $0x34] sm:$0xf0]  ;;  %v10202_v26 = vld [vmem:[%s13626_s26 + $0xe8] sm:$0xff] }
 0x4e4   : > { %v6788_v42 = vunpack.c.l.b16 %v6631_v4  ;;  %v7124_v18 = vunpack.c.l.b16 %v7072_v50  ;;  %v7066_v16 = vrot.slane %v7064_v11, 4  ;;  %v7067_v53 = vrot.slane %v6548_v0, 5  ;;  %7777 = vmatpush.bf16.msra.mxu3 %v10203_v3  ;;  %7889 = vmatpush.bf16.msra.mxu0 %v10207_v48  ;;  %v9678_v2 = vld [vmem:[#allocation3 + $0x30] sm:$0xf]  ;;  %v9686_v35 = vld [vmem:[#allocation3 + $0x60] sm:$0xf] }
 0x4e5   : > { %v7075_v25 = vsel %vm12870_vm14, %v7073_v61, %v7074_v10  ;;  %v9675_v8 = vor.u32 %v10164_v37, %v9674_v13  ;;  %v7065_v52 = vsel %vm12870_vm14, %v9725_v43, %v7064_v11  ;;  %v9727_v27 = vrot.slane %v12748_v39, 9  ;;  %v10167_v10 = vld [vmem:[#allocation3 + $0x64] sm:$0xf0]  ;;  %v9690_v43 = vld [vmem:[#allocation3 + $0x78] sm:$0xf]  ;;  %v10201_v48 = vld [vmem:[%s13626_s26 + $0xe0] sm:$0xff] }
 0x4e6   : > { %v6802_v36 = vpack.c.b16 %v6788_v42, %v6787_v41  ;;  %v7125_v31 = vunpack.c.l.b16 %v7075_v25  ;;  %v7068_v33 = vsel %vm12870_vm14, %v7066_v16, %v7067_v53  ;;  %v7122_v40 = vunpack.c.l.b16 %v7065_v52  ;;  %v10166_v41 = vld [vmem:[#allocation3 + $0x4c] sm:$0xf0]  ;;  %7650 = vmatpush.bf16.msra.mxu2 %v10198_v54  ;;  %v10168_v16 = vld [vmem:[#allocation3 + $0x7c] sm:$0xf0]  ;;  %v6532_v3 = vld [vmem:[%s11734_s1 + $0x8] sm:$0x1] }
 0x4e7   : > { %9716 = vmatmul.msk.bf16.vlgmr.msrb.gmra.mxu1 %vm6833_vm10, %v9671_v51  ;;  %v7123_v19 = vunpack.c.l.b16 %v7068_v33  ;;  %v7078_v30 = vrot.slane %v12755_v22, 5  ;;  %v7081_v14 = vrot.slane %v12761_v58, 5  ;;  %v12932_v22 = vor.u32 %v10165_v23, %v9678_v2  ;;  %v9682_v51 = vld [vmem:[#allocation3 + $0x48] sm:$0xf]  ;;  %6539 = vst.msk [vmem:[#allocation3 + $0xd0] sm:$0x1] %vm6507_vm7, %v6532_v3 }
 0x4e8   : > { %9661 = vmatmul.msk.bf16.gmra.mxu0 %vm6833_vm10, %v6802_v36  ;;  %v12900_v60 = vpack.c.b16 %v7125_v31, %v7124_v18  ;;  %v12944_v42 = vor.u32 %v10166_v41, %v9682_v51  ;;  %v7085_v57 = vrot.slane %v12664_v49, 5  ;;  %7778 = vmatpush.bf16.msra.mxu3 %v10202_v26  ;;  %v9728_v11 = vrot.slane %v12659_v28, 9 }
 0x4e9   : > { %v12912_v0 = vpack.c.b16 %v7123_v19, %v7122_v40  ;;  %v7079_v24 = vsel %vm12870_vm14, %v9727_v27, %v7078_v30  ;;  %v7080_v9 = vrot.slane %v7078_v30, 4  ;;  %v7088_v61 = vrot.slane %v12669_v20, 5  ;;  %v6531_v40 = vld [vmem:[%s11734_s1 + $0x4] sm:$0xf] }
 0x4ea   : > { %v7126_v34 = vunpack.c.l.b16 %v7079_v24  ;;  %v7087_v50 = vrot.slane %v7085_v57, 4  ;;  %v12969_v18 = vor.u32 %v10167_v10, %v9686_v35  ;;  %v7086_v13 = vsel %vm12870_vm14, %v9728_v11, %v7085_v57  ;;  %6538 = vst.msk [vmem:[#allocation3 + $0xc8] sm:$0xf] %vm6504_vm6, %v6531_v40  ;;  %v10193_v27 = vld [vmem:[%s13626_s26 + $0xa0] sm:$0xff]  ;;  %v9694_v24 = vld [vmem:[#allocation3 + $0x90] sm:$0xf] }
 0x4eb   : > { %v7082_v39 = vsel %vm12870_vm14, %v7080_v9, %v7081_v14  ;;  %v7128_v37 = vunpack.c.l.b16 %v7086_v13  ;;  %v7092_v20 = vrot.slane %v12785_v38, 5  ;;  %v9729_v53 = vrot.slane %v12773_v21, 9  ;;  %v6530_v38 = vld [vmem:[%s11734_s1] sm:$0xf]  ;;  %v10169_v9 = vld [vmem:[#allocation3 + $0x94] sm:$0xf0] }
 0x4ec   : > { %9756 = vmatmul.msk.bf16.vlgmr.msrb.gmra.mxu2 %vm6833_vm10, %v7136_v63  ;;  %v7127_v4 = vunpack.c.l.b16 %v7082_v39  ;;  %v10206_v63 = vld [vmem:[%s13626_s26 + $0x108] sm:$0xff]  ;;  %v7089_v49 = vsel %vm12870_vm14, %v7087_v50, %v7088_v61  ;;  %v12988_v52 = vor.u32 %v10168_v16, %v9690_v43  ;;  %v10197_v21 = vld [vmem:[%s13626_s26 + $0xc0] sm:$0xff]  ;;  %6537 = vst.msk [vmem:[#allocation3 + $0xc0] sm:$0xf] %vm6504_vm6, %v6530_v38  ;;  %v7099_v30 = vrot.slane %v12689_v7, 5  ;;  %7779 = vmatpush.bf16.msra.mxu3 %v10201_v48 }
 0x4ed   : > { %7890 = vmatpush.bf16.msra.mxu0 %v10206_v63  ;;  %v7129_v25 = vunpack.c.l.b16 %v7089_v49  ;;  %v7094_v31 = vrot.slane %v7092_v20, 4  ;;  %v7093_v33 = vsel %vm12870_vm14, %v9729_v53, %v7092_v20  ;;  %7651 = vmatpush.bf16.msra.mxu2 %v10197_v21  ;;  %v10205_v14 = vld [vmem:[%s13626_s26 + $0x100] sm:$0xff]  ;;  %v7102_v23 = vrot.slane %v12692_v32, 5  ;;  %v9698_v57 = vld [vmem:[#allocation3 + $0xa8] sm:$0xf] }
 0x4ee   : > { %v12934_v58 = vpack.c.b16 %v7127_v4, %v7126_v34  ;;  %v9730_v34 = vrot.slane %v12684_v6, 9  ;;  %v7101_v2 = vrot.slane %v7099_v30, 4  ;;  %v13025_v39 = vor.u32 %v10169_v9, %v9694_v24  ;;  %v10170_v10 = vld [vmem:[#allocation3 + $0xac] sm:$0xf0] }
 0x4ef   : > { %v12981_v28 = vpack.c.b16 %v7129_v25, %v7128_v37  ;;  %v7106_v32 = vrot.slane %v12827_v46, 5  ;;  %v9731_v46 = vrot.slane %v12822_v59, 9  ;;  %v7109_v49 = vrot.slane %v12840_v45, 5  ;;  %v13066_v59 = vld [vmem:[#allocation3 + $0xd0] sm:$0x1] }
 0x4f0   : > { %v7100_v4 = vsel %vm12870_vm14, %v9730_v34, %v7099_v30  ;;  %v7103_v51 = vsel %vm12870_vm14, %v7101_v2, %v7102_v23  ;;  %v13058_v25 = vor.u32 %v10170_v10, %v9698_v57  ;;  %v7383_v3 = vshll.u32 %v13066_v59, 16 }
 0x4f1   : > { %7891 = vmatpush.bf16.msra.mxu0 %v10205_v14  ;;  %v7132_v41 = vunpack.c.l.b16 %v7100_v4  ;;  %v7133_v54 = vunpack.c.l.b16 %v7103_v51  ;;  %v7108_v13 = vrot.slane %v7106_v32, 4  ;;  %v7107_v53 = vsel %vm12870_vm14, %v9731_v46, %v7106_v32  ;;  %v10171_v2 = vld [vmem:[#allocation3 + $0xc4] sm:$0xf0] }
 0x4f2   : > { %v7134_v38 = vunpack.c.l.b16 %v7107_v53  ;;  %v7385_v14 = vrot.slane %v7383_v3, 5 }
 0x4f3   : > { %9792 = vmatmul.msk.bf16.vlgmr.msrb.gmra.mxu3 %vm6833_vm10, %v9675_v8  ;;  %v13039_v6 = vpack.c.b16 %v7133_v54, %v7132_v41  ;;  %v13042_v26 = vld [vmem:[#allocation3 + $0xc0] sm:$0xf] }
 0x4f4   : > { %v7364_v11 = vshrl.u32 %v13042_v26, 16  ;;  %v7367_v50 = vshll.u32 %v13042_v26, 16  ;;  %v9774_v34 = vld [vmem:[#allocation3 + $0xc0] sm:$0xf] }
 0x4f5   : > { %v13091_v41 = vor.u32 %v10171_v2, %v9774_v34 }
 0x4f6   : > { %v7366_v20 = vrot.slane %v7364_v11, 4  ;;  %v7369_v43 = vrot.slane %v7367_v50, 5 }
 0x4f7   : > { %9717 = vmatmul.msk.bf16.gmra.mxu1 %vm6833_vm10, %v9675_v8  ;;  %v7095_v8 = vrot.slane %v12794_v55, 5  ;;  %v7130_v55 = vunpack.c.l.b16 %v7093_v33 }
 0x4f8   : > { %9824 = vmatmul.msk.bf16.vlgmr.msrb.gmra.mxu0 %vm6833_vm10, %v6802_v36  ;;  %v10194_v36 = vld [vmem:[%s13626_s26 + $0xa8] sm:$0xff] }
 0x4f9   : > { %7544 = vmatpush.bf16.msra.mxu1 %v10194_v36  ;;  %v7096_v15 = vsel %vm12870_vm14, %v7094_v31, %v7095_v8  ;;  %v13044_v36 = vld [vmem:[#allocation3 + $0xc8] sm:$0xf]  ;;  %v7110_v31 = vsel %vm12870_vm14, %v7108_v13, %v7109_v49 }
 0x4fa   : > { %v7131_v19 = vunpack.c.l.b16 %v7096_v15  ;;  %v7373_v61 = vshll.u32 %v13044_v36, 16  ;;  %v7377_v37 = vshrl.u32 %v13044_v36, 16  ;;  %v7135_v40 = vunpack.c.l.b16 %v7110_v31 }
 0x4fc   : > { %9757 = vmatmul.msk.bf16.gmra.mxu2 %vm6833_vm10, %v12912_v0  ;;  %v13009_v62 = vpack.c.b16 %v7131_v19, %v7130_v55  ;;  %v7375_v8 = vrot.slane %v7373_v61, 5  ;;  %v7379_v33 = vrot.slane %v7377_v37, 4  ;;  %v7370_v55 = vor.u32 %v7369_v43, %v7366_v20 }
 0x4fd   : > { %7545 = vmatpush.bf16.msra.mxu1 %v10193_v27  ;;  %v13079_v48 = vpack.c.b16 %v7135_v40, %v7134_v38 }
 0x4fe   : > { %v7380_v19 = vor.u32 %v7379_v33, %v7375_v8  ;;  %v7371_v27 = vrot.slane %v7370_v55, 4 }
 0x500   : > { %v7381_v30 = vrot.slane %v7380_v19, 4  ;;  %v7376_v4 = vsel %vm12679_vm11, %v7371_v27, %v7375_v8 }
 0x501   : > { %v7396_v32 = vunpack.c.l.b16 %v7376_v4 }
 0x502   : > { %v7386_v51 = vsel %vm12679_vm11, %v7381_v30, %v7385_v14 }
 0x503   : > { %9793 = vmatmul.msk.bf16.gmra.mxu3 %vm6833_vm10, %v12932_v22  ;;  %v7397_v57 = vunpack.c.l.b16 %v7386_v51 }
 0x505   : > { %v13097_v10 = vpack.c.b16 %v7397_v57, %v7396_v32 }
 0x507   : > { %9718 = vmatmul.msk.bf16.gmra.mxu1 %vm6833_vm10, %v12932_v22 }
 0x508   : > { %9825 = vmatmul.msk.bf16.gmra.mxu0 %vm6833_vm10, %v12716_v17 }
 0x50c   : > { %9758 = vmatmul.msk.bf16.gmra.mxu2 %vm6833_vm10, %v12900_v60 }
 0x513   : > { %9794 = vmatmul.msk.bf16.gmra.mxu3 %vm6833_vm10, %v12944_v42 }
 0x517   : > { %9719 = vmatmul.msk.bf16.gmra.mxu1 %vm6833_vm10, %v12944_v42 }
 0x518   : > { %9826 = vmatmul.msk.bf16.gmra.mxu0 %vm6833_vm10, %v12825_v47 }
 0x51c   : > { %9759 = vmatmul.msk.bf16.gmra.mxu2 %vm6833_vm10, %v12934_v58 }
 0x523   : > { %9795 = vmatmul.msk.bf16.gmra.mxu3 %vm6833_vm10, %v12969_v18 }
 0x527   : > { %9720 = vmatmul.msk.bf16.gmra.mxu1 %vm6833_vm10, %v12969_v18 }
 0x528   : > { %9827 = vmatmul.msk.bf16.gmra.mxu0 %vm6833_vm10, %v12730_v29 }
 0x52c   : > { %9760 = vmatmul.msk.bf16.gmra.mxu2 %vm6833_vm10, %v12981_v28 }
 0x533   : > { %9796 = vmatmul.msk.bf16.gmra.mxu3 %vm6833_vm10, %v12988_v52 }
 0x537   : > { %9721 = vmatmul.msk.bf16.gmra.mxu1 %vm6833_vm10, %v12988_v52 }
 0x538   : > { %9828 = vmatmul.msk.bf16.gmra.mxu0 %vm6833_vm10, %v12855_v44 }
 0x53c   : > { %9761 = vmatmul.msk.bf16.gmra.mxu2 %vm6833_vm10, %v13009_v62 }
 0x541   : > { %v13027_v7 = vpop.f32.mrf.mxu1 }
 0x543   : > { %9797 = vmatmul.msk.bf16.gmra.mxu3 %vm6833_vm10, %v13025_v39 }
 0x547   : > { %9722 = vmatmul.msk.bf16.gmra.mxu1 %vm6833_vm10, %v13025_v39 }
 0x548   : > { %9829 = vmatmul.msk.bf16.gmra.mxu0 %vm6833_vm10, %v12766_v12 }
 0x549   : > { %v13046_v63 = vpop.f32.mrf.mxu1 }
 0x54a   : > { %v13048_v35 = vpop.f32.mrf.mxu2 }
 0x54c   : > { %9762 = vmatmul.msk.bf16.gmra.mxu2 %vm6833_vm10, %v13039_v6 }
 0x550   : > { %v13064_v15 = vpop.f32.mrf.mxu3 }
 0x551   : > { %v6867_v16 = vpop.f32.mrf.mxu0 }
 0x552   : > { %v13072_v21 = vpop.f32.mrf.mxu2 }
 0x553   : > { %9798 = vmatmul.msk.bf16.gmra.mxu3 %vm6833_vm10, %v13058_v25 }
 0x554   : > { %v13070_v45 = vpop.f32.mrf.mxu1 }
 0x557   : > { %9723 = vmatmul.msk.bf16.gmra.mxu1 %vm6833_vm10, %v13058_v25 }
 0x558   : > { %9830 = vmatmul.msk.bf16.gmra.mxu0 %vm6833_vm10, %v12878_v5  ;;  %v13081_v9 = vpop.f32.mrf.mxu3 }
 0x559   : > { %v6869_v24 = vpop.f32.mrf.mxu0 }
 0x55c   : > { %9763 = vmatmul.msk.bf16.gmra.mxu2 %vm6833_vm10, %v13079_v48  ;;  %v13085_v23 = vpop.f32.mrf.mxu1 }
 0x55f   : > { %v13093_v54 = vpop.f32.mrf.mxu2 }
 0x563   : > { %9799 = vmatmul.msk.bf16.gmra.mxu3 %vm6833_vm10, %v13091_v41 }
 0x564   : > { %v7004_v11 = vpop.f32.mrf.mxu1 }
 0x565   : > { %v6872_v50 = vpop.f32.mrf.mxu0  ;;  %v7005_v61 = vadd.f32 %v7004_v11, %v6867_v16 }
 0x566   : > { %v13099_v46 = vpop.f32.mrf.mxu3 }
 0x567   : > { %v13101_v13 = vpop.f32.mrf.mxu2  ;;  %9857 = vmatmul.msk.bf16.vlgmr.msra.gmra.mxu1 %vm6833_vm10, %v12912_v0 }
 0x568   : > { %9831 = vmatmul.msk.bf16.gmra.mxu0 %vm6833_vm10, %v13097_v10 }
 0x56c   : > { %9893 = vmatmul.msk.bf16.vlgmr.msra.gmra.mxu2 %vm6833_vm10, %v12932_v22  ;;  %v7006_v49 = vpop.f32.mrf.mxu1 }
 0x56d   : > { %v6874_v37 = vpop.f32.mrf.mxu0  ;;  %v7007_v20 = vadd.f32 %v7006_v49, %v6869_v24 }
 0x56e   : > { %v13109_v43 = vpop.f32.mrf.mxu3 }
 0x56f   : > { %v7201_v53 = vpop.f32.mrf.mxu2 }
 0x570   : > { %v7241_v16 = vadd.f32 %v7201_v53, %v7005_v61 }
 0x573   : > { %9925 = vmatmul.msk.bf16.vlgmr.msra.gmra.mxu3 %vm6833_vm10, %v12716_v17 }
 0x574   : > { %v7009_v31 = vpop.f32.mrf.mxu1 }
 0x575   : > { %v7435_v8 = vpop.f32.mrf.mxu0  ;;  %v7010_v33 = vadd.f32 %v7009_v31, %v6872_v50 }
 0x576   : > { %v7307_v0 = vpop.f32.mrf.mxu3 }
 0x577   : > { %v7347_v38 = vadd.f32 %v7307_v0, %v7241_v16  ;;  %v7203_v40 = vpop.f32.mrf.mxu2  ;;  %9858 = vmatmul.msk.bf16.gmra.mxu1 %vm6833_vm10, %v12900_v60 }
 0x578   : > { %9958 = vmatmul.msk.bf16.vlgmr.msra.gmra.mxu0 %vm6833_vm10, %v12900_v60  ;;  %v7242_v22 = vadd.f32 %v7203_v40, %v7007_v20 }
 0x579   : > { %v13117_v55 = vadd.f32 %v7435_v8, %v7347_v38 }
 0x57c   : > { %9894 = vmatmul.msk.bf16.gmra.mxu2 %vm6833_vm10, %v12944_v42  ;;  %v7011_v19 = vpop.f32.mrf.mxu1 }
 0x57d   : > { %v7437_v17 = vpop.f32.mrf.mxu0  ;;  %v7012_v3 = vadd.f32 %v7011_v19, %v6874_v37 }
 0x57e   : > { %v7309_v27 = vpop.f32.mrf.mxu3 }
 0x57f   : > { %v7348_v30 = vadd.f32 %v7309_v27, %v7242_v22  ;;  %v7206_v14 = vpop.f32.mrf.mxu2 }
 0x580   : > { %v7243_v24 = vadd.f32 %v7206_v14, %v7010_v33 }
 0x581   : > { %v13121_v34 = vadd.f32 %v7437_v17, %v7348_v30 }
 0x583   : > { %9926 = vmatmul.msk.bf16.gmra.mxu3 %vm6833_vm10, %v12825_v47 }
 0x584   : > { %v7014_v2 = vpop.f32.mrf.mxu1 }
 0x585   : > { %v7440_v60 = vpop.f32.mrf.mxu0  ;;  %v7015_v4 = vadd.f32 %v7014_v2, %v13027_v7 }
 0x586   : > { %v7312_v51 = vpop.f32.mrf.mxu3 }
 0x587   : > { %v7349_v32 = vadd.f32 %v7312_v51, %v7243_v24  ;;  %v7208_v57 = vpop.f32.mrf.mxu2  ;;  %9859 = vmatmul.msk.bf16.gmra.mxu1 %vm6833_vm10, %v12934_v58 }
 0x588   : > { %9959 = vmatmul.msk.bf16.gmra.mxu0 %vm6833_vm10, %v12934_v58  ;;  %v7244_v42 = vadd.f32 %v7208_v57, %v7012_v3 }
 0x589   : > { %v13130_v11 = vadd.f32 %v7440_v60, %v7349_v32 }
 0x58c   : > { %9895 = vmatmul.msk.bf16.gmra.mxu2 %vm6833_vm10, %v12969_v18  ;;  %v7016_v47 = vpop.f32.mrf.mxu1 }
 0x58d   : > { %v7442_v50 = vpop.f32.mrf.mxu0  ;;  %v7017_v61 = vadd.f32 %v7016_v47, %v13046_v63  ;;  %v6534_v47 = vld [vmem:[%s11734_s1 + $0x10] sm:$0xf] }
 0x58e   : > { %v7314_v7 = vpop.f32.mrf.mxu3  ;;  %6541 = vst.msk [vmem:[#allocation3 + $0xe0] sm:$0xf] %vm6504_vm6, %v6534_v47 }
 0x58f   : > { %v7350_v49 = vadd.f32 %v7314_v7, %v7244_v42  ;;  %v7211_v37 = vpop.f32.mrf.mxu2  ;;  %v6533_v42 = vld [vmem:[%s11734_s1 + $0xc] sm:$0xf] }
 0x590   : > { %v7245_v20 = vadd.f32 %v7211_v37, %v7015_v4  ;;  %6540 = vst.msk [vmem:[#allocation3 + $0xd8] sm:$0xf] %vm6504_vm6, %v6533_v42 }
 0x591   : > { %v13135_v53 = vadd.f32 %v7442_v50, %v7350_v49  ;;  %v6535_v50 = vld [vmem:[%s11734_s1 + $0x14] sm:$0x1] }
 0x592   : > { %6542 = vst.msk [vmem:[#allocation3 + $0xe8] sm:$0x1] %vm6507_vm7, %v6535_v50 }
 0x593   : > { %9927 = vmatmul.msk.bf16.gmra.mxu3 %vm6833_vm10, %v12730_v29 }
 0x594   : > { %v7019_v58 = vpop.f32.mrf.mxu1 }
 0x595   : > { %v7445_v16 = vpop.f32.mrf.mxu0  ;;  %v7020_v31 = vadd.f32 %v7019_v58, %v13070_v45 }
 0x596   : > { %v7317_v8 = vpop.f32.mrf.mxu3 }
 0x597   : > { %v7351_v33 = vadd.f32 %v7317_v8, %v7245_v20  ;;  %v7213_v18 = vpop.f32.mrf.mxu2  ;;  %9860 = vmatmul.msk.bf16.gmra.mxu1 %vm6833_vm10, %v12981_v28 }
 0x598   : > { %9960 = vmatmul.msk.bf16.gmra.mxu0 %vm6833_vm10, %v12981_v28  ;;  %v7246_v63 = vadd.f32 %v7213_v18, %v7017_v61 }
 0x599   : > { %v13144_v0 = vadd.f32 %v7445_v16, %v7351_v33 }
 0x59c   : > { %9896 = vmatmul.msk.bf16.gmra.mxu2 %vm6833_vm10, %v12988_v52  ;;  %v7021_v29 = vpop.f32.mrf.mxu1 }
 0x59d   : > { %v7447_v38 = vpop.f32.mrf.mxu0  ;;  %v7022_v40 = vadd.f32 %v7021_v29, %v13085_v23 }
 0x59e   : > { %v7319_v45 = vpop.f32.mrf.mxu3 }
 0x59f   : > { %v7352_v22 = vadd.f32 %v7319_v45, %v7246_v63  ;;  %v7216_v19 = vpop.f32.mrf.mxu2  ;;  %v7497_v45 = vrot.slane %v13066_v59, 5 }
 0x5a0   : > { %v7247_v17 = vadd.f32 %v7216_v19, %v7020_v31 }
 0x5a1   : > { %v13149_v3 = vadd.f32 %v7447_v38, %v7352_v22  ;;  %v13187_v38 = vld [vmem:[#allocation3 + $0xd8] sm:$0xf] }
 0x5a3   : > { %9928 = vmatmul.msk.bf16.gmra.mxu3 %vm6833_vm10, %v12855_v44 }
 0x5a4   : > { %v7024_v28 = vpop.f32.mrf.mxu1 }
 0x5a5   : > { %v7450_v27 = vpop.f32.mrf.mxu0  ;;  %v7025_v4 = vadd.f32 %v7024_v28, %v13048_v35 }
 0x5a6   : > { %v7322_v30 = vpop.f32.mrf.mxu3 }
 0x5a7   : > { %v7353_v14 = vadd.f32 %v7322_v30, %v7247_v17  ;;  %v7218_v52 = vpop.f32.mrf.mxu2  ;;  %9861 = vmatmul.msk.bf16.gmra.mxu1 %vm6833_vm10, %v13009_v62  ;;  %v7713_v30 = vshll.u32 %v13187_v38, 16 }
 0x5a8   : > { %9961 = vmatmul.msk.bf16.gmra.mxu0 %vm6833_vm10, %v13009_v62  ;;  %v7248_v23 = vadd.f32 %v7218_v52, %v7022_v40 }
 0x5a9   : > { %v13157_v24 = vadd.f32 %v7450_v27, %v7353_v14 }
 0x5ac   : > { %9897 = vmatmul.msk.bf16.gmra.mxu2 %vm6833_vm10, %v13025_v39  ;;  %v7026_v44 = vpop.f32.mrf.mxu1 }
 0x5ad   : > { %v7452_v2 = vpop.f32.mrf.mxu0  ;;  %v7027_v7 = vadd.f32 %v7026_v44, %v13072_v21  ;;  %v7715_v44 = vrot.slane %v7713_v30, 5 }
 0x5ae   : > { %v7324_v60 = vpop.f32.mrf.mxu3 }
 0x5af   : > { %v7354_v51 = vadd.f32 %v7324_v60, %v7248_v23  ;;  %v7221_v32 = vpop.f32.mrf.mxu2 }
 0x5b0   : > { %v7249_v57 = vadd.f32 %v7221_v32, %v7025_v4 }
 0x5b1   : > { %v13165_v62 = vadd.f32 %v7452_v2, %v7354_v51  ;;  %v6572_v51 = vld [vmem:[#allocation3 + $0xe8] sm:$0x1] }
 0x5b3   : > { %9929 = vmatmul.msk.bf16.gmra.mxu3 %vm6833_vm10, %v12766_v12 }
 0x5b4   : > { %v7029_v39 = vpop.f32.mrf.mxu1 }
 0x5b5   : > { %v7455_v61 = vpop.f32.mrf.mxu0  ;;  %v7030_v8 = vadd.f32 %v7029_v39, %v13093_v54 }
 0x5b6   : > { %v7327_v35 = vpop.f32.mrf.mxu3 }
 0x5b7   : > { %v7355_v49 = vadd.f32 %v7327_v35, %v7249_v57  ;;  %v7223_v37 = vpop.f32.mrf.mxu2  ;;  %9862 = vmatmul.msk.bf16.gmra.mxu1 %vm6833_vm10, %v13039_v6 }
 0x5b8   : > { %9962 = vmatmul.msk.bf16.gmra.mxu0 %vm6833_vm10, %v13039_v6  ;;  %v7250_v20 = vadd.f32 %v7223_v37, %v7027_v7  ;;  %v7494_v6 = vrot.slane %v13044_v36, 5  ;;  %v7710_v36 = vshrl.u32 %v13187_v38, 16 }
 0x5b9   : > { %v13177_v58 = vadd.f32 %v7455_v61, %v7355_v49  ;;  %v7729_v49 = vshll.u32 %v6572_v51, 16 }
 0x5ba   : > { %v7496_v28 = vrot.slane %v7494_v6, 4 }
 0x5bc   : > { %9898 = vmatmul.msk.bf16.gmra.mxu2 %vm6833_vm10, %v13058_v25  ;;  %v7031_v12 = vpop.f32.mrf.mxu1  ;;  %v13189_v25 = vld [vmem:[#allocation3 + $0xe0] sm:$0xf] }
 0x5bd   : > { %v7457_v16 = vpop.f32.mrf.mxu0  ;;  %v7032_v54 = vadd.f32 %v7031_v12, %v13101_v13  ;;  %v7719_v59 = vshll.u32 %v13189_v25, 16  ;;  %v7723_v13 = vshrl.u32 %v13189_v25, 16 }
 0x5be   : > { %v7329_v31 = vpop.f32.mrf.mxu3 }
 0x5bf   : > { %v7356_v21 = vadd.f32 %v7329_v31, %v7250_v20  ;;  %v7226_v33 = vpop.f32.mrf.mxu2  ;;  %v7721_v2 = vrot.slane %v7719_v59, 5  ;;  %v7725_v60 = vrot.slane %v7723_v13, 4  ;;  %v7731_v31 = vrot.slane %v7729_v49, 5 }
 0x5c0   : > { %v7251_v18 = vadd.f32 %v7226_v33, %v7030_v8  ;;  %v7840_v33 = vrot.slane %v13189_v25, 5 }
 0x5c1   : > { %v13182_v63 = vadd.f32 %v7457_v16, %v7356_v21  ;;  %v7726_v7 = vor.u32 %v7725_v60, %v7721_v2  ;;  %v10172_v21 = vld [vmem:[#allocation3 + $0xdc] sm:$0xf0] }
 0x5c2   : > { %v7842_v25 = vrot.slane %v7840_v33, 4 }
 0x5c3   : > { %9930 = vmatmul.msk.bf16.gmra.mxu3 %vm6833_vm10, %v12878_v5  ;;  %v9832_v5 = vrot.slane %v13042_v26, 9  ;;  %v7498_v26 = vsel %vm12870_vm14, %v7496_v28, %v7497_v45  ;;  %v7727_v16 = vrot.slane %v7726_v7, 4 }
 0x5c4   : > { %v7034_v29 = vpop.f32.mrf.mxu1  ;;  %v7509_v39 = vunpack.c.l.b16 %v7498_v26 }
 0x5c5   : > { %v7460_v40 = vpop.f32.mrf.mxu0  ;;  %v7495_v52 = vsel %vm12870_vm14, %v9832_v5, %v7494_v6  ;;  %v7035_v57 = vadd.f32 %v7034_v29, %v13064_v15  ;;  %v9875_v15 = vld [vmem:[#allocation3 + $0xd8] sm:$0xf] }
 0x5c6   : > { %v7332_v22 = vpop.f32.mrf.mxu3  ;;  %v7508_v47 = vunpack.c.l.b16 %v7495_v52  ;;  %v9876_v45 = vor.u32 %v10172_v21, %v9875_v15  ;;  %v7949_v15 = vld [vmem:[#allocation2 + $0x30] sm:$0xff] }
 0x5c7   : > { %v7357_v19 = vadd.f32 %v7332_v22, %v7251_v18  ;;  %v7228_v17 = vpop.f32.mrf.mxu2  ;;  %9863 = vmatmul.msk.bf16.gmra.mxu1 %vm6833_vm10, %v13079_v48 }
 0x5c8   : > { %9963 = vmatmul.msk.bf16.gmra.mxu0 %vm6833_vm10, %v13079_v48  ;;  %v7252_v27 = vadd.f32 %v7228_v17, %v7032_v54  ;;  %v7712_v48 = vrot.slane %v7710_v36, 4  ;;  %v7732_v54 = vsel %vm12679_vm11, %v7727_v16, %v7731_v31  ;;  %v7843_v17 = vrot.slane %v6572_v51, 5 }
 0x5c9   : > { %v13202_v14 = vadd.f32 %v7460_v40, %v7357_v19  ;;  %v9933_v19 = vrot.slane %v13187_v38, 9  ;;  %v7743_v28 = vunpack.c.l.b16 %v7732_v54 }
 0x5ca   : > { %v7716_v35 = vor.u32 %v7715_v44, %v7712_v48  ;;  %v7844_v59 = vsel %vm12870_vm14, %v7842_v25, %v7843_v17 }
 0x5cb   : > { %v7841_v30 = vsel %vm12870_vm14, %v9933_v19, %v7840_v33  ;;  %v7855_v48 = vunpack.c.l.b16 %v7844_v59 }
 0x5cc   : > { %9899 = vmatmul.msk.bf16.gmra.mxu2 %vm6833_vm10, %v13091_v41  ;;  %v7036_v23 = vpop.f32.mrf.mxu1  ;;  %v7510_v41 = vpack.c.b16 %v7509_v39, %v7508_v47  ;;  %v7717_v12 = vrot.slane %v7716_v35, 4 }
 0x5cd   : > { %v7462_v4 = vpop.f32.mrf.mxu0  ;;  %v7037_v6 = vadd.f32 %v7036_v23, %v13081_v9  ;;  %v7854_v23 = vunpack.c.l.b16 %v7841_v30  ;;  %v7951_v30 = vld [vmem:[#allocation2 + $0x58] sm:$0xff] }
 0x5ce   : > { %v7334_v32 = vpop.f32.mrf.mxu3  ;;  %v7722_v22 = vsel %vm12679_vm11, %v7717_v12, %v7721_v2 }
 0x5cf   : > { %v7358_v42 = vadd.f32 %v7334_v32, %v7252_v27  ;;  %v7231_v50 = vpop.f32.mrf.mxu2  ;;  %v7742_v9 = vunpack.c.l.b16 %v7722_v22  ;;  %v7856_v60 = vpack.c.b16 %v7855_v48, %v7854_v23  ;;  %v7950_v22 = vld [vmem:[#allocation2] sm:$0xff] }
 0x5d0   : > { %v7253_v61 = vadd.f32 %v7231_v50, %v7035_v57 }
 0x5d1   : > { %v13211_v37 = vadd.f32 %v7462_v4, %v7358_v42  ;;  %v7744_v52 = vpack.c.b16 %v7743_v28, %v7742_v9 }
 0x5d3   : > { %9931 = vmatmul.msk.bf16.gmra.mxu3 %vm6833_vm10, %v13097_v10 }
 0x5d4   : > { %v7039_v20 = vpop.f32.mrf.mxu1 }
 0x5d5   : > { %v7465_v8 = vpop.f32.mrf.mxu0  ;;  %v7040_v13 = vadd.f32 %v7039_v20, %v13099_v46 }
 0x5d6   : > { %v7337_v18 = vpop.f32.mrf.mxu3 }
 0x5d7   : > { %v7359_v29 = vadd.f32 %v7337_v18, %v7253_v61  ;;  %v7233_v40 = vpop.f32.mrf.mxu2  ;;  %9864 = vmatmul.msk.bf16.gmra.mxu1 %vm6833_vm10, %v7510_v41 }
 0x5d8   : > { %9964 = vmatmul.msk.bf16.gmra.mxu0 %vm6833_vm10, %v7510_v41  ;;  %v7254_v10 = vadd.f32 %v7233_v40, %v7037_v6 }
 0x5d9   : > { %v13224_v5 = vadd.f32 %v7465_v8, %v7359_v29 }
 0x5dc   : > { %9900 = vmatmul.msk.bf16.gmra.mxu2 %vm6833_vm10, %v9876_v45  ;;  %v7041_v36 = vpop.f32.mrf.mxu1 }
 0x5dd   : > { %v7467_v27 = vpop.f32.mrf.mxu0  ;;  %v7042_v56 = vadd.f32 %v7041_v36, %v13109_v43 }
 0x5de   : > { %v7339_v1 = vpop.f32.mrf.mxu3 }
 0x5df   : > { %v7360_v38 = vadd.f32 %v7339_v1, %v7254_v10  ;;  %v7236_v26 = vpop.f32.mrf.mxu2 }
 0x5e0   : > { %v7255_v44 = vadd.f32 %v7236_v26, %v7040_v13 }
 0x5e1   : > { %v13232_v2 = vadd.f32 %v7467_v27, %v7360_v38 }
 0x5e3   : > { %9932 = vmatmul.msk.bf16.gmra.mxu3 %vm6833_vm10, %v7744_v52 }
 0x5e4   : > { %v7547_v4 = vpop.f32.mrf.mxu1 }
 0x5e5   : > { %v7470_v51 = vpop.f32.mrf.mxu0  ;;  %v7587_v49 = vadd.f32 %v7547_v4, %v13117_v55 }
 0x5e6   : > { %v7342_v32 = vpop.f32.mrf.mxu3 }
 0x5e7   : > { %v7361_v57 = vadd.f32 %v7342_v32, %v7255_v44  ;;  %v7238_v42 = vpop.f32.mrf.mxu2  ;;  %v7952_v44 = vld [vmem:[#allocation2 + $0x18] sm:$0xff] }
 0x5e8   : > { %9965 = vmatmul.msk.bf16.gmra.mxu0 %vm6833_vm10, %v7856_v60  ;;  %v7256_v46 = vadd.f32 %v7238_v42, %v7042_v56 }
 0x5e9   : > { %v13237_v47 = vadd.f32 %v7470_v51, %v7361_v57 }
 0x5ec   : > { %v7549_v39 = vpop.f32.mrf.mxu1 }
 0x5ed   : > { %v7472_v50 = vpop.f32.mrf.mxu0  ;;  %v7588_v33 = vadd.f32 %v7549_v39, %v13121_v34  ;;  %v7953_v39 = vld [vmem:[#allocation2 + $0x50] sm:$0xff] }
 0x5ee   : > { %v7344_v61 = vpop.f32.mrf.mxu3 }
 0x5ef   : > { %v7362_v35 = vadd.f32 %v7344_v61, %v7256_v46  ;;  %v7653_v7 = vpop.f32.mrf.mxu2 }
 0x5f0   : > { %v7693_v20 = vadd.f32 %v7653_v7, %v7587_v49 }
 0x5f1   : > { %v13240_v41 = vadd.f32 %v7472_v50, %v7362_v35 }
 0x5f4   : > { %v7552_v12 = vpop.f32.mrf.mxu1 }
 0x5f5   : > { %v7893_v16 = vpop.f32.mrf.mxu0  ;;  %v7589_v19 = vadd.f32 %v7552_v12, %v13130_v11 }
 0x5f6   : > { %v7781_v43 = vpop.f32.mrf.mxu3 }
 0x5f7   : > { %v7821_v31 = vadd.f32 %v7781_v43, %v7693_v20  ;;  %v7655_v8 = vpop.f32.mrf.mxu2  ;;  %v7954_v43 = vld [vmem:[#allocation2 + $0x68] sm:$0xff] }
 0x5f8   : > { %v7694_v6 = vadd.f32 %v7655_v8, %v7588_v33 }
 0x5f9   : > { %v7933_v21 = vadd.f32 %v7893_v16, %v7821_v31 }
 0x5fb   : > { %v7965_v18 = vadd.f32 %v7949_v15, %v7933_v21 }
 0x5fc   : > { %v7554_v29 = vpop.f32.mrf.mxu1 }
 0x5fd   : > { %7981 = vst [vmem:[#allocation2 + $0x30] sm:$0xff] %v7965_v18  ;;  %v7895_v40 = vpop.f32.mrf.mxu0  ;;  %v7590_v1 = vadd.f32 %v7554_v29, %v13135_v53 }
 0x5fe   : > { %v7783_v10 = vpop.f32.mrf.mxu3 }
 0x5ff   : > { %v7822_v45 = vadd.f32 %v7783_v10, %v7694_v6  ;;  %v7658_v55 = vpop.f32.mrf.mxu2 }
 0x600   : > { %v7695_v17 = vadd.f32 %v7658_v55, %v7589_v19 }
 0x601   : > { %v7934_v54 = vadd.f32 %v7895_v40, %v7822_v45  ;;  %v7955_v40 = vld [vmem:[#allocation2 + $0x8] sm:$0xff] }
 0x603   : > { %v7966_v25 = vadd.f32 %v7950_v22, %v7934_v54 }
 0x604   : > { %v7557_v9 = vpop.f32.mrf.mxu1 }
 0x605   : > { %7982 = vst [vmem:[#allocation2] sm:$0xff] %v7966_v25  ;;  %v7898_v28 = vpop.f32.mrf.mxu0  ;;  %v7591_v4 = vadd.f32 %v7557_v9, %v13144_v0  ;;  %v7956_v9 = vld [vmem:[#allocation2 + $0x48] sm:$0xff] }
 0x606   : > { %v7786_v36 = vpop.f32.mrf.mxu3 }
 0x607   : > { %v7823_v27 = vadd.f32 %v7786_v36, %v7695_v17  ;;  %v7660_v34 = vpop.f32.mrf.mxu2 }
 0x608   : > { %v7696_v38 = vadd.f32 %v7660_v34, %v7590_v1 }
 0x609   : > { %v7935_v59 = vadd.f32 %v7898_v28, %v7823_v27 }
 0x60b   : > { %v7967_v13 = vadd.f32 %v7951_v30, %v7935_v59 }
 0x60c   : > { %v7559_v52 = vpop.f32.mrf.mxu1 }
 0x60d   : > { %7983 = vst [vmem:[#allocation2 + $0x58] sm:$0xff] %v7967_v13  ;;  %v7900_v26 = vpop.f32.mrf.mxu0  ;;  %v7592_v61 = vadd.f32 %v7559_v52, %v13149_v3 }
 0x60e   : > { %v7788_v23 = vpop.f32.mrf.mxu3 }
 0x60f   : > { %v7824_v48 = vadd.f32 %v7788_v23, %v7696_v38  ;;  %v7663_v11 = vpop.f32.mrf.mxu2  ;;  %v7957_v38 = vld [vmem:[#allocation2 + $0x40] sm:$0xff] }
 0x610   : > { %v7697_v32 = vadd.f32 %v7663_v11, %v7591_v4 }
 0x611   : > { %v7936_v60 = vadd.f32 %v7900_v26, %v7824_v48 }
 0x613   : > { %v7968_v51 = vadd.f32 %v7952_v44, %v7936_v60 }
 0x614   : > { %v7562_v56 = vpop.f32.mrf.mxu1 }
 0x615   : > { %7984 = vst [vmem:[#allocation2 + $0x18] sm:$0xff] %v7968_v51  ;;  %v7903_v57 = vpop.f32.mrf.mxu0  ;;  %v7593_v8 = vadd.f32 %v7562_v56, %v13157_v24  ;;  %v7958_v51 = vld [vmem:[#allocation2 + $0x20] sm:$0xff] }
 0x616   : > { %v7791_v42 = vpop.f32.mrf.mxu3 }
 0x617   : > { %v7825_v46 = vadd.f32 %v7791_v42, %v7697_v32  ;;  %v7665_v53 = vpop.f32.mrf.mxu2 }
 0x618   : > { %v7698_v7 = vadd.f32 %v7665_v53, %v7592_v61  ;;  %v7959_v61 = vld [vmem:[#allocation2 + $0x10] sm:$0xff] }
 0x619   : > { %v7937_v50 = vadd.f32 %v7903_v57, %v7825_v46 }
 0x61b   : > { %v7969_v35 = vadd.f32 %v7953_v39, %v7937_v50 }
 0x61c   : > { %v7564_v49 = vpop.f32.mrf.mxu1 }
 0x61d   : > { %7985 = vst [vmem:[#allocation2 + $0x50] sm:$0xff] %v7969_v35  ;;  %v7905_v20 = vpop.f32.mrf.mxu0  ;;  %v7594_v45 = vadd.f32 %v7564_v49, %v13165_v62 }
 0x61e   : > { %v7793_v12 = vpop.f32.mrf.mxu3 }
 0x61f   : > { %v7826_v16 = vadd.f32 %v7793_v12, %v7698_v7  ;;  %v7668_v0 = vpop.f32.mrf.mxu2 }
 0x620   : > { %v7699_v21 = vadd.f32 %v7668_v0, %v7593_v8 }
 0x621   : > { %v7938_v31 = vadd.f32 %v7905_v20, %v7826_v16 }
 0x623   : > { %v7970_v15 = vadd.f32 %v7954_v43, %v7938_v31 }
 0x624   : > { %v7567_v33 = vpop.f32.mrf.mxu1 }
 0x625   : > { %7986 = vst [vmem:[#allocation2 + $0x68] sm:$0xff] %v7970_v15  ;;  %v7908_v18 = vpop.f32.mrf.mxu0  ;;  %v7595_v36 = vadd.f32 %v7567_v33, %v13177_v58 }
 0x626   : > { %v7796_v6 = vpop.f32.mrf.mxu3 }
 0x627   : > { %v7827_v29 = vadd.f32 %v7796_v6, %v7699_v21  ;;  %v7670_v3 = vpop.f32.mrf.mxu2 }
 0x628   : > { %v7700_v22 = vadd.f32 %v7670_v3, %v7594_v45 }
 0x629   : > { %v7939_v10 = vadd.f32 %v7908_v18, %v7827_v29 }
 0x62b   : > { %v7971_v55 = vadd.f32 %v7955_v40, %v7939_v10 }
 0x62c   : > { %v7569_v54 = vpop.f32.mrf.mxu1 }
 0x62d   : > { %7987 = vst [vmem:[#allocation2 + $0x8] sm:$0xff] %v7971_v55  ;;  %v7910_v19 = vpop.f32.mrf.mxu0  ;;  %v7596_v26 = vadd.f32 %v7569_v54, %v13182_v63 }
 0x62e   : > { %v7798_v25 = vpop.f32.mrf.mxu3 }
 0x62f   : > { %v7828_v17 = vadd.f32 %v7798_v25, %v7700_v22  ;;  %v7673_v24 = vpop.f32.mrf.mxu2 }
 0x630   : > { %v7701_v34 = vadd.f32 %v7673_v24, %v7595_v36 }
 0x631   : > { %v7940_v28 = vadd.f32 %v7910_v19, %v7828_v17  ;;  %v7962_v17 = vld [vmem:[#allocation2 + $0x70] sm:$0xff] }
 0x633   : > { %v7972_v27 = vadd.f32 %v7956_v9, %v7940_v28 }
 0x634   : > { %v7572_v30 = vpop.f32.mrf.mxu1 }
 0x635   : > { %7988 = vst [vmem:[#allocation2 + $0x48] sm:$0xff] %v7972_v27  ;;  %v7913_v59 = vpop.f32.mrf.mxu0  ;;  %v7597_v56 = vadd.f32 %v7572_v30, %v13202_v14  ;;  %v7960_v14 = vld [vmem:[#allocation2 + $0x38] sm:$0xff] }
 0x636   : > { %v7801_v1 = vpop.f32.mrf.mxu3 }
 0x637   : > { %v7829_v13 = vadd.f32 %v7801_v1, %v7701_v34  ;;  %v7675_v62 = vpop.f32.mrf.mxu2 }
 0x638   : > { %v7702_v48 = vadd.f32 %v7675_v62, %v7596_v26 }
 0x639   : > { %v7941_v52 = vadd.f32 %v7913_v59, %v7829_v13 }
 0x63b   : > { %v7973_v23 = vadd.f32 %v7957_v38, %v7941_v52 }
 0x63c   : > { %v7574_v44 = vpop.f32.mrf.mxu1 }
 0x63d   : > { %7989 = vst [vmem:[#allocation2 + $0x40] sm:$0xff] %v7973_v23  ;;  %v7915_v11 = vpop.f32.mrf.mxu0  ;;  %v7598_v7 = vadd.f32 %v7574_v44, %v13211_v37  ;;  %v7961_v37 = vld [vmem:[#allocation2 + $0x60] sm:$0xff] }
 0x63e   : > { %v7803_v60 = vpop.f32.mrf.mxu3 }
 0x63f   : > { %v7830_v4 = vadd.f32 %v7803_v60, %v7702_v48  ;;  %v7678_v58 = vpop.f32.mrf.mxu2 }
 0x640   : > { %v7703_v42 = vadd.f32 %v7678_v58, %v7597_v56 }
 0x641   : > { %v7942_v32 = vadd.f32 %v7915_v11, %v7830_v4  ;;  %v7964_v11 = vld [vmem:[#allocation2 + $0x28] sm:$0xff] }
 0x643   : > { %v7974_v57 = vadd.f32 %v7958_v51, %v7942_v32 }
 0x644   : > { %v7577_v63 = vpop.f32.mrf.mxu1 }
 0x645   : > { %7990 = vst [vmem:[#allocation2 + $0x20] sm:$0xff] %v7974_v57  ;;  %v7918_v46 = vpop.f32.mrf.mxu0  ;;  %v7599_v8 = vadd.f32 %v7577_v63, %v13224_v5 }
 0x646   : > { %v7806_v53 = vpop.f32.mrf.mxu3 }
 0x647   : > { %v7831_v39 = vadd.f32 %v7806_v53, %v7703_v42  ;;  %v7680_v50 = vpop.f32.mrf.mxu2 }
 0x648   : > { %v7704_v20 = vadd.f32 %v7680_v50, %v7598_v7 }
 0x649   : > { %v7943_v35 = vadd.f32 %v7918_v46, %v7831_v39 }
 0x64b   : > { %v7975_v49 = vadd.f32 %v7959_v61, %v7943_v35 }
 0x64c   : > { %v7579_v15 = vpop.f32.mrf.mxu1 }
 0x64d   : > { %7991 = vst [vmem:[#allocation2 + $0x10] sm:$0xff] %v7975_v49  ;;  %v7920_v12 = vpop.f32.mrf.mxu0  ;;  %v7600_v10 = vadd.f32 %v7579_v15, %v13232_v2  ;;  %v7963_v2 = vld [vmem:[#allocation2 + $0x78] sm:$0xff] }
 0x64e   : > { %v7808_v16 = vpop.f32.mrf.mxu3 }
 0x64f   : > { %v7832_v0 = vadd.f32 %v7808_v16, %v7704_v20  ;;  %v7683_v43 = vpop.f32.mrf.mxu2 }
 0x650   : > { %v7705_v33 = vadd.f32 %v7683_v43, %v7599_v8 }
 0x651   : > { %v7944_v31 = vadd.f32 %v7920_v12, %v7832_v0 }
 0x653   : > { %v7976_v21 = vadd.f32 %v7960_v14, %v7944_v31 }
 0x654   : > { %v7582_v22 = vpop.f32.mrf.mxu1 }
 0x655   : > { %7992 = vst [vmem:[#allocation2 + $0x38] sm:$0xff] %v7976_v21  ;;  %v7923_v18 = vpop.f32.mrf.mxu0  ;;  %v7601_v9 = vadd.f32 %v7582_v22, %v13237_v47 }
 0x656   : > { %v7811_v6 = vpop.f32.mrf.mxu3 }
 0x657   : > { %v7833_v29 = vadd.f32 %v7811_v6, %v7705_v33  ;;  %v7685_v3 = vpop.f32.mrf.mxu2 }
 0x658   : > { %v7706_v55 = vadd.f32 %v7685_v3, %v7600_v10 }
 0x659   : > { %v7945_v40 = vadd.f32 %v7923_v18, %v7833_v29 }
 0x65b   : > { %v7977_v45 = vadd.f32 %v7961_v37, %v7945_v40 }
 0x65c   : > { %v7584_v27 = vpop.f32.mrf.mxu1 }
 0x65d   : > { %7993 = vst [vmem:[#allocation2 + $0x60] sm:$0xff] %v7977_v45  ;;  %v7925_v54 = vpop.f32.mrf.mxu0  ;;  %v7602_v62 = vadd.f32 %v7584_v27, %v13240_v41 }
 0x65e   : > { %v7813_v19 = vpop.f32.mrf.mxu3 }
 0x65f   : > { %v7834_v25 = vadd.f32 %v7813_v19, %v7706_v55  ;;  %v7688_v5 = vpop.f32.mrf.mxu2 }
 0x660   : > { %v7707_v36 = vadd.f32 %v7688_v5, %v7601_v9 }
 0x661   : > { %v7946_v24 = vadd.f32 %v7925_v54, %v7834_v25 }
 0x663   : > { %v7978_v28 = vadd.f32 %v7962_v17, %v7946_v24 }
 0x665   : > { %7994 = vst [vmem:[#allocation2 + $0x70] sm:$0xff] %v7978_v28  ;;  %v7928_v34 = vpop.f32.mrf.mxu0 }
 0x666   : > { %v7816_v30 = vpop.f32.mrf.mxu3 }
 0x667   : > { %v7835_v59 = vadd.f32 %v7816_v30, %v7707_v36  ;;  %v7690_v1 = vpop.f32.mrf.mxu2 }
 0x668   : > { %v7708_v52 = vadd.f32 %v7690_v1, %v7602_v62 }
 0x669   : > { %v7947_v13 = vadd.f32 %v7928_v34, %v7835_v59 }
 0x66b   : > { %v7979_v38 = vadd.f32 %v7963_v2, %v7947_v13 }
 0x66d   : > { %7995 = vst [vmem:[#allocation2 + $0x78] sm:$0xff] %v7979_v38  ;;  %v7930_v48 = vpop.f32.mrf.mxu0 }
 0x66e   : > { %v7818_v26 = vpop.f32.mrf.mxu3 }
 0x66f   : > { %v7836_v23 = vadd.f32 %v7818_v26, %v7708_v52 }
 0x671   : > { %v7948_v47 = vadd.f32 %v7930_v48, %v7836_v23 }
 0x673   : > { %v7980_v44 = vadd.f32 %v7964_v11, %v7948_v47 }
 0x675   : > { %7996 = vst [vmem:[#allocation2 + $0x28] sm:$0xff] %v7980_v44 }
 0x676 PF: > { %s13631_s1 = sld [smem:[#allocation17_spill]] }
 0x67c   : > { %p9966_p1 = scmp.ne.s32.totalorder %s13631_s1, 2 }
 0x67d   : > { %s13632_s12 = sld [smem:[#allocation54_spill]] (!%p9966_p1) }
 0x67e   : > { %8000 = sbr.rel (%p9966_p1) target bundleno = 1762 (0x6e2), region = 220 }
 0x683   : > { %v8001_v60 = vld [vmem:[#allocation2 + $0x30] sm:$0xff]  ;;  %v8002_v4 = vld [vmem:[#allocation2] sm:$0xff]  ;;  %v8003_v58 = vld [vmem:[#allocation2 + $0x58] sm:$0xff]  ;;  %v10940_v27 = vmov 128.0  }
 0x684   : > { %v10587_v41 = vld [vmem:[%s13632_s12] ss:$0 sm:$0xff]  ;;  %v8004_v51 = vld [vmem:[#allocation2 + $0x18] sm:$0xff]  ;;  %v8005_v32 = vld [vmem:[#allocation2 + $0x50] sm:$0xff]  ;;  %10588 = vrcp.f32 %v10940_v27 }
 0x685   : > { %v8006_v56 = vld [vmem:[#allocation2 + $0x68] sm:$0xff]  ;;  %v13261_v42 = vadd.f32 %v10587_v41, %v8001_v60  ;;  %v13263_v46 = vadd.f32 %v10587_v41, %v8002_v4  ;;  %v13265_v53 = vadd.f32 %v10587_v41, %v8003_v58  ;;  %v13267_v39 = vadd.f32 %v10587_v41, %v8004_v51  ;;  %v8009_v63 = vld [vmem:[#allocation2 + $0x40] sm:$0xff]  ;;  %v8011_v12 = vld [vmem:[#allocation2 + $0x10] sm:$0xff] }
 0x686   : > { %v8007_v57 = vld [vmem:[#allocation2 + $0x8] sm:$0xff]  ;;  %v8010_v61 = vld [vmem:[#allocation2 + $0x20] sm:$0xff]  ;;  %v13269_v35 = vadd.f32 %v10587_v41, %v8005_v32  ;;  %v13271_v7 = vadd.f32 %v10587_v41, %v8006_v56  ;;  %v8012_v16 = vld [vmem:[#allocation2 + $0x38] sm:$0xff]  ;;  %v13283_v8 = vadd.f32 %v10587_v41, %v8009_v63  ;;  %v13291_v6 = vadd.f32 %v10587_v41, %v8011_v12 }
 0x687   : > { %v8008_v50 = vld [vmem:[#allocation2 + $0x48] sm:$0xff]  ;;  %v13273_v49 = vadd.f32 %v10587_v41, %v8007_v57  ;;  %v8013_v0 = vld [vmem:[#allocation2 + $0x60] sm:$0xff]  ;;  %v8037_v43 = vadd.f32 %v13263_v46, %v13261_v42  ;;  %v10213_v14 = vpack.c.bf16 %v13263_v46, %v13261_v42  ;;  %v10218_v31 = vpack.c.bf16 %v13267_v39, %v13265_v53  ;;  %v8014_v15 = vld [vmem:[#allocation2 + $0x70] sm:$0xff] }
 0x688   : > { %v13275_v20 = vadd.f32 %v10587_v41, %v8008_v50  ;;  %v10223_v21 = vpack.c.bf16 %v13271_v7, %v13269_v35  ;;  %v13289_v18 = vadd.f32 %v10587_v41, %v8010_v61  ;;  %v13295_v3 = vadd.f32 %v10587_v41, %v8012_v16  ;;  %v8015_v25 = vld [vmem:[#allocation2 + $0x78] sm:$0xff]  ;;  %v8016_v5 = vld [vmem:[#allocation2 + $0x28] sm:$0xff] }
 0x689   : > { %10214 = vst [vmem:[%s11742_s16] sm:$0xff] %v10213_v14   ;;  %v8038_v29 = vadd.f32 %v8037_v43, %v13265_v53  ;;  %v13297_v37 = vadd.f32 %v10587_v41, %v8013_v0  ;;  %v13299_v40 = vadd.f32 %v10587_v41, %v8014_v15  ;;  %v13318_v9 = vadd.f32 %v10587_v41, %v8015_v25 }
 0x68a   : > { %v10228_v33 = vpack.c.bf16 %v13275_v20, %v13273_v49  ;;  %10250 = vst [vmem:[%s11742_s16 + $0x8] sm:$0xff] %v10218_v31   ;;  %v10233_v10 = vpack.c.bf16 %v13289_v18, %v13283_v8  ;;  %v10238_v55 = vpack.c.bf16 %v13295_v3, %v13291_v6  ;;  %v13320_v28 = vadd.f32 %v10587_v41, %v8016_v5  ;;  %v10589_v2 = vpop.eup %10588 }
 0x68b   : > { %v8039_v45 = vadd.f32 %v8038_v29, %v13267_v39  ;;  %10251 = vst [vmem:[%s11742_s16 + $0x10] sm:$0xff] %v10223_v21   ;;  %v10243_v22 = vpack.c.bf16 %v13299_v40, %v13297_v37  ;;  %v8059_v62 = vmul.f32 128.0, %v10589_v2  ;;  %vm8063_vm15 = vweird.f32 %v10589_v2 }
 0x68c   : > { %10252 = vst [vmem:[%s11742_s16 + $0x18] sm:$0xff] %v10228_v33   ;;  %v10248_v34 = vpack.c.bf16 %v13320_v28, %v13318_v9 }
 0x68d   : > { %v8040_v54 = vadd.f32 %v8039_v45, %v13269_v35  ;;  %10253 = vst [vmem:[%s11742_s16 + $0x20] sm:$0xff] %v10233_v10   ;;  %v8060_v26 = vsub.f32 1.0, %v8059_v62 }
 0x68e   : > { %10254 = vst [vmem:[%s11742_s16 + $0x28] sm:$0xff] %v10238_v55  }
 0x68f   : > { %v8041_v19 = vadd.f32 %v8040_v54, %v13271_v7  ;;  %10255 = vst [vmem:[%s11742_s16 + $0x30] sm:$0xff] %v10243_v22   ;;  %v8061_v11 = vmul.f32 %v10589_v2, %v8060_v26 }
 0x690   : > { %10256 = vst [vmem:[%s11742_s16 + $0x38] sm:$0xff] %v10248_v34  }
 0x691   : > { %v8042_v17 = vadd.f32 %v8041_v19, %v13273_v49  ;;  %v8062_v60 = vadd.f32 %v10589_v2, %v8061_v11 }
 0x693   : > { %v8043_v24 = vadd.f32 %v8042_v17, %v13275_v20  ;;  %v8064_v58 = vsel %vm8063_vm15, %v10589_v2, %v8062_v60 }
 0x695   : > { %v8044_v36 = vadd.f32 %v8043_v24, %v13283_v8 }
 0x697   : > { %v8045_v30 = vadd.f32 %v8044_v36, %v13289_v18 }
 0x699   : > { %v8046_v59 = vadd.f32 %v8045_v30, %v13291_v6 }
 0x69b   : > { %v8047_v1 = vadd.f32 %v8046_v59, %v13295_v3 }
 0x69d   : > { %v8048_v13 = vadd.f32 %v8047_v1, %v13297_v37 }
 0x69f   : > { %v8049_v38 = vadd.f32 %v8048_v13, %v13299_v40 }
 0x6a1   : > { %v8050_v52 = vadd.f32 %v8049_v38, %v13318_v9 }
 0x6a3   : > { %v8051_v23 = vadd.f32 %v8050_v52, %v13320_v28 }
 0x6a5   : > { %v8052_v48 = vrot.slane %v8051_v23, 4 }
 0x6a7   : > { %v8053_v47 = vadd.f32 %v8052_v48, %v8051_v23 }
 0x6a9   : > { %v8054_v44 = vrot.slane %v8053_v47, 2 }
 0x6ab   : > { %v8055_v4 = vadd.f32 %v8054_v44, %v8053_v47 }
 0x6ad   : > { %v8056_v41 = vrot.slane %v8055_v4, 1 }
 0x6af   : > { %v8057_v51 = vadd.f32 %v8056_v41, %v8055_v4 }
 0x6b1   : > { %v8065_v32 = vmul.f32 %v8064_v58, %v8057_v51 }
 0x6b3   : > { %8151 = vst [vmem:[%s3444_s3] sm:$0x1] %v8065_v32  ;;  %v8066_v56 = vsub.f32 %v13261_v42, %v8065_v32  ;;  %v8067_v57 = vsub.f32 %v13263_v46, %v8065_v32  ;;  %v8068_v50 = vsub.f32 %v13265_v53, %v8065_v32  ;;  %v8069_v63 = vsub.f32 %v13267_v39, %v8065_v32 }
 0x6b4   : > { %v8070_v16 = vsub.f32 %v13269_v35, %v8065_v32  ;;  %v8071_v43 = vsub.f32 %v13271_v7, %v8065_v32  ;;  %v8072_v15 = vsub.f32 %v13273_v49, %v8065_v32  ;;  %v8073_v42 = vsub.f32 %v13275_v20, %v8065_v32 }
 0x6b5   : > { %v8082_v61 = vmul.f32 %v8066_v56, %v8066_v56  ;;  %v8083_v12 = vmul.f32 %v8067_v57, %v8067_v57  ;;  %v8084_v0 = vmul.f32 %v8068_v50, %v8068_v50  ;;  %v8085_v14 = vmul.f32 %v8069_v63, %v8069_v63 }
 0x6b6   : > { %v8086_v21 = vmul.f32 %v8070_v16, %v8070_v16  ;;  %v8087_v46 = vmul.f32 %v8071_v43, %v8071_v43  ;;  %v8074_v53 = vsub.f32 %v13283_v8, %v8065_v32  ;;  %v8088_v39 = vmul.f32 %v8072_v15, %v8072_v15 }
 0x6b7   : > { %v8098_v31 = vadd.f32 %v8083_v12, %v8082_v61  ;;  %v8075_v45 = vsub.f32 %v13289_v18, %v8065_v32  ;;  %v8089_v35 = vmul.f32 %v8073_v42, %v8073_v42  ;;  %v8076_v7 = vsub.f32 %v13291_v6, %v8065_v32 }
 0x6b8   : > { %v8090_v22 = vmul.f32 %v8074_v53, %v8074_v53  ;;  %v8077_v49 = vsub.f32 %v13295_v3, %v8065_v32  ;;  %v8078_v20 = vsub.f32 %v13297_v37, %v8065_v32  ;;  %v8079_v8 = vsub.f32 %v13299_v40, %v8065_v32 }
 0x6b9   : > { %v8099_v33 = vadd.f32 %v8098_v31, %v8084_v0  ;;  %v8091_v19 = vmul.f32 %v8075_v45, %v8075_v45  ;;  %v8092_v5 = vmul.f32 %v8076_v7, %v8076_v7  ;;  %v8080_v18 = vsub.f32 %v13318_v9, %v8065_v32 }
 0x6ba   : > { %v8093_v24 = vmul.f32 %v8077_v49, %v8077_v49  ;;  %v8094_v27 = vmul.f32 %v8078_v20, %v8078_v20  ;;  %v8081_v6 = vsub.f32 %v13320_v28, %v8065_v32  ;;  %v8095_v30 = vmul.f32 %v8079_v8, %v8079_v8 }
 0x6bb   : > { %v8100_v29 = vadd.f32 %v8099_v33, %v8085_v14  ;;  %v8096_v3 = vmul.f32 %v8080_v18, %v8080_v18 }
 0x6bc   : > { %v8097_v1 = vmul.f32 %v8081_v6, %v8081_v6 }
 0x6bd   : > { %v8101_v10 = vadd.f32 %v8100_v29, %v8086_v21 }
 0x6bf   : > { %v8102_v55 = vadd.f32 %v8101_v10, %v8087_v46 }
 0x6c1   : > { %v8103_v54 = vadd.f32 %v8102_v55, %v8088_v39 }
 0x6c3   : > { %v8104_v25 = vadd.f32 %v8103_v54, %v8089_v35 }
 0x6c5   : > { %v8105_v17 = vadd.f32 %v8104_v25, %v8090_v22 }
 0x6c7   : > { %v8106_v36 = vadd.f32 %v8105_v17, %v8091_v19 }
 0x6c9   : > { %v8107_v34 = vadd.f32 %v8106_v36, %v8092_v5 }
 0x6cb   : > { %v8108_v59 = vadd.f32 %v8107_v34, %v8093_v24 }
 0x6cd   : > { %v8109_v2 = vadd.f32 %v8108_v59, %v8094_v27 }
 0x6cf   : > { %v8110_v13 = vadd.f32 %v8109_v2, %v8095_v30 }
 0x6d1   : > { %v8111_v37 = vadd.f32 %v8110_v13, %v8096_v3 }
 0x6d3   : > { %v8112_v62 = vadd.f32 %v8111_v37, %v8097_v1 }
 0x6d5   : > { %v8113_v38 = vrot.slane %v8112_v62, 4 }
 0x6d7   : > { %v8114_v52 = vadd.f32 %v8113_v38, %v8112_v62 }
 0x6d9   : > { %v8115_v40 = vrot.slane %v8114_v52, 2 }
 0x6db   : > { %v8116_v26 = vadd.f32 %v8115_v40, %v8114_v52 }
 0x6dd   : > { %v8117_v23 = vrot.slane %v8116_v26, 1 }
 0x6df   : > { %v8118_v48 = vadd.f32 %v8117_v23, %v8116_v26 }
 0x6e1   : > { %8152 = vst [vmem:[%s13530_s14] sm:$0x1] %v8118_v48 }
 0x6e2 PF: > { %s13633_s29 = sadd.s32 4294967295, %s10872_s24   ;;  %s13634_s11 = sld [smem:[#allocation18_spill]] }
 0x6e3   : > { %s13355_s9 = sand.u32 1, %s13633_s29   ;;  %s13636_s4 = sld [smem:[#allocation56_spill]] }
 0x6e4   : > { %s8195_s20 = sshll.u32 %s3444_s3, 4  ;;  %s8159_s2 = scalar_lea.sflag [#allocation10], %s13355_s9  ;;  %s8196_s20 = int_to_ptr.vmem [resolvable:$true] %s8195_s20 }
 0x6e8   : > { %s9972_s25 = sshll.u32 %s13634_s11, 1 }
 0x6e9   : > { %s13359_s27 = sadd.s32 %s10852_s19, %s9972_s25  ;;  %s10610_s6 = scalar_lea.hbm %s13636_s4, 4 }
 0x6ea   : > { %s8193_s17 = scalar_lea.hbm %s13636_s4, %s13359_s27 }
 0x6eb   : > { %s8197_s0 = sshll.u32 %s8193_s17, 4  ;;  %s8198_s0 = int_to_ptr.hbm [resolvable:$true] %s8197_s0 }
 0x6ec   : > { %s10604_s7 = sshra.s32 %s8198_s0, 4  ;;  %s10605_s7 = int_to_ptr.hbm [resolvable:$true] %s10604_s7 }
 0x6ed   : > { %s10606_s21 = scalar_lea.hbm %s10605_s7, 1  ;;  %p10611_p0 = scmp.lt.s32.totalorder %s10605_s7, %s13636_s4 }
 0x6ee   : > { %p10607_p2 = scmp.ne.s32.totalorder %s10605_s7, %s10606_s21  ;;  %p10612_p7 = scmp.lt.s32.totalorder %s10610_s6, %s10606_s21 }
 0x6f0   : > { %p10608_p3 = pnand %p10607_p2, %p11149_p6  ;;  %p10613_p9 = por %p10612_p7, %p10611_p0 }
 0x6f2   : > { %p10609_p5 = pneg %p10608_p3 }
 0x6f4   : > { %p10614_p8 = pnand %p10613_p9, %p10609_p5 }
 0x6f6   : > { %10617 = shalt.err (!%p10614_p8)
}
 0x6f7   : > { %10297 = dma.vmem_to_hbm [thread:$0]  (%p11149_p6), %s8196_s20, 16, %s8198_s0, %s8159_s2  }
 0x6f8   : > { %s10209_s3 = sshll.u32 %s10852_s19, 4  ;;  %s9970_s25 = sshll.u32 %s13634_s11, 5 }
 0x6f9   : > { %s8174_s30 = sadd.s32 %s10209_s3, %s9970_s25  ;;  %s8177_s18 = sshll.u32 %s11742_s16, 4  ;;  %s8178_s18 = int_to_ptr.vmem [resolvable:$true] %s8177_s18 }
 0x6fa   : > { %s9971_s17 = sshll.u32 %s8174_s30, 2  ;;  %s13637_s1 = sld [smem:[#allocation55_spill]] }
 0x6fb   : > { %s13638_s14 = sld [smem:[#allocation57_spill]]  ;;  %s8154_s23 = scalar_lea.sflag [#allocation8], %s11720_s28 }
 0x700   : > { %s8176_s8 = scalar_lea.hbm %s13637_s1, %s9971_s17  ;;  %s10638_s11 = scalar_lea.hbm %s13637_s1, 256 }
 0x701   : > { %s8179_s6 = sshll.u32 %s8176_s8, 4  ;;  %s13639_s4 = smov %s13638_s14  ;;  %s8180_s6 = int_to_ptr.hbm [resolvable:$true] %s8179_s6 }
 0x702   : > { %s8208_s26 = scalar_lea.hbm %s13638_s14, %s13359_s27  ;;  %s10632_s22 = sshra.s32 %s8180_s6, 4  ;;  %s10633_s22 = int_to_ptr.hbm [resolvable:$true] %s10632_s22 }
 0x703   : > { %s10634_s20 = scalar_lea.hbm %s10633_s22, 64  ;;  %p10639_p4 = scmp.lt.s32.totalorder %s10633_s22, %s13637_s1 }
 0x704   : > { %p10635_p10 = scmp.ne.s32.totalorder %s10633_s22, %s10634_s20  ;;  %p10640_p1 = scmp.lt.s32.totalorder %s10638_s11, %s10634_s20 }
 0x706   : > { %p10636_p12 = pnand %p10635_p10, %p11149_p6  ;;  %p10641_p2 = por %p10640_p1, %p10639_p4 }
 0x708   : > { %p10637_p13 = pneg %p10636_p12 }
 0x70a   : > { %p10642_p3 = pnand %p10641_p2, %p10637_p13 }
 0x70c   : > { %10645 = shalt.err (!%p10642_p3)
}
 0x70d   : > { %s10941_s14 = smov 64   ;;  %s10942_s27 = smov 4  }
 0x70e   : > { %10296 = dma.vmem_to_hbm [thread:$0]  (%p11149_p6), %s8178_s18, 1024, %s8180_s6, %s8154_s23, %s10941_s14, %s10941_s14, %s10942_s27  }
 0x70f   : > { %s13640_s25 = scalar_lea.vmem [#allocation11], %s11720_s28  ;;  %s8212_s17 = sshll.u32 %s8208_s26, 4  ;;  %s8213_s17 = int_to_ptr.hbm [resolvable:$true] %s8212_s17 }
 0x710   : > { %s8210_s30 = sshll.u32 %s13640_s25, 4  ;;  %s10660_s7 = sshra.s32 %s8213_s17, 4  ;;  %s8211_s30 = int_to_ptr.vmem [resolvable:$true] %s8210_s30  ;;  %s10661_s7 = int_to_ptr.hbm [resolvable:$true] %s10660_s7 }
 0x711   : > { %s10662_s21 = scalar_lea.hbm %s10661_s7, 1  ;;  %s10666_s12 = scalar_lea.hbm %s13639_s4, 4 }
 0x712   : > { %p10663_p5 = scmp.ne.s32.totalorder %s10661_s7, %s10662_s21  ;;  %p10667_p9 = scmp.lt.s32.totalorder %s10661_s7, %s13639_s4 }
 0x713   : > { %p10668_p8 = scmp.lt.s32.totalorder %s10666_s12, %s10662_s21 }
 0x714   : > { %p10664_p0 = pnand %p10663_p5, %p11149_p6 }
 0x715   : > { %p10669_p10 = por %p10668_p8, %p10667_p9 }
 0x716   : > { %p10665_p7 = pneg %p10664_p0 }
 0x718   : > { %p10670_p12 = pnand %p10669_p10, %p10665_p7 }
 0x71a   : > { %10673 = shalt.err (!%p10670_p12)
}
 0x71b   : > { %10298 = dma.vmem_to_hbm [thread:$0]  (%p11149_p6), %s8211_s30, 16, %s8213_s17, %s8159_s2  }
 0x71c PF: > { %s13641_s23 = sld [smem:[#allocation14_spill]]  ;;  %p10312_p13 = scmp.ge.s32.totalorder %s10872_s24, 2 }
 0x71e   : > { %p10303_p4 = pnand %p10312_p13, %p11157_p11 }
 0x720   : > { %p10304_p1 = pneg %p10303_p4 }
 0x722   : > { %s8224_s26 = sand.u32 1, %s13641_s23  }
 0x723   : > { %s8225_s18 = scalar_lea.sflag [#allocation8], %s8224_s26 }
 0x724   : > { %10803 = dma.done.wait (%p10304_p1), %s8225_s18, 1024  }
 0x725   : > { %10805 = vsyncadd (%p10304_p1), %s8225_s18, 4294966272  ;;  %s13643_s6 = sadd.s32 4294967294, %s10872_s24  }
 0x726   : > { %s8234_s19 = sand.u32 1, %s13643_s6  }
 0x727   : > { %s8235_s16 = scalar_lea.sflag [#allocation10], %s8234_s19 }
 0x728   : > { %10807 = dma.done.wait (%p10304_p1), %s8235_s16, 32  }
 0x729   : > { %10809 = vsyncadd (%p10304_p1), %s8235_s16, 4294967264  ;;  %s26_s24 = sadd.s32 1, %s10872_s24   ;;  %s13645_s9 = sld [smem:[#allocation15_spill]] }
 0x72a   : > { %p13422_p6 = scmp.ge.s32.totalorder %s26_s24, 14   ;;  %s13646_s11 = sld [smem:[#allocation28_spill]] }
 0x72b   : > { %s13647_s2 = sld [smem:[#allocation27_spill]]  ;;  %s13657_s30 = smov %s10816_s10 }
 0x72c   : > { %s13648_s0 = sld [smem:[#allocation26_spill]]  ;;  %s13659_s12 = smov %s10828_s13 }
 0x72d   : > { %s13649_s16 = sld [smem:[#allocation16_spill]]  ;;  %s13661_s14 = smov %s10836_s15 }
 0x72e   : > { %s13650_s17 = sld [smem:[#allocation25_spill]] }
 0x72f   : > { %s13651_s18 = sld [smem:[#allocation19_spill]]  ;;  %s13658_s10 = smov %s13645_s9 }
 0x730   : > { %s13652_s19 = sld [smem:[#allocation20_spill]]  ;;  %25 = sbr.rel (!%p13422_p6) target bundleno = 22 (0x16), region = 399 }
 0x731   : > { %s13653_s20 = sld [smem:[#allocation21_spill]]  ;;  %s13660_s13 = smov %s13647_s2 }
 0x732   : > { %s13654_s21 = sld [smem:[#allocation22_spill]]  ;;  %s13662_s15 = smov %s13648_s0 }
 0x733   : > { %s13655_s22 = sld [smem:[#allocation23_spill]] }
 0x734   : > { %s13656_s23 = sld [smem:[#allocation24_spill]] }
 0x735   :  { %8249 = vsyncpa [#allocation8], 1 }
 0x736   :  { %8251 = vsyncpa [#allocation8 + $0x1], 1 }
 0x737   :  { %8252 = vsyncpa [#allocation10], 1 }
 0x738   :  { %8254 = vsyncpa [#allocation10 + $0x1], 1 }

</bundles_post_ra>
